<compile_context>
chip_gen: v7x
topology: tpu7x:2x2x1
jax: 0.10.0
libtpu: 0.0.40
codegen_flags: <defaults>
</compile_context>

<pallas_src>
import math

import numpy as np

import jax
import jax.numpy as jnp
from jax import lax
from jax.experimental import pallas as pl
from jax.experimental.pallas import tpu as pltpu


_VMEM = pl.BlockSpec(memory_space=pltpu.MemorySpace.VMEM)
_LN_EPS = 1e-5  # torch.nn.LayerNorm default


# ----------------------------------------------------------------------------
# Static constants (selectors / masks), built host-side with numpy
# ----------------------------------------------------------------------------

def _make_consts(B, Nc, Nt, nh, dh):
    H = nh * dh

    def attn_consts(Sq, Sk):
        Nq, Nk, Rq = B * Sq, B * Sk, nh * B * Sq
        rows = np.arange(Rq)
        # replicate query rows per head: qf[i, :] = q[i % Nq, :]
        rep = np.equal.outer(rows % Nq, np.arange(Nq)).astype(np.float32)
        # keep only the row's own head columns
        hmask = np.equal.outer(rows // Nq, np.arange(H) // dh).astype(np.float32)
        # additive bias: 0 for same-batch keys, -1e30 otherwise
        bias = np.where(np.equal.outer((rows % Nq) // Sq, np.arange(Nk) // Sk),
                        0.0, -1e30).astype(np.float32)
        # collapse folded head rows back to (Nq, H)
        collapse = np.equal.outer(np.arange(Nq), np.arange(Rq) % Nq).astype(np.float32)
        return {"rep": jnp.asarray(rep), "hmask": jnp.asarray(hmask),
                "bias": jnp.asarray(bias), "collapse": jnp.asarray(collapse)}

    attn = {key: attn_consts(*key) for key in {(Nc, Nc), (Nt, Nc), (Nt, Nt)}}
    # per-batch mean over the context sequence, as an averaging matmul
    avg = np.equal.outer(np.arange(B), np.arange(B * Nc) // Nc).astype(np.float32) / float(Nc)
    # z "repeat over Nt targets" selector
    repz = np.equal.outer(np.arange(B * Nt) // Nt, np.arange(B)).astype(np.float32)
    return {"attn": attn, "avg": jnp.asarray(avg), "repz": jnp.asarray(repz)}


# ----------------------------------------------------------------------------
# The single fused kernel
# ----------------------------------------------------------------------------

def _make_fused_kernel(treedef, *, H, dh, dout, Nc, Nt):
    scale = 1.0 / math.sqrt(float(dh))
    f32 = jnp.float32

    def kernel(*refs):
        out_ref = refs[-1]
        (xc_r, yc_r, xt_r, eps_r), P, C = jax.tree_util.tree_unflatten(treedef, refs[:-1])

        def mm(a, b):
            return jnp.dot(a, b, preferred_element_type=f32)

        def layer_norm(y, g_ref, b_ref):
            mean = jnp.mean(y, axis=-1, keepdims=True)
            var = jnp.mean((y - mean) ** 2, axis=-1, keepdims=True)
            return (y - mean) * lax.rsqrt(var + _LN_EPS) * g_ref[...] + b_ref[...]

        def attn_core(k, v, q, resid, ap, c):
            hmask = c["hmask"][...]
            # head-fold: replicate query rows per head via MXU selector + column mask
            qf = mm(c["rep"][...], q) * hmask                                    # (Rq, H)
            s = lax.dot_general(qf, k, (((1,), (1,)), ((), ())),
                                preferred_element_type=f32) * scale + c["bias"][...]
            s = s - jnp.max(s, axis=-1, keepdims=True)
            p = jnp.exp(s)
            p = p * pl.reciprocal(jnp.sum(p, axis=-1, keepdims=True), approx=True)
            o = mm(p, v) * hmask                                                 # (Rq, H)
            att = mm(c["collapse"][...], o)                                      # (Nq, H)
            # final_linear(concat([residual, att])) in split-weight form + residual
            y = (mm(resid, ap["wf_res"][...]) + mm(att, ap["wf_att"][...])
                 + ap["bf"][...] + resid)
            return layer_norm(y, ap["ln_g"], ap["ln_b"])

        def self_attn(x, ap, c):
            kvq = mm(x, ap["wqkv"][...])                       # fused K|V|Q projection
            return attn_core(kvq[:, :H], kvq[:, H:2 * H], kvq[:, 2 * H:], x, ap, c)

        def cross_attn(xk, xv, xq, ap, c):
            return attn_core(mm(xk, ap["wk"][...]), mm(xv, ap["wv"][...]),
                             mm(xq, ap["wq"][...]), xq, ap, c)

        xc = xc_r[...]
        yc = yc_r[...]
        xt = xt_r[...]

        c_cc = C["attn"][(Nc, Nc)]
        c_tc = C["attn"][(Nt, Nc)]
        c_tt = C["attn"][(Nt, Nt)]

        # ---------------- latent encoder ----------------
        lp = P["latent"]
        enc = layer_norm(mm(xc, lp["proj"]["wx"][...]) + mm(yc, lp["proj"]["wy"][...])
                         + lp["proj"]["b"][...],
                         lp["proj"]["ln_g"], lp["proj"]["ln_b"])
        for ap in lp["self_attn"]:
            enc = self_attn(enc, ap, c_cc)
        hid = mm(C["avg"][...], enc)                                     # mean over sequence
        hid = jnp.maximum(mm(hid, lp["tail"]["wp"][...]) + lp["tail"]["bp"][...], 0.0)
        muls = mm(hid, lp["tail"]["wmuls"][...]) + lp["tail"]["bmuls"][...]  # [mu | log_sigma]
        z = eps_r[...] * jnp.exp(0.5 * muls[:, H:]) + muls[:, :H]        # reparameterization

        # ---------------- deterministic encoder ----------------
        dp = P["det"]
        denc = layer_norm(mm(xc, dp["proj"]["wx"][...]) + mm(yc, dp["proj"]["wy"][...])
                          + dp["proj"]["b"][...],
                          dp["proj"]["ln_g"], dp["proj"]["ln_b"])
        for ap in dp["self_attn"]:
            denc = self_attn(denc, ap, c_cc)
        keys_r = mm(xc, dp["ctx_proj"]["w"][...]) + dp["ctx_proj"]["b"][...]
        query = mm(xt, dp["tgt_proj"]["w"][...]) + dp["tgt_proj"]["b"][...]
        for ap in dp["cross_attn"]:
            query = cross_attn(keys_r, denc, query, ap, c_tc)

        # ---------------- decoder ----------------
        cp = P["dec"]
        fr = cp["front"]
        z_rep = mm(C["repz"][...], z)                                    # repeat z per target row
        tproj = mm(xt, fr["wt"][...]) + fr["bt"][...]
        # concat([r, z, target_proj]) @ W0 in split-weight form (pre-split wrapper-side)
        h3 = (mm(query, fr["w0_r"][...]) + mm(z_rep, fr["w0_z"][...])
              + mm(tproj, fr["w0_t"][...]) + fr["b0"][...])
        if "wh" in fr:                                                   # hidden_layers > 1
            h3 = jnp.maximum(h3, 0.0)
            for lw in fr["linears"]:
                h3 = jnp.maximum(mm(h3, lw["w"][...]) + lw["b"][...], 0.0)
            hidden = mm(h3, fr["wh"][...]) + fr["bh"][...]
        else:
            hidden = h3
        for ap in cp["self_attn"]:
            hidden = self_attn(hidden, ap, c_tt)

        mc = mm(hidden, cp["head"]["wmc"][...]) + cp["head"]["bmc"][...]  # [mean | cov_pre]
        col = lax.broadcasted_iota(jnp.int32, mc.shape, 1)
        softp = jnp.maximum(mc, 0.0) + jnp.log(1.0 + jnp.exp(-jnp.abs(mc)))
        out_ref[...] = jnp.where(col < dout, mc, softp).astype(out_ref.dtype)

    return kernel


# ----------------------------------------------------------------------------
# Forward wrapper: one pallas_call, whole-array VMEM blocks, no grid
# ----------------------------------------------------------------------------

def model_forward(params, cfg, x_context, y_context, x_target, eps):
    H = cfg["hidden_dim"]
    nh = cfg["num_heads"]
    dh = H // nh
    dout = cfg["l2_output_dim"]
    B, Nc, _ = x_context.shape
    Nt = x_target.shape[1]

    xc = x_context.reshape(B * Nc, -1)
    yc = y_context.reshape(B * Nc, -1)
    xt = x_target.reshape(B * Nt, -1)

    consts = _make_consts(B, Nc, Nt, nh, dh)
    flat_in, treedef = jax.tree_util.tree_flatten(((xc, yc, xt, eps), params, consts))
    kernel = _make_fused_kernel(treedef, H=H, dh=dh, dout=dout, Nc=Nc, Nt=Nt)

    out = pl.pallas_call(
        kernel,
        out_shape=jax.ShapeDtypeStruct((B * Nt, 2 * dout), jnp.float32),
        in_specs=[_VMEM] * len(flat_in),
        out_specs=_VMEM,
    )(*flat_in)

    mean = out[:, :dout].reshape(B, Nt, dout)
    cov = out[:, dout:].reshape(B, Nt, dout)
    return mean, cov


# ----------------------------------------------------------------------------
# Parameters (xavier-uniform, weights stored (in_dim, out_dim); fused / pre-split
# layouts matching what the kernel expects)
# ----------------------------------------------------------------------------

def make_model_params(key, cfg):
    H = cfg["hidden_dim"]
    din = cfg["l2_input_dim"]
    dout = cfg["l2_output_dim"]
    L = cfg["attention_layers"]
    HL = cfg["hidden_layers"]
    relu_gain = math.sqrt(2.0)
    keys = iter(jax.random.split(key, 1024))

    def xavier(in_dim, out_dim, gain=1.0):
        bound = gain * math.sqrt(6.0 / (in_dim + out_dim))
        return jax.random.uniform(next(keys), (in_dim, out_dim), jnp.float32, -bound, bound)

    def lin(in_dim, out_dim, gain=1.0, bias=True):
        w = xavier(in_dim, out_dim, gain)
        if bias:
            bb = 1.0 / math.sqrt(in_dim)
            b = jax.random.uniform(next(keys), (1, out_dim), jnp.float32, -bb, bb)
            return w, b
        return w, None

    def ln_p():
        return jnp.ones((1, H), jnp.float32), jnp.zeros((1, H), jnp.float32)

    def self_attn_p():
        wk, _ = lin(H, H, bias=False)
        wv, _ = lin(H, H, bias=False)
        wq, _ = lin(H, H, bias=False)
        wf, bf = lin(2 * H, H)
        g, b = ln_p()
        return {"wqkv": jnp.concatenate([wk, wv, wq], axis=1),
                "wf_res": wf[:H], "wf_att": wf[H:], "bf": bf, "ln_g": g, "ln_b": b}

    def cross_attn_p():
        wk, _ = lin(H, H, bias=False)
        wv, _ = lin(H, H, bias=False)
        wq, _ = lin(H, H, bias=False)
        wf, bf = lin(2 * H, H)
        g, b = ln_p()
        return {"wk": wk, "wv": wv, "wq": wq,
                "wf_res": wf[:H], "wf_att": wf[H:], "bf": bf, "ln_g": g, "ln_b": b}

    # latent encoder
    wi, bi = lin(din + dout, H)
    g, b = ln_p()
    wp, bp = lin(H, H, gain=relu_gain)
    wmu, bmu = lin(H, H)
    wls, bls = lin(H, H)
    latent = {
        "proj": {"wx": wi[:din], "wy": wi[din:], "b": bi, "ln_g": g, "ln_b": b},
        "self_attn": [self_attn_p() for _ in range(L)],
        "tail": {"wp": wp, "bp": bp,
                 "wmuls": jnp.concatenate([wmu, wls], axis=1),
                 "bmuls": jnp.concatenate([bmu, bls], axis=1)},
    }

    # deterministic encoder
    wi2, bi2 = lin(din + dout, H)
    g2, b2 = ln_p()
    wc, bc = lin(din, H)
    wt, bt = lin(din, H)
    det = {
        "proj": {"wx": wi2[:din], "wy": wi2[din:], "b": bi2, "ln_g": g2, "ln_b": b2},
        "self_attn": [self_attn_p() for _ in range(L)],
        "cross_attn": [cross_attn_p() for _ in range(L)],
        "ctx_proj": {"w": wc, "b": bc},
        "tgt_proj": {"w": wt, "b": bt},
    }

    # decoder
    wtd, btd = lin(din, H)
    lin_list = [lin(3 * H, 3 * H, gain=relu_gain) for _ in range(HL - 1)]
    wh, bh = lin(3 * H, H)
    wm, bm = lin(H, dout)
    wcv, bcv = lin(H, dout)
    if HL > 1:
        w0, b0 = lin_list[0]
        front = {"wt": wtd, "bt": btd,
                 "w0_r": w0[:H], "w0_z": w0[H:2 * H], "w0_t": w0[2 * H:], "b0": b0,
                 "linears": [{"w": w_, "b": b_} for (w_, b_) in lin_list[1:]],
                 "wh": wh, "bh": bh}
    else:
        front = {"wt": wtd, "bt": btd,
                 "w0_r": wh[:H], "w0_z": wh[H:2 * H], "w0_t": wh[2 * H:], "b0": bh,
                 "linears": []}
    dec = {
        "front": front,
        "self_attn": [self_attn_p() for _ in range(L)],
        "head": {"wmc": jnp.concatenate([wm, wcv], axis=1),
                 "bmc": jnp.concatenate([bm, bcv], axis=1)},
    }
    return {"latent": latent, "det": det, "dec": dec}


# ----------------------------------------------------------------------------
# Pure-JAX reference of the original torch forward (for validation)
# ----------------------------------------------------------------------------

def reference_forward(params, cfg, x_context, y_context, x_target, eps):
    H = cfg["hidden_dim"]
    nh = cfg["num_heads"]
    dh = H // nh
    B, Nc, _ = x_context.shape
    Nt = x_target.shape[1]

    def layer_norm(y, g, b):
        m = y.mean(-1, keepdims=True)
        v = ((y - m) ** 2).mean(-1, keepdims=True)
        return (y - m) / jnp.sqrt(v + _LN_EPS) * g + b

    def attention(key_in, value_in, query_in, ap):
        if "wqkv" in ap:
            wk, wv, wq = ap["wqkv"][:, :H], ap["wqkv"][:, H:2 * H], ap["wqkv"][:, 2 * H:]
        else:
            wk, wv, wq = ap["wk"], ap["wv"], ap["wq"]
        Sk, Sq = key_in.shape[1], query_in.shape[1]
        k = (key_in @ wk).reshape(B, Sk, nh, dh).transpose(2, 0, 1, 3).reshape(nh * B, Sk, dh)
        v = (value_in @ wv).reshape(B, Sk, nh, dh).transpose(2, 0, 1, 3).reshape(nh * B, Sk, dh)
        q = (query_in @ wq).reshape(B, Sq, nh, dh).transpose(2, 0, 1, 3).reshape(nh * B, Sq, dh)
        attn = jax.nn.softmax(jnp.einsum("hqd,hkd->hqk", q, k) / math.sqrt(dh), axis=-1)
        res = jnp.einsum("hqk,hkd->hqd", attn, v)
        res = res.reshape(nh, B, Sq, dh).transpose(1, 2, 0, 3).reshape(B, Sq, H)
        y = query_in @ ap["wf_res"] + res @ ap["wf_att"] + ap["bf"] + query_in
        return layer_norm(y, ap["ln_g"], ap["ln_b"])

    lp = params["latent"]
    enc = layer_norm(x_context @ lp["proj"]["wx"] + y_context @ lp["proj"]["wy"] + lp["proj"]["b"],
                     lp["proj"]["ln_g"], lp["proj"]["ln_b"])
    for ap in lp["self_attn"]:
        enc = attention(enc, enc, enc, ap)
    hid = enc.mean(axis=1)
    hid = jax.nn.relu(hid @ lp["tail"]["wp"] + lp["tail"]["bp"])
    muls = hid @ lp["tail"]["wmuls"] + lp["tail"]["bmuls"]
    mu, ls = muls[:, :H], muls[:, H:]
    z = eps * jnp.exp(0.5 * ls) + mu

    dp = params["det"]
    denc = layer_norm(x_context @ dp["proj"]["wx"] + y_context @ dp["proj"]["wy"] + dp["proj"]["b"],
                      dp["proj"]["ln_g"], dp["proj"]["ln_b"])
    for ap in dp["self_attn"]:
        denc = attention(denc, denc, denc, ap)
    keys = x_context @ dp["ctx_proj"]["w"] + dp["ctx_proj"]["b"]
    query = x_target @ dp["tgt_proj"]["w"] + dp["tgt_proj"]["b"]
    for ap in dp["cross_attn"]:
        query = attention(keys, denc, query, ap)

    cp = params["dec"]
    fr = cp["front"]
    z_rep = jnp.broadcast_to(z[:, None, :], (B, Nt, H))
    tproj = x_target @ fr["wt"] + fr["bt"]
    w0 = jnp.concatenate([fr["w0_r"], fr["w0_z"], fr["w0_t"]], axis=0)
    h3 = jnp.concatenate([query, z_rep, tproj], axis=-1) @ w0 + fr["b0"]
    if "wh" in fr:
        h3 = jax.nn.relu(h3)
        for lw in fr["linears"]:
            h3 = jax.nn.relu(h3 @ lw["w"] + lw["b"])
        hidden = h3 @ fr["wh"] + fr["bh"]
    else:
        hidden = h3
    for ap in cp["self_attn"]:
        hidden = attention(hidden, hidden, hidden, ap)
    mc = hidden @ cp["head"]["wmc"] + cp["head"]["bmc"]
    dout = mc.shape[-1] // 2
    return mc[..., :dout], jax.nn.softplus(mc[..., dout:])


# ----------------------------------------------------------------------------
# Main
# ----------------------------------------------------------------------------

if __name__ == "__main__":
    config = {
        "hidden_dim": 32,
        "num_heads": 4,
        "dropout": 0.0,          # eval semantics: dropout is identity
        "l2_input_dim": 3,
        "l2_output_dim": 2,
        "hidden_layers": 2,
        "attention_layers": 1,
    }
    B, Nc, Nt = 2, 8, 8

    root = jax.random.PRNGKey(0)
    k_param, k_xc, k_yc, k_xt, k_eps = jax.random.split(root, 5)

    params = make_model_params(k_param, config)
    x_context = jax.random.normal(k_xc, (B, Nc, config["l2_input_dim"]), jnp.float32)
    y_context = jax.random.normal(k_yc, (B, Nc, config["l2_output_dim"]), jnp.float32)
    x_target = jax.random.normal(k_xt, (B, Nt, config["l2_input_dim"]), jnp.float32)
    eps = jax.random.normal(k_eps, (B, config["hidden_dim"]), jnp.float32)

    fwd = jax.jit(lambda p, xc, yc, xt, e: model_forward(p, config, xc, yc, xt, e))
    mean, cov = fwd(params, x_context, y_context, x_target, eps)
    jax.block_until_ready((mean, cov))

    # validate against a pure-JAX reference of the original torch forward
    with jax.default_matmul_precision("float32"):
        ref_fn = jax.jit(lambda p, xc, yc, xt, e: reference_forward(p, config, xc, yc, xt, e))
        mean_ref, cov_ref = ref_fn(params, x_context, y_context, x_target, eps)
    jax.block_until_ready((mean_ref, cov_ref))

    assert mean.shape == (B, Nt, config["l2_output_dim"])
    assert cov.shape == (B, Nt, config["l2_output_dim"])
    assert bool(jnp.all(jnp.isfinite(mean))) and bool(jnp.all(jnp.isfinite(cov)))
    assert bool(jnp.all(cov > 0.0))  # softplus output must be positive
    err = max(float(jnp.max(jnp.abs(mean - mean_ref))),
              float(jnp.max(jnp.abs(cov - cov_ref))))
    assert err < 5e-2, f"kernel/reference mismatch: max abs err = {err}"

    print("KERNEL_OK")
</pallas_src>

<mosaic_0001>
module attributes {stable_mosaic.version = 11 : i64} {
  func.func @kernel(%arg0: memref<16x3xf32, #tpu.memory_space<vmem>>, %arg1: memref<16x2xf32, #tpu.memory_space<vmem>>, %arg2: memref<16x3xf32, #tpu.memory_space<vmem>>, %arg3: memref<2x32xf32, #tpu.memory_space<vmem>>, %arg4: memref<1x96xf32, #tpu.memory_space<vmem>>, %arg5: memref<1x32xf32, #tpu.memory_space<vmem>>, %arg6: memref<1x32xf32, #tpu.memory_space<vmem>>, %arg7: memref<32x96xf32, #tpu.memory_space<vmem>>, %arg8: memref<32x96xf32, #tpu.memory_space<vmem>>, %arg9: memref<32x96xf32, #tpu.memory_space<vmem>>, %arg10: memref<96x32xf32, #tpu.memory_space<vmem>>, %arg11: memref<3x32xf32, #tpu.memory_space<vmem>>, %arg12: memref<1x4xf32, #tpu.memory_space<vmem>>, %arg13: memref<32x4xf32, #tpu.memory_space<vmem>>, %arg14: memref<1x32xf32, #tpu.memory_space<vmem>>, %arg15: memref<1x32xf32, #tpu.memory_space<vmem>>, %arg16: memref<1x32xf32, #tpu.memory_space<vmem>>, %arg17: memref<32x32xf32, #tpu.memory_space<vmem>>, %arg18: memref<32x32xf32, #tpu.memory_space<vmem>>, %arg19: memref<32x96xf32, #tpu.memory_space<vmem>>, %arg20: memref<1x32xf32, #tpu.memory_space<vmem>>, %arg21: memref<1x32xf32, #tpu.memory_space<vmem>>, %arg22: memref<1x32xf32, #tpu.memory_space<vmem>>, %arg23: memref<32x32xf32, #tpu.memory_space<vmem>>, %arg24: memref<32x32xf32, #tpu.memory_space<vmem>>, %arg25: memref<32x32xf32, #tpu.memory_space<vmem>>, %arg26: memref<32x32xf32, #tpu.memory_space<vmem>>, %arg27: memref<32x32xf32, #tpu.memory_space<vmem>>, %arg28: memref<1x32xf32, #tpu.memory_space<vmem>>, %arg29: memref<3x32xf32, #tpu.memory_space<vmem>>, %arg30: memref<1x32xf32, #tpu.memory_space<vmem>>, %arg31: memref<1x32xf32, #tpu.memory_space<vmem>>, %arg32: memref<1x32xf32, #tpu.memory_space<vmem>>, %arg33: memref<3x32xf32, #tpu.memory_space<vmem>>, %arg34: memref<2x32xf32, #tpu.memory_space<vmem>>, %arg35: memref<1x32xf32, #tpu.memory_space<vmem>>, %arg36: memref<1x32xf32, #tpu.memory_space<vmem>>, %arg37: memref<1x32xf32, #tpu.memory_space<vmem>>, %arg38: memref<32x32xf32, #tpu.memory_space<vmem>>, %arg39: memref<32x32xf32, #tpu.memory_space<vmem>>, %arg40: memref<32x96xf32, #tpu.memory_space<vmem>>, %arg41: memref<1x32xf32, #tpu.memory_space<vmem>>, %arg42: memref<3x32xf32, #tpu.memory_space<vmem>>, %arg43: memref<1x32xf32, #tpu.memory_space<vmem>>, %arg44: memref<1x32xf32, #tpu.memory_space<vmem>>, %arg45: memref<1x32xf32, #tpu.memory_space<vmem>>, %arg46: memref<3x32xf32, #tpu.memory_space<vmem>>, %arg47: memref<2x32xf32, #tpu.memory_space<vmem>>, %arg48: memref<1x32xf32, #tpu.memory_space<vmem>>, %arg49: memref<1x32xf32, #tpu.memory_space<vmem>>, %arg50: memref<1x32xf32, #tpu.memory_space<vmem>>, %arg51: memref<32x32xf32, #tpu.memory_space<vmem>>, %arg52: memref<32x32xf32, #tpu.memory_space<vmem>>, %arg53: memref<32x96xf32, #tpu.memory_space<vmem>>, %arg54: memref<1x64xf32, #tpu.memory_space<vmem>>, %arg55: memref<1x32xf32, #tpu.memory_space<vmem>>, %arg56: memref<32x64xf32, #tpu.memory_space<vmem>>, %arg57: memref<32x32xf32, #tpu.memory_space<vmem>>, %arg58: memref<64x16xf32, #tpu.memory_space<vmem>>, %arg59: memref<16x64xf32, #tpu.memory_space<vmem>>, %arg60: memref<64x32xf32, #tpu.memory_space<vmem>>, %arg61: memref<64x16xf32, #tpu.memory_space<vmem>>, %arg62: memref<2x16xf32, #tpu.memory_space<vmem>>, %arg63: memref<16x2xf32, #tpu.memory_space<vmem>>, %arg64: memref<16x4xf32, #tpu.memory_space<vmem>>) attributes {dimension_semantics = [], scalar_prefetch = 0 : i64, scratch_operands = 0 : i64, tpu.core_type = #tpu.core_type<tc>} {
    %c0 = arith.constant 0 : index
    %c0_0 = arith.constant 0 : index
    %0 = vector.load %arg0[%c0, %c0_0] : memref<16x3xf32, #tpu.memory_space<vmem>>, vector<16x3xf32>
    %c0_1 = arith.constant 0 : index
    %c0_2 = arith.constant 0 : index
    %1 = vector.load %arg1[%c0_1, %c0_2] : memref<16x2xf32, #tpu.memory_space<vmem>>, vector<16x2xf32>
    %c0_3 = arith.constant 0 : index
    %c0_4 = arith.constant 0 : index
    %2 = vector.load %arg2[%c0_3, %c0_4] : memref<16x3xf32, #tpu.memory_space<vmem>>, vector<16x3xf32>
    %c0_5 = arith.constant 0 : index
    %c0_6 = arith.constant 0 : index
    %3 = vector.load %arg46[%c0_5, %c0_6] : memref<3x32xf32, #tpu.memory_space<vmem>>, vector<3x32xf32>
    %cst = arith.constant dense<0.000000e+00> : vector<16x32xf32>
    %4 = tpu.matmul %0, %3, %cst {dimension_numbers = #tpu.dot_dimension_numbers<[1], [0], [0], [1], [0, 0, 1, 1], [], []>} : vector<16x3xf32>, vector<3x32xf32>, vector<16x32xf32> -> vector<16x32xf32>
    %c0_7 = arith.constant 0 : index
    %c0_8 = arith.constant 0 : index
    %5 = vector.load %arg47[%c0_7, %c0_8] : memref<2x32xf32, #tpu.memory_space<vmem>>, vector<2x32xf32>
    %cst_9 = arith.constant dense<0.000000e+00> : vector<16x32xf32>
    %6 = tpu.matmul %1, %5, %cst_9 {dimension_numbers = #tpu.dot_dimension_numbers<[1], [0], [0], [1], [0, 0, 1, 1], [], []>} : vector<16x2xf32>, vector<2x32xf32>, vector<16x32xf32> -> vector<16x32xf32>
    %7 = arith.addf %4, %6 : vector<16x32xf32>
    %c0_10 = arith.constant 0 : index
    %c0_11 = arith.constant 0 : index
    %8 = vector.load %arg43[%c0_10, %c0_11] : memref<1x32xf32, #tpu.memory_space<vmem>>, vector<1x32xf32>
    %9 = vector.broadcast %8 : vector<1x32xf32> to vector<16x32xf32>
    %10 = arith.addf %7, %9 : vector<16x32xf32>
    %cst_12 = arith.constant dense<0.000000e+00> : vector<16xf32>
    %11 = vector.multi_reduction <add>, %10, %cst_12 [1] : vector<16x32xf32> to vector<16xf32>
    %12 = vector.shape_cast %11 : vector<16xf32> to vector<16x1xf32>
    %cst_13 = arith.constant 3.200000e+01 : f32
    %13 = vector.broadcast %cst_13 : f32 to vector<16x1xf32>
    %14 = arith.divf %12, %13 : vector<16x1xf32>
    %15 = vector.broadcast %14 : vector<16x1xf32> to vector<16x32xf32>
    %16 = arith.subf %10, %15 : vector<16x32xf32>
    %17 = arith.mulf %16, %16 : vector<16x32xf32>
    %cst_14 = arith.constant dense<0.000000e+00> : vector<16xf32>
    %18 = vector.multi_reduction <add>, %17, %cst_14 [1] : vector<16x32xf32> to vector<16xf32>
    %19 = vector.shape_cast %18 : vector<16xf32> to vector<16x1xf32>
    %cst_15 = arith.constant 3.200000e+01 : f32
    %20 = vector.broadcast %cst_15 : f32 to vector<16x1xf32>
    %21 = arith.divf %19, %20 : vector<16x1xf32>
    %22 = vector.broadcast %14 : vector<16x1xf32> to vector<16x32xf32>
    %23 = arith.subf %10, %22 : vector<16x32xf32>
    %cst_16 = arith.constant 9.99999974E-6 : f32
    %24 = vector.broadcast %cst_16 : f32 to vector<16x1xf32>
    %25 = arith.addf %21, %24 : vector<16x1xf32>
    %26 = math.rsqrt %25 : vector<16x1xf32>
    %27 = vector.broadcast %26 : vector<16x1xf32> to vector<16x32xf32>
    %28 = arith.mulf %23, %27 : vector<16x32xf32>
    %c0_17 = arith.constant 0 : index
    %c0_18 = arith.constant 0 : index
    %29 = vector.load %arg45[%c0_17, %c0_18] : memref<1x32xf32, #tpu.memory_space<vmem>>, vector<1x32xf32>
    %30 = vector.broadcast %29 : vector<1x32xf32> to vector<16x32xf32>
    %31 = arith.mulf %28, %30 : vector<16x32xf32>
    %c0_19 = arith.constant 0 : index
    %c0_20 = arith.constant 0 : index
    %32 = vector.load %arg44[%c0_19, %c0_20] : memref<1x32xf32, #tpu.memory_space<vmem>>, vector<1x32xf32>
    %33 = vector.broadcast %32 : vector<1x32xf32> to vector<16x32xf32>
    %34 = arith.addf %31, %33 : vector<16x32xf32>
    %c0_21 = arith.constant 0 : index
    %c0_22 = arith.constant 0 : index
    %35 = vector.load %arg53[%c0_21, %c0_22] : memref<32x96xf32, #tpu.memory_space<vmem>>, vector<32x96xf32>
    %cst_23 = arith.constant dense<0.000000e+00> : vector<16x96xf32>
    %36 = tpu.matmul %34, %35, %cst_23 {dimension_numbers = #tpu.dot_dimension_numbers<[1], [0], [0], [1], [0, 0, 1, 1], [], []>} : vector<16x32xf32>, vector<32x96xf32>, vector<16x96xf32> -> vector<16x96xf32>
    %37 = vector.extract_strided_slice %36 {offsets = [0, 0], sizes = [16, 32], strides = [1, 1]} : vector<16x96xf32> to vector<16x32xf32>
    %38 = vector.extract_strided_slice %36 {offsets = [0, 32], sizes = [16, 32], strides = [1, 1]} : vector<16x96xf32> to vector<16x32xf32>
    %39 = vector.extract_strided_slice %36 {offsets = [0, 64], sizes = [16, 32], strides = [1, 1]} : vector<16x96xf32> to vector<16x32xf32>
    %c0_24 = arith.constant 0 : index
    %c0_25 = arith.constant 0 : index
    %40 = vector.load %arg60[%c0_24, %c0_25] : memref<64x32xf32, #tpu.memory_space<vmem>>, vector<64x32xf32>
    %c0_26 = arith.constant 0 : index
    %c0_27 = arith.constant 0 : index
    %41 = vector.load %arg61[%c0_26, %c0_27] : memref<64x16xf32, #tpu.memory_space<vmem>>, vector<64x16xf32>
    %cst_28 = arith.constant dense<0.000000e+00> : vector<64x32xf32>
    %42 = tpu.matmul %41, %39, %cst_28 {dimension_numbers = #tpu.dot_dimension_numbers<[1], [0], [0], [1], [0, 0, 1, 1], [], []>} : vector<64x16xf32>, vector<16x32xf32>, vector<64x32xf32> -> vector<64x32xf32>
    %43 = arith.mulf %42, %40 : vector<64x32xf32>
    %cst_29 = arith.constant dense<0.000000e+00> : vector<64x16xf32>
    %44 = tpu.matmul %43, %37, %cst_29 {dimension_numbers = #tpu.dot_dimension_numbers<[1], [1], [0], [0], [0, 0, 1, 0], [], []>} : vector<64x32xf32>, vector<16x32xf32>, vector<64x16xf32> -> vector<64x16xf32>
    %cst_30 = arith.constant 0.353553385 : f32
    %45 = vector.broadcast %cst_30 : f32 to vector<64x16xf32>
    %46 = arith.mulf %44, %45 : vector<64x16xf32>
    %c0_31 = arith.constant 0 : index
    %c0_32 = arith.constant 0 : index
    %47 = vector.load %arg58[%c0_31, %c0_32] : memref<64x16xf32, #tpu.memory_space<vmem>>, vector<64x16xf32>
    %48 = arith.addf %46, %47 : vector<64x16xf32>
    %cst_33 = arith.constant dense<0xFF800000> : vector<64xf32>
    %49 = vector.multi_reduction <maximumf>, %48, %cst_33 [1] : vector<64x16xf32> to vector<64xf32>
    %50 = vector.shape_cast %49 : vector<64xf32> to vector<64x1xf32>
    %51 = vector.broadcast %50 : vector<64x1xf32> to vector<64x16xf32>
    %52 = arith.subf %48, %51 : vector<64x16xf32>
    %53 = math.exp %52 : vector<64x16xf32>
    %cst_34 = arith.constant dense<0.000000e+00> : vector<64xf32>
    %54 = vector.multi_reduction <add>, %53, %cst_34 [1] : vector<64x16xf32> to vector<64xf32>
    %55 = vector.shape_cast %54 : vector<64xf32> to vector<64x1xf32>
    %56 = tpu.reciprocal %55 {approx = true} : vector<64x1xf32> -> vector<64x1xf32>
    %57 = vector.broadcast %56 : vector<64x1xf32> to vector<64x16xf32>
    %58 = arith.mulf %53, %57 : vector<64x16xf32>
    %cst_35 = arith.constant dense<0.000000e+00> : vector<64x32xf32>
    %59 = tpu.matmul %58, %38, %cst_35 {dimension_numbers = #tpu.dot_dimension_numbers<[1], [0], [0], [1], [0, 0, 1, 1], [], []>} : vector<64x16xf32>, vector<16x32xf32>, vector<64x32xf32> -> vector<64x32xf32>
    %60 = arith.mulf %59, %40 : vector<64x32xf32>
    %c0_36 = arith.constant 0 : index
    %c0_37 = arith.constant 0 : index
    %61 = vector.load %arg59[%c0_36, %c0_37] : memref<16x64xf32, #tpu.memory_space<vmem>>, vector<16x64xf32>
    %cst_38 = arith.constant dense<0.000000e+00> : vector<16x32xf32>
    %62 = tpu.matmul %61, %60, %cst_38 {dimension_numbers = #tpu.dot_dimension_numbers<[1], [0], [0], [1], [0, 0, 1, 1], [], []>} : vector<16x64xf32>, vector<64x32xf32>, vector<16x32xf32> -> vector<16x32xf32>
    %c0_39 = arith.constant 0 : index
    %c0_40 = arith.constant 0 : index
    %63 = vector.load %arg52[%c0_39, %c0_40] : memref<32x32xf32, #tpu.memory_space<vmem>>, vector<32x32xf32>
    %cst_41 = arith.constant dense<0.000000e+00> : vector<16x32xf32>
    %64 = tpu.matmul %34, %63, %cst_41 {dimension_numbers = #tpu.dot_dimension_numbers<[1], [0], [0], [1], [0, 0, 1, 1], [], []>} : vector<16x32xf32>, vector<32x32xf32>, vector<16x32xf32> -> vector<16x32xf32>
    %c0_42 = arith.constant 0 : index
    %c0_43 = arith.constant 0 : index
    %65 = vector.load %arg51[%c0_42, %c0_43] : memref<32x32xf32, #tpu.memory_space<vmem>>, vector<32x32xf32>
    %cst_44 = arith.constant dense<0.000000e+00> : vector<16x32xf32>
    %66 = tpu.matmul %62, %65, %cst_44 {dimension_numbers = #tpu.dot_dimension_numbers<[1], [0], [0], [1], [0, 0, 1, 1], [], []>} : vector<16x32xf32>, vector<32x32xf32>, vector<16x32xf32> -> vector<16x32xf32>
    %67 = arith.addf %64, %66 : vector<16x32xf32>
    %c0_45 = arith.constant 0 : index
    %c0_46 = arith.constant 0 : index
    %68 = vector.load %arg48[%c0_45, %c0_46] : memref<1x32xf32, #tpu.memory_space<vmem>>, vector<1x32xf32>
    %69 = vector.broadcast %68 : vector<1x32xf32> to vector<16x32xf32>
    %70 = arith.addf %67, %69 : vector<16x32xf32>
    %71 = arith.addf %70, %34 : vector<16x32xf32>
    %cst_47 = arith.constant dense<0.000000e+00> : vector<16xf32>
    %72 = vector.multi_reduction <add>, %71, %cst_47 [1] : vector<16x32xf32> to vector<16xf32>
    %73 = vector.shape_cast %72 : vector<16xf32> to vector<16x1xf32>
    %cst_48 = arith.constant 3.200000e+01 : f32
    %74 = vector.broadcast %cst_48 : f32 to vector<16x1xf32>
    %75 = arith.divf %73, %74 : vector<16x1xf32>
    %76 = vector.broadcast %75 : vector<16x1xf32> to vector<16x32xf32>
    %77 = arith.subf %71, %76 : vector<16x32xf32>
    %78 = arith.mulf %77, %77 : vector<16x32xf32>
    %cst_49 = arith.constant dense<0.000000e+00> : vector<16xf32>
    %79 = vector.multi_reduction <add>, %78, %cst_49 [1] : vector<16x32xf32> to vector<16xf32>
    %80 = vector.shape_cast %79 : vector<16xf32> to vector<16x1xf32>
    %cst_50 = arith.constant 3.200000e+01 : f32
    %81 = vector.broadcast %cst_50 : f32 to vector<16x1xf32>
    %82 = arith.divf %80, %81 : vector<16x1xf32>
    %83 = vector.broadcast %75 : vector<16x1xf32> to vector<16x32xf32>
    %84 = arith.subf %71, %83 : vector<16x32xf32>
    %cst_51 = arith.constant 9.99999974E-6 : f32
    %85 = vector.broadcast %cst_51 : f32 to vector<16x1xf32>
    %86 = arith.addf %82, %85 : vector<16x1xf32>
    %87 = math.rsqrt %86 : vector<16x1xf32>
    %88 = vector.broadcast %87 : vector<16x1xf32> to vector<16x32xf32>
    %89 = arith.mulf %84, %88 : vector<16x32xf32>
    %c0_52 = arith.constant 0 : index
    %c0_53 = arith.constant 0 : index
    %90 = vector.load %arg50[%c0_52, %c0_53] : memref<1x32xf32, #tpu.memory_space<vmem>>, vector<1x32xf32>
    %91 = vector.broadcast %90 : vector<1x32xf32> to vector<16x32xf32>
    %92 = arith.mulf %89, %91 : vector<16x32xf32>
    %c0_54 = arith.constant 0 : index
    %c0_55 = arith.constant 0 : index
    %93 = vector.load %arg49[%c0_54, %c0_55] : memref<1x32xf32, #tpu.memory_space<vmem>>, vector<1x32xf32>
    %94 = vector.broadcast %93 : vector<1x32xf32> to vector<16x32xf32>
    %95 = arith.addf %92, %94 : vector<16x32xf32>
    %c0_56 = arith.constant 0 : index
    %c0_57 = arith.constant 0 : index
    %96 = vector.load %arg62[%c0_56, %c0_57] : memref<2x16xf32, #tpu.memory_space<vmem>>, vector<2x16xf32>
    %cst_58 = arith.constant dense<0.000000e+00> : vector<2x32xf32>
    %97 = tpu.matmul %96, %95, %cst_58 {dimension_numbers = #tpu.dot_dimension_numbers<[1], [0], [0], [1], [0, 0, 1, 1], [], []>} : vector<2x16xf32>, vector<16x32xf32>, vector<2x32xf32> -> vector<2x32xf32>
    %c0_59 = arith.constant 0 : index
    %c0_60 = arith.constant 0 : index
    %98 = vector.load %arg57[%c0_59, %c0_60] : memref<32x32xf32, #tpu.memory_space<vmem>>, vector<32x32xf32>
    %cst_61 = arith.constant dense<0.000000e+00> : vector<2x32xf32>
    %99 = tpu.matmul %97, %98, %cst_61 {dimension_numbers = #tpu.dot_dimension_numbers<[1], [0], [0], [1], [0, 0, 1, 1], [], []>} : vector<2x32xf32>, vector<32x32xf32>, vector<2x32xf32> -> vector<2x32xf32>
    %c0_62 = arith.constant 0 : index
    %c0_63 = arith.constant 0 : index
    %100 = vector.load %arg55[%c0_62, %c0_63] : memref<1x32xf32, #tpu.memory_space<vmem>>, vector<1x32xf32>
    %101 = vector.broadcast %100 : vector<1x32xf32> to vector<2x32xf32>
    %102 = arith.addf %99, %101 : vector<2x32xf32>
    %cst_64 = arith.constant 0.000000e+00 : f32
    %103 = vector.broadcast %cst_64 : f32 to vector<2x32xf32>
    %104 = arith.maximumf %102, %103 : vector<2x32xf32>
    %c0_65 = arith.constant 0 : index
    %c0_66 = arith.constant 0 : index
    %105 = vector.load %arg56[%c0_65, %c0_66] : memref<32x64xf32, #tpu.memory_space<vmem>>, vector<32x64xf32>
    %cst_67 = arith.constant dense<0.000000e+00> : vector<2x64xf32>
    %106 = tpu.matmul %104, %105, %cst_67 {dimension_numbers = #tpu.dot_dimension_numbers<[1], [0], [0], [1], [0, 0, 1, 1], [], []>} : vector<2x32xf32>, vector<32x64xf32>, vector<2x64xf32> -> vector<2x64xf32>
    %c0_68 = arith.constant 0 : index
    %c0_69 = arith.constant 0 : index
    %107 = vector.load %arg54[%c0_68, %c0_69] : memref<1x64xf32, #tpu.memory_space<vmem>>, vector<1x64xf32>
    %108 = vector.broadcast %107 : vector<1x64xf32> to vector<2x64xf32>
    %109 = arith.addf %106, %108 : vector<2x64xf32>
    %c0_70 = arith.constant 0 : index
    %c0_71 = arith.constant 0 : index
    %110 = vector.load %arg3[%c0_70, %c0_71] : memref<2x32xf32, #tpu.memory_space<vmem>>, vector<2x32xf32>
    %111 = vector.extract_strided_slice %109 {offsets = [0, 32], sizes = [2, 32], strides = [1, 1]} : vector<2x64xf32> to vector<2x32xf32>
    %cst_72 = arith.constant 5.000000e-01 : f32
    %112 = vector.broadcast %cst_72 : f32 to vector<2x32xf32>
    %113 = arith.mulf %112, %111 : vector<2x32xf32>
    %114 = math.exp %113 : vector<2x32xf32>
    %115 = arith.mulf %110, %114 : vector<2x32xf32>
    %116 = vector.extract_strided_slice %109 {offsets = [0, 0], sizes = [2, 32], strides = [1, 1]} : vector<2x64xf32> to vector<2x32xf32>
    %117 = arith.addf %115, %116 : vector<2x32xf32>
    %c0_73 = arith.constant 0 : index
    %c0_74 = arith.constant 0 : index
    %118 = vector.load %arg33[%c0_73, %c0_74] : memref<3x32xf32, #tpu.memory_space<vmem>>, vector<3x32xf32>
    %cst_75 = arith.constant dense<0.000000e+00> : vector<16x32xf32>
    %119 = tpu.matmul %0, %118, %cst_75 {dimension_numbers = #tpu.dot_dimension_numbers<[1], [0], [0], [1], [0, 0, 1, 1], [], []>} : vector<16x3xf32>, vector<3x32xf32>, vector<16x32xf32> -> vector<16x32xf32>
    %c0_76 = arith.constant 0 : index
    %c0_77 = arith.constant 0 : index
    %120 = vector.load %arg34[%c0_76, %c0_77] : memref<2x32xf32, #tpu.memory_space<vmem>>, vector<2x32xf32>
    %cst_78 = arith.constant dense<0.000000e+00> : vector<16x32xf32>
    %121 = tpu.matmul %1, %120, %cst_78 {dimension_numbers = #tpu.dot_dimension_numbers<[1], [0], [0], [1], [0, 0, 1, 1], [], []>} : vector<16x2xf32>, vector<2x32xf32>, vector<16x32xf32> -> vector<16x32xf32>
    %122 = arith.addf %119, %121 : vector<16x32xf32>
    %c0_79 = arith.constant 0 : index
    %c0_80 = arith.constant 0 : index
    %123 = vector.load %arg30[%c0_79, %c0_80] : memref<1x32xf32, #tpu.memory_space<vmem>>, vector<1x32xf32>
    %124 = vector.broadcast %123 : vector<1x32xf32> to vector<16x32xf32>
    %125 = arith.addf %122, %124 : vector<16x32xf32>
    %cst_81 = arith.constant dense<0.000000e+00> : vector<16xf32>
    %126 = vector.multi_reduction <add>, %125, %cst_81 [1] : vector<16x32xf32> to vector<16xf32>
    %127 = vector.shape_cast %126 : vector<16xf32> to vector<16x1xf32>
    %cst_82 = arith.constant 3.200000e+01 : f32
    %128 = vector.broadcast %cst_82 : f32 to vector<16x1xf32>
    %129 = arith.divf %127, %128 : vector<16x1xf32>
    %130 = vector.broadcast %129 : vector<16x1xf32> to vector<16x32xf32>
    %131 = arith.subf %125, %130 : vector<16x32xf32>
    %132 = arith.mulf %131, %131 : vector<16x32xf32>
    %cst_83 = arith.constant dense<0.000000e+00> : vector<16xf32>
    %133 = vector.multi_reduction <add>, %132, %cst_83 [1] : vector<16x32xf32> to vector<16xf32>
    %134 = vector.shape_cast %133 : vector<16xf32> to vector<16x1xf32>
    %cst_84 = arith.constant 3.200000e+01 : f32
    %135 = vector.broadcast %cst_84 : f32 to vector<16x1xf32>
    %136 = arith.divf %134, %135 : vector<16x1xf32>
    %137 = vector.broadcast %129 : vector<16x1xf32> to vector<16x32xf32>
    %138 = arith.subf %125, %137 : vector<16x32xf32>
    %cst_85 = arith.constant 9.99999974E-6 : f32
    %139 = vector.broadcast %cst_85 : f32 to vector<16x1xf32>
    %140 = arith.addf %136, %139 : vector<16x1xf32>
    %141 = math.rsqrt %140 : vector<16x1xf32>
    %142 = vector.broadcast %141 : vector<16x1xf32> to vector<16x32xf32>
    %143 = arith.mulf %138, %142 : vector<16x32xf32>
    %c0_86 = arith.constant 0 : index
    %c0_87 = arith.constant 0 : index
    %144 = vector.load %arg32[%c0_86, %c0_87] : memref<1x32xf32, #tpu.memory_space<vmem>>, vector<1x32xf32>
    %145 = vector.broadcast %144 : vector<1x32xf32> to vector<16x32xf32>
    %146 = arith.mulf %143, %145 : vector<16x32xf32>
    %c0_88 = arith.constant 0 : index
    %c0_89 = arith.constant 0 : index
    %147 = vector.load %arg31[%c0_88, %c0_89] : memref<1x32xf32, #tpu.memory_space<vmem>>, vector<1x32xf32>
    %148 = vector.broadcast %147 : vector<1x32xf32> to vector<16x32xf32>
    %149 = arith.addf %146, %148 : vector<16x32xf32>
    %c0_90 = arith.constant 0 : index
    %c0_91 = arith.constant 0 : index
    %150 = vector.load %arg40[%c0_90, %c0_91] : memref<32x96xf32, #tpu.memory_space<vmem>>, vector<32x96xf32>
    %cst_92 = arith.constant dense<0.000000e+00> : vector<16x96xf32>
    %151 = tpu.matmul %149, %150, %cst_92 {dimension_numbers = #tpu.dot_dimension_numbers<[1], [0], [0], [1], [0, 0, 1, 1], [], []>} : vector<16x32xf32>, vector<32x96xf32>, vector<16x96xf32> -> vector<16x96xf32>
    %152 = vector.extract_strided_slice %151 {offsets = [0, 0], sizes = [16, 32], strides = [1, 1]} : vector<16x96xf32> to vector<16x32xf32>
    %153 = vector.extract_strided_slice %151 {offsets = [0, 32], sizes = [16, 32], strides = [1, 1]} : vector<16x96xf32> to vector<16x32xf32>
    %154 = vector.extract_strided_slice %151 {offsets = [0, 64], sizes = [16, 32], strides = [1, 1]} : vector<16x96xf32> to vector<16x32xf32>
    %c0_93 = arith.constant 0 : index
    %c0_94 = arith.constant 0 : index
    %155 = vector.load %arg60[%c0_93, %c0_94] : memref<64x32xf32, #tpu.memory_space<vmem>>, vector<64x32xf32>
    %c0_95 = arith.constant 0 : index
    %c0_96 = arith.constant 0 : index
    %156 = vector.load %arg61[%c0_95, %c0_96] : memref<64x16xf32, #tpu.memory_space<vmem>>, vector<64x16xf32>
    %cst_97 = arith.constant dense<0.000000e+00> : vector<64x32xf32>
    %157 = tpu.matmul %156, %154, %cst_97 {dimension_numbers = #tpu.dot_dimension_numbers<[1], [0], [0], [1], [0, 0, 1, 1], [], []>} : vector<64x16xf32>, vector<16x32xf32>, vector<64x32xf32> -> vector<64x32xf32>
    %158 = arith.mulf %157, %155 : vector<64x32xf32>
    %cst_98 = arith.constant dense<0.000000e+00> : vector<64x16xf32>
    %159 = tpu.matmul %158, %152, %cst_98 {dimension_numbers = #tpu.dot_dimension_numbers<[1], [1], [0], [0], [0, 0, 1, 0], [], []>} : vector<64x32xf32>, vector<16x32xf32>, vector<64x16xf32> -> vector<64x16xf32>
    %cst_99 = arith.constant 0.353553385 : f32
    %160 = vector.broadcast %cst_99 : f32 to vector<64x16xf32>
    %161 = arith.mulf %159, %160 : vector<64x16xf32>
    %c0_100 = arith.constant 0 : index
    %c0_101 = arith.constant 0 : index
    %162 = vector.load %arg58[%c0_100, %c0_101] : memref<64x16xf32, #tpu.memory_space<vmem>>, vector<64x16xf32>
    %163 = arith.addf %161, %162 : vector<64x16xf32>
    %cst_102 = arith.constant dense<0xFF800000> : vector<64xf32>
    %164 = vector.multi_reduction <maximumf>, %163, %cst_102 [1] : vector<64x16xf32> to vector<64xf32>
    %165 = vector.shape_cast %164 : vector<64xf32> to vector<64x1xf32>
    %166 = vector.broadcast %165 : vector<64x1xf32> to vector<64x16xf32>
    %167 = arith.subf %163, %166 : vector<64x16xf32>
    %168 = math.exp %167 : vector<64x16xf32>
    %cst_103 = arith.constant dense<0.000000e+00> : vector<64xf32>
    %169 = vector.multi_reduction <add>, %168, %cst_103 [1] : vector<64x16xf32> to vector<64xf32>
    %170 = vector.shape_cast %169 : vector<64xf32> to vector<64x1xf32>
    %171 = tpu.reciprocal %170 {approx = true} : vector<64x1xf32> -> vector<64x1xf32>
    %172 = vector.broadcast %171 : vector<64x1xf32> to vector<64x16xf32>
    %173 = arith.mulf %168, %172 : vector<64x16xf32>
    %cst_104 = arith.constant dense<0.000000e+00> : vector<64x32xf32>
    %174 = tpu.matmul %173, %153, %cst_104 {dimension_numbers = #tpu.dot_dimension_numbers<[1], [0], [0], [1], [0, 0, 1, 1], [], []>} : vector<64x16xf32>, vector<16x32xf32>, vector<64x32xf32> -> vector<64x32xf32>
    %175 = arith.mulf %174, %155 : vector<64x32xf32>
    %c0_105 = arith.constant 0 : index
    %c0_106 = arith.constant 0 : index
    %176 = vector.load %arg59[%c0_105, %c0_106] : memref<16x64xf32, #tpu.memory_space<vmem>>, vector<16x64xf32>
    %cst_107 = arith.constant dense<0.000000e+00> : vector<16x32xf32>
    %177 = tpu.matmul %176, %175, %cst_107 {dimension_numbers = #tpu.dot_dimension_numbers<[1], [0], [0], [1], [0, 0, 1, 1], [], []>} : vector<16x64xf32>, vector<64x32xf32>, vector<16x32xf32> -> vector<16x32xf32>
    %c0_108 = arith.constant 0 : index
    %c0_109 = arith.constant 0 : index
    %178 = vector.load %arg39[%c0_108, %c0_109] : memref<32x32xf32, #tpu.memory_space<vmem>>, vector<32x32xf32>
    %cst_110 = arith.constant dense<0.000000e+00> : vector<16x32xf32>
    %179 = tpu.matmul %149, %178, %cst_110 {dimension_numbers = #tpu.dot_dimension_numbers<[1], [0], [0], [1], [0, 0, 1, 1], [], []>} : vector<16x32xf32>, vector<32x32xf32>, vector<16x32xf32> -> vector<16x32xf32>
    %c0_111 = arith.constant 0 : index
    %c0_112 = arith.constant 0 : index
    %180 = vector.load %arg38[%c0_111, %c0_112] : memref<32x32xf32, #tpu.memory_space<vmem>>, vector<32x32xf32>
    %cst_113 = arith.constant dense<0.000000e+00> : vector<16x32xf32>
    %181 = tpu.matmul %177, %180, %cst_113 {dimension_numbers = #tpu.dot_dimension_numbers<[1], [0], [0], [1], [0, 0, 1, 1], [], []>} : vector<16x32xf32>, vector<32x32xf32>, vector<16x32xf32> -> vector<16x32xf32>
    %182 = arith.addf %179, %181 : vector<16x32xf32>
    %c0_114 = arith.constant 0 : index
    %c0_115 = arith.constant 0 : index
    %183 = vector.load %arg35[%c0_114, %c0_115] : memref<1x32xf32, #tpu.memory_space<vmem>>, vector<1x32xf32>
    %184 = vector.broadcast %183 : vector<1x32xf32> to vector<16x32xf32>
    %185 = arith.addf %182, %184 : vector<16x32xf32>
    %186 = arith.addf %185, %149 : vector<16x32xf32>
    %cst_116 = arith.constant dense<0.000000e+00> : vector<16xf32>
    %187 = vector.multi_reduction <add>, %186, %cst_116 [1] : vector<16x32xf32> to vector<16xf32>
    %188 = vector.shape_cast %187 : vector<16xf32> to vector<16x1xf32>
    %cst_117 = arith.constant 3.200000e+01 : f32
    %189 = vector.broadcast %cst_117 : f32 to vector<16x1xf32>
    %190 = arith.divf %188, %189 : vector<16x1xf32>
    %191 = vector.broadcast %190 : vector<16x1xf32> to vector<16x32xf32>
    %192 = arith.subf %186, %191 : vector<16x32xf32>
    %193 = arith.mulf %192, %192 : vector<16x32xf32>
    %cst_118 = arith.constant dense<0.000000e+00> : vector<16xf32>
    %194 = vector.multi_reduction <add>, %193, %cst_118 [1] : vector<16x32xf32> to vector<16xf32>
    %195 = vector.shape_cast %194 : vector<16xf32> to vector<16x1xf32>
    %cst_119 = arith.constant 3.200000e+01 : f32
    %196 = vector.broadcast %cst_119 : f32 to vector<16x1xf32>
    %197 = arith.divf %195, %196 : vector<16x1xf32>
    %198 = vector.broadcast %190 : vector<16x1xf32> to vector<16x32xf32>
    %199 = arith.subf %186, %198 : vector<16x32xf32>
    %cst_120 = arith.constant 9.99999974E-6 : f32
    %200 = vector.broadcast %cst_120 : f32 to vector<16x1xf32>
    %201 = arith.addf %197, %200 : vector<16x1xf32>
    %202 = math.rsqrt %201 : vector<16x1xf32>
    %203 = vector.broadcast %202 : vector<16x1xf32> to vector<16x32xf32>
    %204 = arith.mulf %199, %203 : vector<16x32xf32>
    %c0_121 = arith.constant 0 : index
    %c0_122 = arith.constant 0 : index
    %205 = vector.load %arg37[%c0_121, %c0_122] : memref<1x32xf32, #tpu.memory_space<vmem>>, vector<1x32xf32>
    %206 = vector.broadcast %205 : vector<1x32xf32> to vector<16x32xf32>
    %207 = arith.mulf %204, %206 : vector<16x32xf32>
    %c0_123 = arith.constant 0 : index
    %c0_124 = arith.constant 0 : index
    %208 = vector.load %arg36[%c0_123, %c0_124] : memref<1x32xf32, #tpu.memory_space<vmem>>, vector<1x32xf32>
    %209 = vector.broadcast %208 : vector<1x32xf32> to vector<16x32xf32>
    %210 = arith.addf %207, %209 : vector<16x32xf32>
    %c0_125 = arith.constant 0 : index
    %c0_126 = arith.constant 0 : index
    %211 = vector.load %arg29[%c0_125, %c0_126] : memref<3x32xf32, #tpu.memory_space<vmem>>, vector<3x32xf32>
    %cst_127 = arith.constant dense<0.000000e+00> : vector<16x32xf32>
    %212 = tpu.matmul %0, %211, %cst_127 {dimension_numbers = #tpu.dot_dimension_numbers<[1], [0], [0], [1], [0, 0, 1, 1], [], []>} : vector<16x3xf32>, vector<3x32xf32>, vector<16x32xf32> -> vector<16x32xf32>
    %c0_128 = arith.constant 0 : index
    %c0_129 = arith.constant 0 : index
    %213 = vector.load %arg28[%c0_128, %c0_129] : memref<1x32xf32, #tpu.memory_space<vmem>>, vector<1x32xf32>
    %214 = vector.broadcast %213 : vector<1x32xf32> to vector<16x32xf32>
    %215 = arith.addf %212, %214 : vector<16x32xf32>
    %c0_130 = arith.constant 0 : index
    %c0_131 = arith.constant 0 : index
    %216 = vector.load %arg42[%c0_130, %c0_131] : memref<3x32xf32, #tpu.memory_space<vmem>>, vector<3x32xf32>
    %cst_132 = arith.constant dense<0.000000e+00> : vector<16x32xf32>
    %217 = tpu.matmul %2, %216, %cst_132 {dimension_numbers = #tpu.dot_dimension_numbers<[1], [0], [0], [1], [0, 0, 1, 1], [], []>} : vector<16x3xf32>, vector<3x32xf32>, vector<16x32xf32> -> vector<16x32xf32>
    %c0_133 = arith.constant 0 : index
    %c0_134 = arith.constant 0 : index
    %218 = vector.load %arg41[%c0_133, %c0_134] : memref<1x32xf32, #tpu.memory_space<vmem>>, vector<1x32xf32>
    %219 = vector.broadcast %218 : vector<1x32xf32> to vector<16x32xf32>
    %220 = arith.addf %217, %219 : vector<16x32xf32>
    %c0_135 = arith.constant 0 : index
    %c0_136 = arith.constant 0 : index
    %221 = vector.load %arg25[%c0_135, %c0_136] : memref<32x32xf32, #tpu.memory_space<vmem>>, vector<32x32xf32>
    %cst_137 = arith.constant dense<0.000000e+00> : vector<16x32xf32>
    %222 = tpu.matmul %215, %221, %cst_137 {dimension_numbers = #tpu.dot_dimension_numbers<[1], [0], [0], [1], [0, 0, 1, 1], [], []>} : vector<16x32xf32>, vector<32x32xf32>, vector<16x32xf32> -> vector<16x32xf32>
    %c0_138 = arith.constant 0 : index
    %c0_139 = arith.constant 0 : index
    %223 = vector.load %arg27[%c0_138, %c0_139] : memref<32x32xf32, #tpu.memory_space<vmem>>, vector<32x32xf32>
    %cst_140 = arith.constant dense<0.000000e+00> : vector<16x32xf32>
    %224 = tpu.matmul %210, %223, %cst_140 {dimension_numbers = #tpu.dot_dimension_numbers<[1], [0], [0], [1], [0, 0, 1, 1], [], []>} : vector<16x32xf32>, vector<32x32xf32>, vector<16x32xf32> -> vector<16x32xf32>
    %c0_141 = arith.constant 0 : index
    %c0_142 = arith.constant 0 : index
    %225 = vector.load %arg26[%c0_141, %c0_142] : memref<32x32xf32, #tpu.memory_space<vmem>>, vector<32x32xf32>
    %cst_143 = arith.constant dense<0.000000e+00> : vector<16x32xf32>
    %226 = tpu.matmul %220, %225, %cst_143 {dimension_numbers = #tpu.dot_dimension_numbers<[1], [0], [0], [1], [0, 0, 1, 1], [], []>} : vector<16x32xf32>, vector<32x32xf32>, vector<16x32xf32> -> vector<16x32xf32>
    %c0_144 = arith.constant 0 : index
    %c0_145 = arith.constant 0 : index
    %227 = vector.load %arg60[%c0_144, %c0_145] : memref<64x32xf32, #tpu.memory_space<vmem>>, vector<64x32xf32>
    %c0_146 = arith.constant 0 : index
    %c0_147 = arith.constant 0 : index
    %228 = vector.load %arg61[%c0_146, %c0_147] : memref<64x16xf32, #tpu.memory_space<vmem>>, vector<64x16xf32>
    %cst_148 = arith.constant dense<0.000000e+00> : vector<64x32xf32>
    %229 = tpu.matmul %228, %226, %cst_148 {dimension_numbers = #tpu.dot_dimension_numbers<[1], [0], [0], [1], [0, 0, 1, 1], [], []>} : vector<64x16xf32>, vector<16x32xf32>, vector<64x32xf32> -> vector<64x32xf32>
    %230 = arith.mulf %229, %227 : vector<64x32xf32>
    %cst_149 = arith.constant dense<0.000000e+00> : vector<64x16xf32>
    %231 = tpu.matmul %230, %222, %cst_149 {dimension_numbers = #tpu.dot_dimension_numbers<[1], [1], [0], [0], [0, 0, 1, 0], [], []>} : vector<64x32xf32>, vector<16x32xf32>, vector<64x16xf32> -> vector<64x16xf32>
    %cst_150 = arith.constant 0.353553385 : f32
    %232 = vector.broadcast %cst_150 : f32 to vector<64x16xf32>
    %233 = arith.mulf %231, %232 : vector<64x16xf32>
    %c0_151 = arith.constant 0 : index
    %c0_152 = arith.constant 0 : index
    %234 = vector.load %arg58[%c0_151, %c0_152] : memref<64x16xf32, #tpu.memory_space<vmem>>, vector<64x16xf32>
    %235 = arith.addf %233, %234 : vector<64x16xf32>
    %cst_153 = arith.constant dense<0xFF800000> : vector<64xf32>
    %236 = vector.multi_reduction <maximumf>, %235, %cst_153 [1] : vector<64x16xf32> to vector<64xf32>
    %237 = vector.shape_cast %236 : vector<64xf32> to vector<64x1xf32>
    %238 = vector.broadcast %237 : vector<64x1xf32> to vector<64x16xf32>
    %239 = arith.subf %235, %238 : vector<64x16xf32>
    %240 = math.exp %239 : vector<64x16xf32>
    %cst_154 = arith.constant dense<0.000000e+00> : vector<64xf32>
    %241 = vector.multi_reduction <add>, %240, %cst_154 [1] : vector<64x16xf32> to vector<64xf32>
    %242 = vector.shape_cast %241 : vector<64xf32> to vector<64x1xf32>
    %243 = tpu.reciprocal %242 {approx = true} : vector<64x1xf32> -> vector<64x1xf32>
    %244 = vector.broadcast %243 : vector<64x1xf32> to vector<64x16xf32>
    %245 = arith.mulf %240, %244 : vector<64x16xf32>
    %cst_155 = arith.constant dense<0.000000e+00> : vector<64x32xf32>
    %246 = tpu.matmul %245, %224, %cst_155 {dimension_numbers = #tpu.dot_dimension_numbers<[1], [0], [0], [1], [0, 0, 1, 1], [], []>} : vector<64x16xf32>, vector<16x32xf32>, vector<64x32xf32> -> vector<64x32xf32>
    %247 = arith.mulf %246, %227 : vector<64x32xf32>
    %c0_156 = arith.constant 0 : index
    %c0_157 = arith.constant 0 : index
    %248 = vector.load %arg59[%c0_156, %c0_157] : memref<16x64xf32, #tpu.memory_space<vmem>>, vector<16x64xf32>
    %cst_158 = arith.constant dense<0.000000e+00> : vector<16x32xf32>
    %249 = tpu.matmul %248, %247, %cst_158 {dimension_numbers = #tpu.dot_dimension_numbers<[1], [0], [0], [1], [0, 0, 1, 1], [], []>} : vector<16x64xf32>, vector<64x32xf32>, vector<16x32xf32> -> vector<16x32xf32>
    %c0_159 = arith.constant 0 : index
    %c0_160 = arith.constant 0 : index
    %250 = vector.load %arg24[%c0_159, %c0_160] : memref<32x32xf32, #tpu.memory_space<vmem>>, vector<32x32xf32>
    %cst_161 = arith.constant dense<0.000000e+00> : vector<16x32xf32>
    %251 = tpu.matmul %220, %250, %cst_161 {dimension_numbers = #tpu.dot_dimension_numbers<[1], [0], [0], [1], [0, 0, 1, 1], [], []>} : vector<16x32xf32>, vector<32x32xf32>, vector<16x32xf32> -> vector<16x32xf32>
    %c0_162 = arith.constant 0 : index
    %c0_163 = arith.constant 0 : index
    %252 = vector.load %arg23[%c0_162, %c0_163] : memref<32x32xf32, #tpu.memory_space<vmem>>, vector<32x32xf32>
    %cst_164 = arith.constant dense<0.000000e+00> : vector<16x32xf32>
    %253 = tpu.matmul %249, %252, %cst_164 {dimension_numbers = #tpu.dot_dimension_numbers<[1], [0], [0], [1], [0, 0, 1, 1], [], []>} : vector<16x32xf32>, vector<32x32xf32>, vector<16x32xf32> -> vector<16x32xf32>
    %254 = arith.addf %251, %253 : vector<16x32xf32>
    %c0_165 = arith.constant 0 : index
    %c0_166 = arith.constant 0 : index
    %255 = vector.load %arg20[%c0_165, %c0_166] : memref<1x32xf32, #tpu.memory_space<vmem>>, vector<1x32xf32>
    %256 = vector.broadcast %255 : vector<1x32xf32> to vector<16x32xf32>
    %257 = arith.addf %254, %256 : vector<16x32xf32>
    %258 = arith.addf %257, %220 : vector<16x32xf32>
    %cst_167 = arith.constant dense<0.000000e+00> : vector<16xf32>
    %259 = vector.multi_reduction <add>, %258, %cst_167 [1] : vector<16x32xf32> to vector<16xf32>
    %260 = vector.shape_cast %259 : vector<16xf32> to vector<16x1xf32>
    %cst_168 = arith.constant 3.200000e+01 : f32
    %261 = vector.broadcast %cst_168 : f32 to vector<16x1xf32>
    %262 = arith.divf %260, %261 : vector<16x1xf32>
    %263 = vector.broadcast %262 : vector<16x1xf32> to vector<16x32xf32>
    %264 = arith.subf %258, %263 : vector<16x32xf32>
    %265 = arith.mulf %264, %264 : vector<16x32xf32>
    %cst_169 = arith.constant dense<0.000000e+00> : vector<16xf32>
    %266 = vector.multi_reduction <add>, %265, %cst_169 [1] : vector<16x32xf32> to vector<16xf32>
    %267 = vector.shape_cast %266 : vector<16xf32> to vector<16x1xf32>
    %cst_170 = arith.constant 3.200000e+01 : f32
    %268 = vector.broadcast %cst_170 : f32 to vector<16x1xf32>
    %269 = arith.divf %267, %268 : vector<16x1xf32>
    %270 = vector.broadcast %262 : vector<16x1xf32> to vector<16x32xf32>
    %271 = arith.subf %258, %270 : vector<16x32xf32>
    %cst_171 = arith.constant 9.99999974E-6 : f32
    %272 = vector.broadcast %cst_171 : f32 to vector<16x1xf32>
    %273 = arith.addf %269, %272 : vector<16x1xf32>
    %274 = math.rsqrt %273 : vector<16x1xf32>
    %275 = vector.broadcast %274 : vector<16x1xf32> to vector<16x32xf32>
    %276 = arith.mulf %271, %275 : vector<16x32xf32>
    %c0_172 = arith.constant 0 : index
    %c0_173 = arith.constant 0 : index
    %277 = vector.load %arg22[%c0_172, %c0_173] : memref<1x32xf32, #tpu.memory_space<vmem>>, vector<1x32xf32>
    %278 = vector.broadcast %277 : vector<1x32xf32> to vector<16x32xf32>
    %279 = arith.mulf %276, %278 : vector<16x32xf32>
    %c0_174 = arith.constant 0 : index
    %c0_175 = arith.constant 0 : index
    %280 = vector.load %arg21[%c0_174, %c0_175] : memref<1x32xf32, #tpu.memory_space<vmem>>, vector<1x32xf32>
    %281 = vector.broadcast %280 : vector<1x32xf32> to vector<16x32xf32>
    %282 = arith.addf %279, %281 : vector<16x32xf32>
    %c0_176 = arith.constant 0 : index
    %c0_177 = arith.constant 0 : index
    %283 = vector.load %arg63[%c0_176, %c0_177] : memref<16x2xf32, #tpu.memory_space<vmem>>, vector<16x2xf32>
    %cst_178 = arith.constant dense<0.000000e+00> : vector<16x32xf32>
    %284 = tpu.matmul %283, %117, %cst_178 {dimension_numbers = #tpu.dot_dimension_numbers<[1], [0], [0], [1], [0, 0, 1, 1], [], []>} : vector<16x2xf32>, vector<2x32xf32>, vector<16x32xf32> -> vector<16x32xf32>
    %c0_179 = arith.constant 0 : index
    %c0_180 = arith.constant 0 : index
    %285 = vector.load %arg11[%c0_179, %c0_180] : memref<3x32xf32, #tpu.memory_space<vmem>>, vector<3x32xf32>
    %cst_181 = arith.constant dense<0.000000e+00> : vector<16x32xf32>
    %286 = tpu.matmul %2, %285, %cst_181 {dimension_numbers = #tpu.dot_dimension_numbers<[1], [0], [0], [1], [0, 0, 1, 1], [], []>} : vector<16x3xf32>, vector<3x32xf32>, vector<16x32xf32> -> vector<16x32xf32>
    %c0_182 = arith.constant 0 : index
    %c0_183 = arith.constant 0 : index
    %287 = vector.load %arg6[%c0_182, %c0_183] : memref<1x32xf32, #tpu.memory_space<vmem>>, vector<1x32xf32>
    %288 = vector.broadcast %287 : vector<1x32xf32> to vector<16x32xf32>
    %289 = arith.addf %286, %288 : vector<16x32xf32>
    %c0_184 = arith.constant 0 : index
    %c0_185 = arith.constant 0 : index
    %290 = vector.load %arg7[%c0_184, %c0_185] : memref<32x96xf32, #tpu.memory_space<vmem>>, vector<32x96xf32>
    %cst_186 = arith.constant dense<0.000000e+00> : vector<16x96xf32>
    %291 = tpu.matmul %282, %290, %cst_186 {dimension_numbers = #tpu.dot_dimension_numbers<[1], [0], [0], [1], [0, 0, 1, 1], [], []>} : vector<16x32xf32>, vector<32x96xf32>, vector<16x96xf32> -> vector<16x96xf32>
    %c0_187 = arith.constant 0 : index
    %c0_188 = arith.constant 0 : index
    %292 = vector.load %arg9[%c0_187, %c0_188] : memref<32x96xf32, #tpu.memory_space<vmem>>, vector<32x96xf32>
    %cst_189 = arith.constant dense<0.000000e+00> : vector<16x96xf32>
    %293 = tpu.matmul %284, %292, %cst_189 {dimension_numbers = #tpu.dot_dimension_numbers<[1], [0], [0], [1], [0, 0, 1, 1], [], []>} : vector<16x32xf32>, vector<32x96xf32>, vector<16x96xf32> -> vector<16x96xf32>
    %294 = arith.addf %291, %293 : vector<16x96xf32>
    %c0_190 = arith.constant 0 : index
    %c0_191 = arith.constant 0 : index
    %295 = vector.load %arg8[%c0_190, %c0_191] : memref<32x96xf32, #tpu.memory_space<vmem>>, vector<32x96xf32>
    %cst_192 = arith.constant dense<0.000000e+00> : vector<16x96xf32>
    %296 = tpu.matmul %289, %295, %cst_192 {dimension_numbers = #tpu.dot_dimension_numbers<[1], [0], [0], [1], [0, 0, 1, 1], [], []>} : vector<16x32xf32>, vector<32x96xf32>, vector<16x96xf32> -> vector<16x96xf32>
    %297 = arith.addf %294, %296 : vector<16x96xf32>
    %c0_193 = arith.constant 0 : index
    %c0_194 = arith.constant 0 : index
    %298 = vector.load %arg4[%c0_193, %c0_194] : memref<1x96xf32, #tpu.memory_space<vmem>>, vector<1x96xf32>
    %299 = vector.broadcast %298 : vector<1x96xf32> to vector<16x96xf32>
    %300 = arith.addf %297, %299 : vector<16x96xf32>
    %cst_195 = arith.constant 0.000000e+00 : f32
    %301 = vector.broadcast %cst_195 : f32 to vector<16x96xf32>
    %302 = arith.maximumf %300, %301 : vector<16x96xf32>
    %c0_196 = arith.constant 0 : index
    %c0_197 = arith.constant 0 : index
    %303 = vector.load %arg10[%c0_196, %c0_197] : memref<96x32xf32, #tpu.memory_space<vmem>>, vector<96x32xf32>
    %cst_198 = arith.constant dense<0.000000e+00> : vector<16x32xf32>
    %304 = tpu.matmul %302, %303, %cst_198 {dimension_numbers = #tpu.dot_dimension_numbers<[1], [0], [0], [1], [0, 0, 1, 1], [], []>} : vector<16x96xf32>, vector<96x32xf32>, vector<16x32xf32> -> vector<16x32xf32>
    %c0_199 = arith.constant 0 : index
    %c0_200 = arith.constant 0 : index
    %305 = vector.load %arg5[%c0_199, %c0_200] : memref<1x32xf32, #tpu.memory_space<vmem>>, vector<1x32xf32>
    %306 = vector.broadcast %305 : vector<1x32xf32> to vector<16x32xf32>
    %307 = arith.addf %304, %306 : vector<16x32xf32>
    %c0_201 = arith.constant 0 : index
    %c0_202 = arith.constant 0 : index
    %308 = vector.load %arg19[%c0_201, %c0_202] : memref<32x96xf32, #tpu.memory_space<vmem>>, vector<32x96xf32>
    %cst_203 = arith.constant dense<0.000000e+00> : vector<16x96xf32>
    %309 = tpu.matmul %307, %308, %cst_203 {dimension_numbers = #tpu.dot_dimension_numbers<[1], [0], [0], [1], [0, 0, 1, 1], [], []>} : vector<16x32xf32>, vector<32x96xf32>, vector<16x96xf32> -> vector<16x96xf32>
    %310 = vector.extract_strided_slice %309 {offsets = [0, 0], sizes = [16, 32], strides = [1, 1]} : vector<16x96xf32> to vector<16x32xf32>
    %311 = vector.extract_strided_slice %309 {offsets = [0, 32], sizes = [16, 32], strides = [1, 1]} : vector<16x96xf32> to vector<16x32xf32>
    %312 = vector.extract_strided_slice %309 {offsets = [0, 64], sizes = [16, 32], strides = [1, 1]} : vector<16x96xf32> to vector<16x32xf32>
    %c0_204 = arith.constant 0 : index
    %c0_205 = arith.constant 0 : index
    %313 = vector.load %arg60[%c0_204, %c0_205] : memref<64x32xf32, #tpu.memory_space<vmem>>, vector<64x32xf32>
    %c0_206 = arith.constant 0 : index
    %c0_207 = arith.constant 0 : index
    %314 = vector.load %arg61[%c0_206, %c0_207] : memref<64x16xf32, #tpu.memory_space<vmem>>, vector<64x16xf32>
    %cst_208 = arith.constant dense<0.000000e+00> : vector<64x32xf32>
    %315 = tpu.matmul %314, %312, %cst_208 {dimension_numbers = #tpu.dot_dimension_numbers<[1], [0], [0], [1], [0, 0, 1, 1], [], []>} : vector<64x16xf32>, vector<16x32xf32>, vector<64x32xf32> -> vector<64x32xf32>
    %316 = arith.mulf %315, %313 : vector<64x32xf32>
    %cst_209 = arith.constant dense<0.000000e+00> : vector<64x16xf32>
    %317 = tpu.matmul %316, %310, %cst_209 {dimension_numbers = #tpu.dot_dimension_numbers<[1], [1], [0], [0], [0, 0, 1, 0], [], []>} : vector<64x32xf32>, vector<16x32xf32>, vector<64x16xf32> -> vector<64x16xf32>
    %cst_210 = arith.constant 0.353553385 : f32
    %318 = vector.broadcast %cst_210 : f32 to vector<64x16xf32>
    %319 = arith.mulf %317, %318 : vector<64x16xf32>
    %c0_211 = arith.constant 0 : index
    %c0_212 = arith.constant 0 : index
    %320 = vector.load %arg58[%c0_211, %c0_212] : memref<64x16xf32, #tpu.memory_space<vmem>>, vector<64x16xf32>
    %321 = arith.addf %319, %320 : vector<64x16xf32>
    %cst_213 = arith.constant dense<0xFF800000> : vector<64xf32>
    %322 = vector.multi_reduction <maximumf>, %321, %cst_213 [1] : vector<64x16xf32> to vector<64xf32>
    %323 = vector.shape_cast %322 : vector<64xf32> to vector<64x1xf32>
    %324 = vector.broadcast %323 : vector<64x1xf32> to vector<64x16xf32>
    %325 = arith.subf %321, %324 : vector<64x16xf32>
    %326 = math.exp %325 : vector<64x16xf32>
    %cst_214 = arith.constant dense<0.000000e+00> : vector<64xf32>
    %327 = vector.multi_reduction <add>, %326, %cst_214 [1] : vector<64x16xf32> to vector<64xf32>
    %328 = vector.shape_cast %327 : vector<64xf32> to vector<64x1xf32>
    %329 = tpu.reciprocal %328 {approx = true} : vector<64x1xf32> -> vector<64x1xf32>
    %330 = vector.broadcast %329 : vector<64x1xf32> to vector<64x16xf32>
    %331 = arith.mulf %326, %330 : vector<64x16xf32>
    %cst_215 = arith.constant dense<0.000000e+00> : vector<64x32xf32>
    %332 = tpu.matmul %331, %311, %cst_215 {dimension_numbers = #tpu.dot_dimension_numbers<[1], [0], [0], [1], [0, 0, 1, 1], [], []>} : vector<64x16xf32>, vector<16x32xf32>, vector<64x32xf32> -> vector<64x32xf32>
    %333 = arith.mulf %332, %313 : vector<64x32xf32>
    %c0_216 = arith.constant 0 : index
    %c0_217 = arith.constant 0 : index
    %334 = vector.load %arg59[%c0_216, %c0_217] : memref<16x64xf32, #tpu.memory_space<vmem>>, vector<16x64xf32>
    %cst_218 = arith.constant dense<0.000000e+00> : vector<16x32xf32>
    %335 = tpu.matmul %334, %333, %cst_218 {dimension_numbers = #tpu.dot_dimension_numbers<[1], [0], [0], [1], [0, 0, 1, 1], [], []>} : vector<16x64xf32>, vector<64x32xf32>, vector<16x32xf32> -> vector<16x32xf32>
    %c0_219 = arith.constant 0 : index
    %c0_220 = arith.constant 0 : index
    %336 = vector.load %arg18[%c0_219, %c0_220] : memref<32x32xf32, #tpu.memory_space<vmem>>, vector<32x32xf32>
    %cst_221 = arith.constant dense<0.000000e+00> : vector<16x32xf32>
    %337 = tpu.matmul %307, %336, %cst_221 {dimension_numbers = #tpu.dot_dimension_numbers<[1], [0], [0], [1], [0, 0, 1, 1], [], []>} : vector<16x32xf32>, vector<32x32xf32>, vector<16x32xf32> -> vector<16x32xf32>
    %c0_222 = arith.constant 0 : index
    %c0_223 = arith.constant 0 : index
    %338 = vector.load %arg17[%c0_222, %c0_223] : memref<32x32xf32, #tpu.memory_space<vmem>>, vector<32x32xf32>
    %cst_224 = arith.constant dense<0.000000e+00> : vector<16x32xf32>
    %339 = tpu.matmul %335, %338, %cst_224 {dimension_numbers = #tpu.dot_dimension_numbers<[1], [0], [0], [1], [0, 0, 1, 1], [], []>} : vector<16x32xf32>, vector<32x32xf32>, vector<16x32xf32> -> vector<16x32xf32>
    %340 = arith.addf %337, %339 : vector<16x32xf32>
    %c0_225 = arith.constant 0 : index
    %c0_226 = arith.constant 0 : index
    %341 = vector.load %arg14[%c0_225, %c0_226] : memref<1x32xf32, #tpu.memory_space<vmem>>, vector<1x32xf32>
    %342 = vector.broadcast %341 : vector<1x32xf32> to vector<16x32xf32>
    %343 = arith.addf %340, %342 : vector<16x32xf32>
    %344 = arith.addf %343, %307 : vector<16x32xf32>
    %cst_227 = arith.constant dense<0.000000e+00> : vector<16xf32>
    %345 = vector.multi_reduction <add>, %344, %cst_227 [1] : vector<16x32xf32> to vector<16xf32>
    %346 = vector.shape_cast %345 : vector<16xf32> to vector<16x1xf32>
    %cst_228 = arith.constant 3.200000e+01 : f32
    %347 = vector.broadcast %cst_228 : f32 to vector<16x1xf32>
    %348 = arith.divf %346, %347 : vector<16x1xf32>
    %349 = vector.broadcast %348 : vector<16x1xf32> to vector<16x32xf32>
    %350 = arith.subf %344, %349 : vector<16x32xf32>
    %351 = arith.mulf %350, %350 : vector<16x32xf32>
    %cst_229 = arith.constant dense<0.000000e+00> : vector<16xf32>
    %352 = vector.multi_reduction <add>, %351, %cst_229 [1] : vector<16x32xf32> to vector<16xf32>
    %353 = vector.shape_cast %352 : vector<16xf32> to vector<16x1xf32>
    %cst_230 = arith.constant 3.200000e+01 : f32
    %354 = vector.broadcast %cst_230 : f32 to vector<16x1xf32>
    %355 = arith.divf %353, %354 : vector<16x1xf32>
    %356 = vector.broadcast %348 : vector<16x1xf32> to vector<16x32xf32>
    %357 = arith.subf %344, %356 : vector<16x32xf32>
    %cst_231 = arith.constant 9.99999974E-6 : f32
    %358 = vector.broadcast %cst_231 : f32 to vector<16x1xf32>
    %359 = arith.addf %355, %358 : vector<16x1xf32>
    %360 = math.rsqrt %359 : vector<16x1xf32>
    %361 = vector.broadcast %360 : vector<16x1xf32> to vector<16x32xf32>
    %362 = arith.mulf %357, %361 : vector<16x32xf32>
    %c0_232 = arith.constant 0 : index
    %c0_233 = arith.constant 0 : index
    %363 = vector.load %arg16[%c0_232, %c0_233] : memref<1x32xf32, #tpu.memory_space<vmem>>, vector<1x32xf32>
    %364 = vector.broadcast %363 : vector<1x32xf32> to vector<16x32xf32>
    %365 = arith.mulf %362, %364 : vector<16x32xf32>
    %c0_234 = arith.constant 0 : index
    %c0_235 = arith.constant 0 : index
    %366 = vector.load %arg15[%c0_234, %c0_235] : memref<1x32xf32, #tpu.memory_space<vmem>>, vector<1x32xf32>
    %367 = vector.broadcast %366 : vector<1x32xf32> to vector<16x32xf32>
    %368 = arith.addf %365, %367 : vector<16x32xf32>
    %c0_236 = arith.constant 0 : index
    %c0_237 = arith.constant 0 : index
    %369 = vector.load %arg13[%c0_236, %c0_237] : memref<32x4xf32, #tpu.memory_space<vmem>>, vector<32x4xf32>
    %cst_238 = arith.constant dense<0.000000e+00> : vector<16x4xf32>
    %370 = tpu.matmul %368, %369, %cst_238 {dimension_numbers = #tpu.dot_dimension_numbers<[1], [0], [0], [1], [0, 0, 1, 1], [], []>} : vector<16x32xf32>, vector<32x4xf32>, vector<16x4xf32> -> vector<16x4xf32>
    %c0_239 = arith.constant 0 : index
    %c0_240 = arith.constant 0 : index
    %371 = vector.load %arg12[%c0_239, %c0_240] : memref<1x4xf32, #tpu.memory_space<vmem>>, vector<1x4xf32>
    %372 = vector.broadcast %371 : vector<1x4xf32> to vector<16x4xf32>
    %373 = arith.addf %370, %372 : vector<16x4xf32>
    %374 = tpu.iota {dimensions = array<i32: 1>} : vector<16x4xi32>
    %cst_241 = arith.constant 0.000000e+00 : f32
    %375 = vector.broadcast %cst_241 : f32 to vector<16x4xf32>
    %376 = arith.maximumf %373, %375 : vector<16x4xf32>
    %377 = math.absf %373 : vector<16x4xf32>
    %cst_242 = arith.constant 0.000000e+00 : f32
    %378 = vector.broadcast %cst_242 : f32 to vector<16x4xf32>
    %379 = arith.subf %378, %377 : vector<16x4xf32>
    %380 = math.exp %379 : vector<16x4xf32>
    %cst_243 = arith.constant 1.000000e+00 : f32
    %381 = vector.broadcast %cst_243 : f32 to vector<16x4xf32>
    %382 = arith.addf %381, %380 : vector<16x4xf32>
    %383 = math.log %382 : vector<16x4xf32>
    %384 = arith.addf %376, %383 : vector<16x4xf32>
    %c2_i32 = arith.constant 2 : i32
    %385 = vector.broadcast %c2_i32 : i32 to vector<16x4xi32>
    %386 = arith.cmpi slt, %374, %385 : vector<16x4xi32>
    %387 = arith.select %386, %373, %384 : vector<16x4xi1>, vector<16x4xf32>
    %c0_244 = arith.constant 0 : index
    %c0_245 = arith.constant 0 : index
    %388 = vector.load %arg64[%c0_244, %c0_245] : memref<16x4xf32, #tpu.memory_space<vmem>>, vector<16x4xf32>
    tpu.vector_store %arg64[%c0_244, %c0_245], %387 {strides = array<i32>} : memref<16x4xf32, #tpu.memory_space<vmem>>, vector<16x4xf32>,
    return
  }
}

</mosaic_0001>

<bundles_post_ra>
// kernel: _lambda_.1
= control target key start
LH: loop header
LB: loop body
LE: loop exit
PB: predicated region body
PF: predicated region fallthrough
CT: control target
= control target key end

     0   :  { %s8916_s6 = smov 1   ;;  %s8917_s10 = smov 2   ;;  %s10397_s0 = inlined_call_operand.smem [shape: u32[65], index: -1, kind: input, shape index: {}] }
   0x1   :  { %s9039_s5 = sld [smem:[%s10397_s0]]   ;;  %s8918_s14 = smov 3  }
   0x2   :  { %s9044_s9 = sld [smem:[%s10397_s0 + %s8916_s6]]   ;;  %s8919_s18 = smov 4  }
   0x3   :  { %s9049_s13 = sld [smem:[%s10397_s0 + %s8917_s10]]   ;;  %s8920_s22 = smov 5  }
   0x4   :  { %s9054_s17 = sld [smem:[%s10397_s0 + %s8918_s14]]   ;;  %s8921_s26 = smov 6  }
   0x5   :  { %s9059_s21 = sld [smem:[%s10397_s0 + %s8919_s18]]   ;;  %s8922_s30 = smov 7  }
   0x6   :  { %s9064_s25 = sld [smem:[%s10397_s0 + %s8920_s22]]   ;;  %s8923_s4 = smov 8  }
   0x7   :  { %10443 = sst [smem:[#allocation92_spill]] %s9039_s5  ;;  %s8924_s10 = smov 9  }
   0x8   :  { %10444 = sst [smem:[#allocation93_spill]] %s9044_s9  ;;  %s8925_s15 = smov 10  }
   0x9   :  { %10445 = sst [smem:[#allocation94_spill]] %s9049_s13  ;;  %s8926_s20 = smov 11  }
   0xa   :  { %10446 = sst [smem:[#allocation95_spill]] %s9054_s17  ;;  %s8928_s1 = smov 13  }
   0xb   :  { %10447 = sst [smem:[#allocation96_spill]] %s9059_s21  ;;  %s8929_s7 = smov 14  }
   0xc   :  { %s9069_s29 = sld [smem:[%s10397_s0 + %s8921_s26]]   ;;  %s8927_s26 = smov 12  }
   0xd   :  { %s9074_s3 = sld [smem:[%s10397_s0 + %s8922_s30]]   ;;  %s8931_s22 = smov 16  }
   0xe   :  { %s9079_s8 = sld [smem:[%s10397_s0 + %s8923_s4]]   ;;  %s8932_s28 = smov 17  }
   0xf   :  { %s9084_s14 = sld [smem:[%s10397_s0 + %s8924_s10]]  }
  0x10   :  { %s9089_s19 = sld [smem:[%s10397_s0 + %s8925_s15]]   ;;  %s8930_s15 = smov 15  }
  0x11   :  { %s9094_s24 = sld [smem:[%s10397_s0 + %s8926_s20]]  }
  0x12   :  { %10448 = sst [smem:[#allocation97_spill]] %s9069_s29 }
  0x13   :  { %10449 = sst [smem:[#allocation98_spill]] %s9074_s3 }
  0x14   :  { %s9099_s30 = sld [smem:[%s10397_s0 + %s8927_s26]]  }
  0x15   :  { %10450 = sst [smem:[#allocation99_spill]] %s9084_s14 }
  0x16   :  { %10451 = sst [smem:[#allocation100_spill]] %s9089_s19 }
  0x17   :  { %10452 = sst [smem:[#allocation101_spill]] %s9094_s24 }
  0x18   :  { %s9104_s6 = sld [smem:[%s10397_s0 + %s8928_s1]]  }
  0x19   :  { %s9109_s12 = sld [smem:[%s10397_s0 + %s8929_s7]]   ;;  %s8933_s7 = smov 18  }
  0x1a   :  { %s9114_s20 = sld [smem:[%s10397_s0 + %s8930_s15]]   ;;  %s8934_s15 = smov 19  }
  0x1b   :  { %s9119_s27 = sld [smem:[%s10397_s0 + %s8931_s22]]   ;;  %s8935_s22 = smov 20  }
  0x1c   :  { %s9124_s4 = sld [smem:[%s10397_s0 + %s8932_s28]]   ;;  %s8936_s28 = smov 21  }
  0x1d   :  { %s9134_s19 = sld [smem:[%s10397_s0 + %s8934_s15]]   ;;  %s8938_s15 = smov 23  }
  0x1e   :  { %10453 = sst [smem:[#allocation102_spill]] %s9104_s6 }
  0x1f   :  { %10454 = sst [smem:[#allocation103_spill]] %s9109_s12 }
  0x20   :  { %s9129_s6 = sld [smem:[%s10397_s0 + %s8933_s7]]   ;;  %s8937_s7 = smov 22  }
  0x21   :  { %10455 = sst [smem:[#allocation104_spill]] %s9119_s27 }
  0x22   :  { %10456 = sst [smem:[#allocation105_spill]] %s9124_s4 }
  0x23   :  { %10457 = sst [smem:[#allocation106_spill]] %s9134_s19 }
  0x24   :  { %s9139_s3 = sld [smem:[%s10397_s0 + %s8935_s22]]   ;;  %s8939_s22 = smov 24  }
  0x25   :  { %s9144_s4 = sld [smem:[%s10397_s0 + %s8936_s28]]   ;;  %s8940_s28 = smov 25  }
  0x26   :  { %s9149_s14 = sld [smem:[%s10397_s0 + %s8937_s7]]   ;;  %s8941_s7 = smov 26  }
  0x27   :  { %s9154_s17 = sld [smem:[%s10397_s0 + %s8938_s15]]   ;;  %s8942_s15 = smov 27  }
  0x28   :  { %s9159_s13 = sld [smem:[%s10397_s0 + %s8939_s22]]   ;;  %s8943_s22 = smov 28  }
  0x29   :  { %s9164_s5 = sld [smem:[%s10397_s0 + %s8940_s28]]   ;;  %s8944_s28 = smov 29  }
  0x2a   :  { %s9169_s9 = sld [smem:[%s10397_s0 + %s8941_s7]]   ;;  %s8945_s7 = smov 30  }
  0x2b   :  { %10458 = sst [smem:[#allocation107_spill]] %s9144_s4 }
  0x2c   :  { %s9179_s4 = sld [smem:[%s10397_s0 + %s8943_s22]]   ;;  %s8947_s22 = smov 32  }
  0x2d   :  { %10459 = sst [smem:[#allocation108_spill]] %s9154_s17 }
  0x2e   :  { %s9174_s17 = sld [smem:[%s10397_s0 + %s8942_s15]]   ;;  %s8946_s15 = smov 31  }
  0x2f   :  { %10460 = sst [smem:[#allocation109_spill]] %s9164_s5 }
  0x30   :  { %10461 = sst [smem:[#allocation110_spill]] %s9169_s9 }
  0x31   :  { %s9184_s5 = sld [smem:[%s10397_s0 + %s8944_s28]]   ;;  %s8948_s28 = smov 33  }
  0x32   :  { %10462 = sst [smem:[#allocation111_spill]] %s9179_s4 }
  0x33   :  { %s9189_s9 = sld [smem:[%s10397_s0 + %s8945_s7]]   ;;  %s8949_s7 = smov 34  }
  0x34   :  { %s9194_s19 = sld [smem:[%s10397_s0 + %s8946_s15]]   ;;  %s8950_s15 = smov 35  }
  0x35   :  { %s9199_s4 = sld [smem:[%s10397_s0 + %s8947_s22]]   ;;  %s8951_s22 = smov 36  }
  0x36   :  { %s9204_s27 = sld [smem:[%s10397_s0 + %s8948_s28]]   ;;  %s8952_s28 = smov 37  }
  0x37   :  { %s9214_s12 = sld [smem:[%s10397_s0 + %s8950_s15]]   ;;  %s8954_s15 = smov 39  }
  0x38   :  { %s9224_s24 = sld [smem:[%s10397_s0 + %s8952_s28]]   ;;  %s8956_s28 = smov 41  }
  0x39   :  { %10463 = sst [smem:[#allocation112_spill]] %s9189_s9 }
  0x3a   :  { %s9209_s9 = sld [smem:[%s10397_s0 + %s8949_s7]]   ;;  %s8953_s7 = smov 38  }
  0x3b   :  { %10464 = sst [smem:[#allocation113_spill]] %s9199_s4 }
  0x3c   :  { %s9219_s4 = sld [smem:[%s10397_s0 + %s8951_s22]]   ;;  %s8955_s22 = smov 40  }
  0x3d   :  { %10466 = sst [smem:[#allocation115_spill]] %s9214_s12 }
  0x3e   :  { %10467 = sst [smem:[#allocation116_spill]] %s9224_s24 }
  0x3f   :  { %s9234_s12 = sld [smem:[%s10397_s0 + %s8954_s15]]   ;;  %s8958_s15 = smov 43  }
  0x40   :  { %10465 = sst [smem:[#allocation114_spill]] %s9209_s9 }
  0x41   :  { %s9229_s9 = sld [smem:[%s10397_s0 + %s8953_s7]]   ;;  %s8957_s7 = smov 42  }
  0x42   :  { %s9239_s29 = sld [smem:[%s10397_s0 + %s8955_s22]]   ;;  %s8959_s22 = smov 44  }
  0x43   :  { %s9244_s24 = sld [smem:[%s10397_s0 + %s8956_s28]]   ;;  %s8960_s28 = smov 45  }
  0x44   :  { %s9254_s21 = sld [smem:[%s10397_s0 + %s8958_s15]]   ;;  %s8962_s15 = smov 47  }
  0x47   :  { %10468 = sst [smem:[#allocation117_spill]] %s9229_s9 }
  0x48   :  { %10469 = sst [smem:[#allocation118_spill]] %s9239_s29 }
  0x49   :  { %10470 = sst [smem:[#allocation119_spill]] %s9244_s24 }
  0x4a   :  { %s9249_s9 = sld [smem:[%s10397_s0 + %s8957_s7]]   ;;  %s8961_s7 = smov 46  }
  0x4b   :  { %10472 = sst [smem:[#allocation121_spill]] %s9254_s21 }
  0x4c   :  { %s9259_s29 = sld [smem:[%s10397_s0 + %s8959_s22]]   ;;  %s8963_s22 = smov 48  }
  0x4d   :  { %s9264_s24 = sld [smem:[%s10397_s0 + %s8960_s28]]   ;;  %s8964_s28 = smov 49  }
  0x4e   :  { %s9274_s21 = sld [smem:[%s10397_s0 + %s8962_s15]]   ;;  %s8966_s15 = smov 51  }
  0x50   :  { %10471 = sst [smem:[#allocation120_spill]] %s9249_s9 }
  0x51   :  { %s9269_s9 = sld [smem:[%s10397_s0 + %s8961_s7]]   ;;  %s8965_s7 = smov 50  }
  0x52   :  { %10473 = sst [smem:[#allocation122_spill]] %s9259_s29 }
  0x53   :  { %10474 = sst [smem:[#allocation123_spill]] %s9264_s24 }
  0x54   :  { %10476 = sst [smem:[#allocation125_spill]] %s9274_s21 }
  0x55   :  { %s9279_s29 = sld [smem:[%s10397_s0 + %s8963_s22]]   ;;  %s8967_s22 = smov 52  }
  0x56   :  { %s9284_s24 = sld [smem:[%s10397_s0 + %s8964_s28]]   ;;  %s8968_s28 = smov 53  }
  0x57   :  { %10475 = sst [smem:[#allocation124_spill]] %s9269_s9 }
  0x58   :  { %s9289_s9 = sld [smem:[%s10397_s0 + %s8965_s7]]   ;;  %s8969_s7 = smov 54  }
  0x59   :  { %s9294_s21 = sld [smem:[%s10397_s0 + %s8966_s15]]   ;;  %s8970_s15 = smov 55  }
  0x5b   :  { %10477 = sst [smem:[#allocation126_spill]] %s9279_s29 }
  0x5c   :  { %10478 = sst [smem:[#allocation127_spill]] %s9284_s24 }
  0x5d   :  { %s9299_s29 = sld [smem:[%s10397_s0 + %s8967_s22]]   ;;  %s8971_s22 = smov 56  }
  0x5e   :  { %10479 = sst [smem:[#allocation128_spill]] %s9289_s9 }
  0x5f   :  { %10480 = sst [smem:[#allocation129_spill]] %s9294_s21 }
  0x60   :  { %s9304_s24 = sld [smem:[%s10397_s0 + %s8968_s28]]   ;;  %s8972_s28 = smov 57  }
  0x61   :  { %s9309_s9 = sld [smem:[%s10397_s0 + %s8969_s7]]   ;;  %s8973_s7 = smov 58  }
  0x62   :  { %s9314_s21 = sld [smem:[%s10397_s0 + %s8970_s15]]   ;;  %s8974_s15 = smov 59  }
  0x63   :  { %10481 = sst [smem:[#allocation130_spill]] %s9299_s29 }
  0x64   :  { %s9319_s29 = sld [smem:[%s10397_s0 + %s8971_s22]]   ;;  %s8975_s22 = smov 60  }
  0x66   :  { %10482 = sst [smem:[#allocation131_spill]] %s9304_s24 }
  0x67   :  { %10483 = sst [smem:[#allocation132_spill]] %s9309_s9 }
  0x68   :  { %10484 = sst [smem:[#allocation133_spill]] %s9314_s21 }
  0x69   :  { %s9324_s24 = sld [smem:[%s10397_s0 + %s8972_s28]]   ;;  %s8976_s28 = smov 61  }
  0x6a   :  { %10485 = sst [smem:[#allocation134_spill]] %s9319_s29 }
  0x6b   :  { %s9329_s9 = sld [smem:[%s10397_s0 + %s8973_s7]]   ;;  %s8977_s7 = smov 62  }
  0x6c   :  { %s9334_s21 = sld [smem:[%s10397_s0 + %s8974_s15]]   ;;  %s8978_s15 = smov 63  }
  0x6d   :  { %s9339_s29 = sld [smem:[%s10397_s0 + %s8975_s22]]   ;;  %s8979_s22 = smov 64  }
  0x6f   :  { %10486 = sst [smem:[#allocation135_spill]] %s9324_s24 }
  0x70   :  { %s9344_s24 = sld [smem:[%s10397_s0 + %s8976_s28]]  }
  0x71   :  { %10487 = sst [smem:[#allocation136_spill]] %s9329_s9 }
  0x72   :  { %10488 = sst [smem:[#allocation137_spill]] %s9334_s21 }
  0x73   :  { %10489 = sst [smem:[#allocation138_spill]] %s9339_s29 }
  0x74   :  { %s9349_s9 = sld [smem:[%s10397_s0 + %s8977_s7]]  }
  0x75   :  { %s9354_s21 = sld [smem:[%s10397_s0 + %s8978_s15]]  }
  0x76   :  { %s9359_s29 = sld [smem:[%s10397_s0 + %s8979_s22]]  }
  0x77   :  { %134 = vsyncpa [#allocation3], 0 }
  0x78   :  { %135 = vsyncpa [#allocation5], 0 }
  0x79   :  { %136 = vsyncpa [#allocation8], 0 }
  0x7a   :  { %137 = vsyncpa [#allocation11], 0 }
  0x7b   :  { %138 = vsyncpa [#allocation14], 0 }
  0x7c   :  { %139 = vsyncpa [#allocation17], 0 }
  0x7d   :  { %140 = vsyncpa [#allocation20], 0 }
  0x7e   :  { %141 = vsyncpa [#allocation23], 0 }
  0x7f   :  { %142 = vsyncpa [#allocation26], 0 }
  0x80   :  { %143 = vsyncpa [#allocation29], 0 }
  0x81   :  { %144 = vsyncpa [#allocation32], 0 }
  0x82   :  { %145 = vsyncpa [#allocation35], 0 }
  0x83   :  { %146 = vsyncpa [#allocation38], 0 }
  0x84   :  { %147 = vsyncpa [#allocation41], 0 }
  0x85   :  { %148 = vsyncpa [#allocation44], 0 }
  0x86   :  { %149 = vsyncpa [#allocation47], 0 }
  0x87   :  { %150 = vsyncpa [#allocation50], 0 }
  0x88   :  { %151 = vsyncpa [#allocation53], 0 }
  0x89   :  { %152 = vsyncpa [#allocation56], 0 }
  0x8a   :  { %153 = vsyncpa [#allocation59], 0 }
  0x8b   :  { %154 = vsyncpa [#allocation62], 0 }
  0x8c   :  { %155 = vsyncpa [#allocation65], 0 }
  0x8d   :  { %156 = vsyncpa [#allocation68], 0  ;;  %s8980_s0 = smov [#allocation4]   ;;  %s8981_s1 = smov [#allocation7]  }
  0x8e   :  { %s181_s28 = sshll.u32 %s8980_s0, 4  ;;  %s202_s2 = sshll.u32 %s8981_s1, 4  ;;  %s182_s28 = int_to_ptr.vmem [resolvable:$true] %s181_s28  ;;  %s9361_s2 = int_to_ptr.vmem [resolvable:$true] %s202_s2 }
  0x8f   :  { %s7902_s7 = scalar_lea.hbm %s9064_s25, 16 }
  0x90   :  { %p7903_p0 = scmp.ne.s32.totalorder %s9064_s25, %s7902_s7  ;;  %p7906_p1 = scmp.lt.u32.totalorder %s7902_s7, %s9064_s25 }
  0x92   :  { %p7908_p2 = pnand %p7906_p1, %p7903_p0 }
  0x94   :  { %7911 = shalt.err (!%p7908_p2)
}
  0x95   :  { %s7912_s10 = scalar_lea.vmem %s182_s28, 16  ;;  %s7916_s11 = scalar_lea.vmem %s182_s28, 32 }
  0x96   :  { %p7913_p3 = scmp.ne.s32.totalorder %s182_s28, %s7912_s10  ;;  %p7917_p4 = scmp.lt.s32.totalorder %s182_s28, %s182_s28 }
  0x97   :  { %p7918_p5 = scmp.lt.s32.totalorder %s7916_s11, %s7912_s10 }
  0x99   :  { %p7919_p6 = por %p7918_p5, %p7917_p4 }
  0x9b   :  { %p7920_p7 = pnand %p7919_p6, %p7913_p3 }
  0x9d   :  { %7923 = shalt.err (!%p7920_p7)
}
  0x9e   :  { %184 = dma.hbm_to_vmem [thread:$0]  %s9064_s25, 16, %s182_s28, [#allocation5]  }
  0x9f   :  { %s7924_s15 = scalar_lea.hbm %s9079_s8, 512 }
  0xa0   :  { %p7925_p8 = scmp.ne.s32.totalorder %s9079_s8, %s7924_s15  ;;  %p7928_p9 = scmp.lt.u32.totalorder %s7924_s15, %s9079_s8 }
  0xa2   :  { %p7930_p10 = pnand %p7928_p9, %p7925_p8 }
  0xa4   :  { %7933 = shalt.err (!%p7930_p10)
}
  0xa5   :  { %s7934_s16 = scalar_lea.vmem %s9361_s2, 512  ;;  %p7939_p12 = scmp.lt.s32.totalorder %s9361_s2, %s9361_s2 }
  0xa6   :  { %p7935_p11 = scmp.ne.s32.totalorder %s9361_s2, %s7934_s16  ;;  %p7940_p13 = scmp.lt.s32.totalorder %s7934_s16, %s7934_s16 }
  0xa8   :  { %p7941_p0 = por %p7940_p13, %p7939_p12 }
  0xaa   :  { %p7942_p1 = pnand %p7941_p0, %p7935_p11 }
  0xac   :  { %7945 = shalt.err (!%p7942_p1)
}
  0xad   :  { %s8982_s18 = smov 128   ;;  %s8983_s25 = smov 8  }
  0xae   :  { %208 = dma.hbm_to_vmem [thread:$0]  %s9079_s8, 512, %s9361_s2, [#allocation8], %s8982_s18, %s8982_s18, %s8983_s25  }
  0xaf   :  { %s8984_s22 = smov [#allocation10]   ;;  %s8985_s26 = smov [#allocation13]  }
  0xb0   :  { %s229_s23 = sshll.u32 %s8984_s22, 4  ;;  %s251_s0 = sshll.u32 %s8985_s26, 4  ;;  %s230_s23 = int_to_ptr.vmem [resolvable:$true] %s229_s23  ;;  %s252_s0 = int_to_ptr.vmem [resolvable:$true] %s251_s0 }
  0xb1   :  { %s7946_s28 = scalar_lea.hbm %s9099_s30, 16 }
  0xb2   :  { %p7947_p2 = scmp.ne.s32.totalorder %s9099_s30, %s7946_s28  ;;  %p7950_p3 = scmp.lt.u32.totalorder %s7946_s28, %s9099_s30 }
  0xb4   :  { %p7952_p4 = pnand %p7950_p3, %p7947_p2 }
  0xb6   :  { %7955 = shalt.err (!%p7952_p4)
}
  0xb7   :  { %s7956_s1 = scalar_lea.vmem %s230_s23, 16  ;;  %s7960_s7 = scalar_lea.vmem %s230_s23, 32 }
  0xb8   :  { %p7957_p5 = scmp.ne.s32.totalorder %s230_s23, %s7956_s1  ;;  %p7961_p6 = scmp.lt.s32.totalorder %s230_s23, %s230_s23 }
  0xb9   :  { %p7962_p7 = scmp.lt.s32.totalorder %s7960_s7, %s7956_s1 }
  0xbb   :  { %p7963_p8 = por %p7962_p7, %p7961_p6 }
  0xbd   :  { %p7964_p9 = pnand %p7963_p8, %p7957_p5 }
  0xbf   :  { %7967 = shalt.err (!%p7964_p9)
}
  0xc0   :  { %232 = dma.hbm_to_vmem [thread:$0]  %s9099_s30, 16, %s230_s23, [#allocation11]  }
  0xc1   :  { %s7968_s8 = scalar_lea.hbm %s9114_s20, 16 }
  0xc2   :  { %p7969_p10 = scmp.ne.s32.totalorder %s9114_s20, %s7968_s8  ;;  %p7972_p11 = scmp.lt.u32.totalorder %s7968_s8, %s9114_s20 }
  0xc4   :  { %p7974_p12 = pnand %p7972_p11, %p7969_p10 }
  0xc6   :  { %7977 = shalt.err (!%p7974_p12)
}
  0xc7   :  { %s7978_s2 = scalar_lea.vmem %s252_s0, 16  ;;  %s7982_s10 = scalar_lea.vmem %s252_s0, 32 }
  0xc8   :  { %p7979_p13 = scmp.ne.s32.totalorder %s252_s0, %s7978_s2  ;;  %p7983_p0 = scmp.lt.s32.totalorder %s252_s0, %s252_s0 }
  0xc9   :  { %p7984_p1 = scmp.lt.s32.totalorder %s7982_s10, %s7978_s2 }
  0xcb   :  { %p7985_p2 = por %p7984_p1, %p7983_p0 }
  0xcd   :  { %p7986_p3 = pnand %p7985_p2, %p7979_p13 }
  0xcf   :  { %7989 = shalt.err (!%p7986_p3)
}
  0xd0   :  { %254 = dma.hbm_to_vmem [thread:$0]  %s9114_s20, 16, %s252_s0, [#allocation14]  }
  0xd1   :  { %s8986_s11 = smov [#allocation16]   ;;  %s8987_s15 = smov [#allocation19]  }
  0xd2   :  { %s272_s30 = sshll.u32 %s8986_s11, 4  ;;  %s297_s16 = sshll.u32 %s8987_s15, 4  ;;  %s273_s30 = int_to_ptr.vmem [resolvable:$true] %s272_s30  ;;  %s298_s16 = int_to_ptr.vmem [resolvable:$true] %s297_s16 }
  0xd3   :  { %s7990_s22 = scalar_lea.hbm %s9129_s6, 512 }
  0xd4   :  { %p7991_p4 = scmp.ne.s32.totalorder %s9129_s6, %s7990_s22  ;;  %p7994_p5 = scmp.lt.u32.totalorder %s7990_s22, %s9129_s6 }
  0xd6   :  { %p7996_p6 = pnand %p7994_p5, %p7991_p4 }
  0xd8   :  { %7999 = shalt.err (!%p7996_p6)
}
  0xd9   :  { %s8000_s23 = scalar_lea.vmem %s273_s30, 512  ;;  %p8005_p8 = scmp.lt.s32.totalorder %s273_s30, %s273_s30 }
  0xda   :  { %p8001_p7 = scmp.ne.s32.totalorder %s273_s30, %s8000_s23  ;;  %p8006_p9 = scmp.lt.s32.totalorder %s8000_s23, %s8000_s23 }
  0xdc   :  { %p8007_p10 = por %p8006_p9, %p8005_p8 }
  0xde   :  { %p8008_p11 = pnand %p8007_p10, %p8001_p7 }
  0xe0   :  { %8011 = shalt.err (!%p8008_p11)
}
  0xe1   :  { %278 = dma.hbm_to_vmem [thread:$0]  %s9129_s6, 512, %s273_s30, [#allocation17], %s8982_s18, %s8982_s18, %s8983_s25  }
  0xe2   :  { %s8012_s20 = scalar_lea.hbm %s9139_s3, 16 }
  0xe3   :  { %p8013_p12 = scmp.ne.s32.totalorder %s9139_s3, %s8012_s20  ;;  %p8016_p13 = scmp.lt.u32.totalorder %s8012_s20, %s9139_s3 }
  0xe5   :  { %p8018_p0 = pnand %p8016_p13, %p8013_p12 }
  0xe7   :  { %8021 = shalt.err (!%p8018_p0)
}
  0xe8   :  { %s8022_s26 = scalar_lea.vmem %s298_s16, 16  ;;  %s8026_s0 = scalar_lea.vmem %s298_s16, 32 }
  0xe9   :  { %p8023_p1 = scmp.ne.s32.totalorder %s298_s16, %s8022_s26  ;;  %p8027_p2 = scmp.lt.s32.totalorder %s298_s16, %s298_s16 }
  0xea   :  { %p8028_p3 = scmp.lt.s32.totalorder %s8026_s0, %s8022_s26 }
  0xec   :  { %p8029_p4 = por %p8028_p3, %p8027_p2 }
  0xee   :  { %p8030_p5 = pnand %p8029_p4, %p8023_p1 }
  0xf0   :  { %8033 = shalt.err (!%p8030_p5)
}
  0xf1   :  { %300 = dma.hbm_to_vmem [thread:$0]  %s9139_s3, 16, %s298_s16, [#allocation20]  }
  0xf2   :  { %s8988_s28 = smov [#allocation22]   ;;  %s8989_s1 = smov [#allocation25]  }
  0xf3   :  { %s317_s6 = sshll.u32 %s8988_s28, 4  ;;  %s338_s7 = sshll.u32 %s8989_s1, 4  ;;  %s318_s6 = int_to_ptr.vmem [resolvable:$true] %s317_s6  ;;  %s9398_s7 = int_to_ptr.vmem [resolvable:$true] %s338_s7 }
  0xf4   :  { %s8034_s8 = scalar_lea.hbm %s9149_s14, 16 }
  0xf5   :  { %p8035_p6 = scmp.ne.s32.totalorder %s9149_s14, %s8034_s8  ;;  %p8038_p7 = scmp.lt.u32.totalorder %s8034_s8, %s9149_s14 }
  0xf7   :  { %p8040_p8 = pnand %p8038_p7, %p8035_p6 }
  0xf9   :  { %8043 = shalt.err (!%p8040_p8)
}
  0xfa   :  { %s8044_s2 = scalar_lea.vmem %s318_s6, 16  ;;  %s8048_s10 = scalar_lea.vmem %s318_s6, 32 }
  0xfb   :  { %p8045_p9 = scmp.ne.s32.totalorder %s318_s6, %s8044_s2  ;;  %p8049_p10 = scmp.lt.s32.totalorder %s318_s6, %s318_s6 }
  0xfc   :  { %p8050_p11 = scmp.lt.s32.totalorder %s8048_s10, %s8044_s2 }
  0xfe   :  { %p8051_p12 = por %p8050_p11, %p8049_p10 }
 0x100   :  { %p8052_p13 = pnand %p8051_p12, %p8045_p9 }
 0x102   :  { %8055 = shalt.err (!%p8052_p13)
}
 0x103   :  { %320 = dma.hbm_to_vmem [thread:$0]  %s9149_s14, 16, %s318_s6, [#allocation23]  }
 0x104   :  { %s8056_s3 = scalar_lea.hbm %s9159_s13, 512 }
 0x105   :  { %p8057_p0 = scmp.ne.s32.totalorder %s9159_s13, %s8056_s3  ;;  %p8060_p1 = scmp.lt.u32.totalorder %s8056_s3, %s9159_s13 }
 0x107   :  { %p8062_p2 = pnand %p8060_p1, %p8057_p0 }
 0x109   :  { %8065 = shalt.err (!%p8062_p2)
}
 0x10a   :  { %s8066_s11 = scalar_lea.vmem %s9398_s7, 512  ;;  %p8071_p4 = scmp.lt.s32.totalorder %s9398_s7, %s9398_s7 }
 0x10b   :  { %p8067_p3 = scmp.ne.s32.totalorder %s9398_s7, %s8066_s11  ;;  %p8072_p5 = scmp.lt.s32.totalorder %s8066_s11, %s8066_s11 }
 0x10d   :  { %p8073_p6 = por %p8072_p5, %p8071_p4 }
 0x10f   :  { %p8074_p7 = pnand %p8073_p6, %p8067_p3 }
 0x111   :  { %8077 = shalt.err (!%p8074_p7)
}
 0x112   :  { %344 = dma.hbm_to_vmem [thread:$0]  %s9159_s13, 512, %s9398_s7, [#allocation26], %s8982_s18, %s8982_s18, %s8983_s25  }
 0x113   :  { %s8990_s14 = smov [#allocation28]   ;;  %s8991_s15 = smov [#allocation31]  }
 0x114   :  { %s364_s30 = sshll.u32 %s8990_s14, 4  ;;  %s387_s16 = sshll.u32 %s8991_s15, 4  ;;  %s365_s30 = int_to_ptr.vmem [resolvable:$true] %s364_s30  ;;  %s388_s16 = int_to_ptr.vmem [resolvable:$true] %s387_s16 }
 0x115   :  { %s8078_s22 = scalar_lea.hbm %s9174_s17, 512 }
 0x116   :  { %p8079_p8 = scmp.ne.s32.totalorder %s9174_s17, %s8078_s22  ;;  %p8082_p9 = scmp.lt.u32.totalorder %s8078_s22, %s9174_s17 }
 0x118   :  { %p8084_p10 = pnand %p8082_p9, %p8079_p8 }
 0x11a   :  { %8087 = shalt.err (!%p8084_p10)
}
 0x11b   :  { %s8088_s23 = scalar_lea.vmem %s365_s30, 512  ;;  %p8093_p12 = scmp.lt.s32.totalorder %s365_s30, %s365_s30 }
 0x11c   :  { %p8089_p11 = scmp.ne.s32.totalorder %s365_s30, %s8088_s23  ;;  %p8094_p13 = scmp.lt.s32.totalorder %s8088_s23, %s8088_s23 }
 0x11e   :  { %p8095_p0 = por %p8094_p13, %p8093_p12 }
 0x120   :  { %p8096_p1 = pnand %p8095_p0, %p8089_p11 }
 0x122   :  { %8099 = shalt.err (!%p8096_p1)
}
 0x123   :  { %370 = dma.hbm_to_vmem [thread:$0]  %s9174_s17, 512, %s365_s30, [#allocation29], %s8982_s18, %s8982_s18, %s8983_s25  }
 0x124   :  { %s8100_s13 = scalar_lea.hbm %s9184_s5, 64 }
 0x125   :  { %p8101_p2 = scmp.ne.s32.totalorder %s9184_s5, %s8100_s13  ;;  %p8104_p3 = scmp.lt.u32.totalorder %s8100_s13, %s9184_s5 }
 0x127   :  { %p8106_p4 = pnand %p8104_p3, %p8101_p2 }
 0x129   :  { %8109 = shalt.err (!%p8106_p4)
}
 0x12a   :  { %s8110_s20 = scalar_lea.vmem %s388_s16, 64  ;;  %p8115_p6 = scmp.lt.s32.totalorder %s388_s16, %s388_s16 }
 0x12b   :  { %p8111_p5 = scmp.ne.s32.totalorder %s388_s16, %s8110_s20  ;;  %p8116_p7 = scmp.lt.s32.totalorder %s8110_s20, %s8110_s20 }
 0x12d   :  { %p8117_p8 = por %p8116_p7, %p8115_p6 }
 0x12f   :  { %p8118_p9 = pnand %p8117_p8, %p8111_p5 }
 0x131   :  { %8121 = shalt.err (!%p8118_p9)
}
 0x132   :  { %390 = dma.hbm_to_vmem [thread:$0]  %s9184_s5, 64, %s388_s16, [#allocation32]  }
 0x133   :  { %s8992_s26 = smov [#allocation34]   ;;  %s8993_s17 = smov [#allocation37]  }
 0x134   :  { %s407_s0 = sshll.u32 %s8992_s26, 4  ;;  %s427_s28 = sshll.u32 %s8993_s17, 4  ;;  %s408_s0 = int_to_ptr.vmem [resolvable:$true] %s407_s0  ;;  %s428_s28 = int_to_ptr.vmem [resolvable:$true] %s427_s28 }
 0x135   :  { %s8122_s6 = scalar_lea.hbm %s9194_s19, 16 }
 0x136   :  { %p8123_p10 = scmp.ne.s32.totalorder %s9194_s19, %s8122_s6  ;;  %p8126_p11 = scmp.lt.u32.totalorder %s8122_s6, %s9194_s19 }
 0x138   :  { %p8128_p12 = pnand %p8126_p11, %p8123_p10 }
 0x13a   :  { %8131 = shalt.err (!%p8128_p12)
}
 0x13b   :  { %s8132_s1 = scalar_lea.vmem %s408_s0, 16  ;;  %s8136_s7 = scalar_lea.vmem %s408_s0, 32 }
 0x13c   :  { %p8133_p13 = scmp.ne.s32.totalorder %s408_s0, %s8132_s1  ;;  %p8137_p0 = scmp.lt.s32.totalorder %s408_s0, %s408_s0 }
 0x13d   :  { %p8138_p1 = scmp.lt.s32.totalorder %s8136_s7, %s8132_s1 }
 0x13f   :  { %p8139_p2 = por %p8138_p1, %p8137_p0 }
 0x141   :  { %p8140_p3 = pnand %p8139_p2, %p8133_p13 }
 0x143   :  { %8143 = shalt.err (!%p8140_p3)
}
 0x144   :  { %410 = dma.hbm_to_vmem [thread:$0]  %s9194_s19, 16, %s408_s0, [#allocation35]  }
 0x145   :  { %s8144_s5 = scalar_lea.hbm %s9204_s27, 64 }
 0x146   :  { %p8145_p4 = scmp.ne.s32.totalorder %s9204_s27, %s8144_s5  ;;  %p8148_p5 = scmp.lt.u32.totalorder %s8144_s5, %s9204_s27 }
 0x148   :  { %p8150_p6 = pnand %p8148_p5, %p8145_p4 }
 0x14a   :  { %8153 = shalt.err (!%p8150_p6)
}
 0x14b   :  { %s8154_s8 = scalar_lea.vmem %s428_s28, 64  ;;  %p8159_p8 = scmp.lt.s32.totalorder %s428_s28, %s428_s28 }
 0x14c   :  { %p8155_p7 = scmp.ne.s32.totalorder %s428_s28, %s8154_s8  ;;  %p8160_p9 = scmp.lt.s32.totalorder %s8154_s8, %s8154_s8 }
 0x14e   :  { %p8161_p10 = por %p8160_p9, %p8159_p8 }
 0x150   :  { %p8162_p11 = pnand %p8161_p10, %p8155_p7 }
 0x152   :  { %8165 = shalt.err (!%p8162_p11)
}
 0x153   :  { %430 = dma.hbm_to_vmem [thread:$0]  %s9204_s27, 64, %s428_s28, [#allocation38]  }
 0x154   :  { %s8994_s2 = smov [#allocation40]   ;;  %s8995_s19 = smov [#allocation43]  }
 0x155   :  { %s449_s10 = sshll.u32 %s8994_s2, 4  ;;  %s470_s3 = sshll.u32 %s8995_s19, 4  ;;  %s450_s10 = int_to_ptr.vmem [resolvable:$true] %s449_s10  ;;  %s9435_s3 = int_to_ptr.vmem [resolvable:$true] %s470_s3 }
 0x156   :  { %s8166_s11 = scalar_lea.hbm %s9219_s4, 16 }
 0x157   :  { %p8167_p12 = scmp.ne.s32.totalorder %s9219_s4, %s8166_s11  ;;  %p8170_p13 = scmp.lt.u32.totalorder %s8166_s11, %s9219_s4 }
 0x159   :  { %p8172_p0 = pnand %p8170_p13, %p8167_p12 }
 0x15b   :  { %8175 = shalt.err (!%p8172_p0)
}
 0x15c   :  { %s8176_s14 = scalar_lea.vmem %s450_s10, 16  ;;  %s8180_s30 = scalar_lea.vmem %s450_s10, 32 }
 0x15d   :  { %p8177_p1 = scmp.ne.s32.totalorder %s450_s10, %s8176_s14  ;;  %p8181_p2 = scmp.lt.s32.totalorder %s450_s10, %s450_s10 }
 0x15e   :  { %p8182_p3 = scmp.lt.s32.totalorder %s8180_s30, %s8176_s14 }
 0x160   :  { %p8183_p4 = por %p8182_p3, %p8181_p2 }
 0x162   :  { %p8184_p5 = pnand %p8183_p4, %p8177_p1 }
 0x164   :  { %8187 = shalt.err (!%p8184_p5)
}
 0x165   :  { %452 = dma.hbm_to_vmem [thread:$0]  %s9219_s4, 16, %s450_s10, [#allocation41]  }
 0x166   :  { %s8188_s27 = scalar_lea.hbm %s9234_s12, 512 }
 0x167   :  { %p8189_p6 = scmp.ne.s32.totalorder %s9234_s12, %s8188_s27  ;;  %p8192_p7 = scmp.lt.u32.totalorder %s8188_s27, %s9234_s12 }
 0x169   :  { %p8194_p8 = pnand %p8192_p7, %p8189_p6 }
 0x16b   :  { %8197 = shalt.err (!%p8194_p8)
}
 0x16c   :  { %s8198_s15 = scalar_lea.vmem %s9435_s3, 512  ;;  %p8203_p10 = scmp.lt.s32.totalorder %s9435_s3, %s9435_s3 }
 0x16d   :  { %p8199_p9 = scmp.ne.s32.totalorder %s9435_s3, %s8198_s15  ;;  %p8204_p11 = scmp.lt.s32.totalorder %s8198_s15, %s8198_s15 }
 0x16f   :  { %p8205_p12 = por %p8204_p11, %p8203_p10 }
 0x171   :  { %p8206_p13 = pnand %p8205_p12, %p8199_p9 }
 0x173   :  { %8209 = shalt.err (!%p8206_p13)
}
 0x174   :  { %s10490_s4 = sld [smem:[#allocation119_spill]]  ;;  %s8996_s16 = smov [#allocation46]  }
 0x175   :  { %476 = dma.hbm_to_vmem [thread:$0]  %s9234_s12, 512, %s9435_s3, [#allocation44], %s8982_s18, %s8982_s18, %s8983_s25  }
 0x176   :  { %s495_s22 = sshll.u32 %s8996_s16, 4  ;;  %s8997_s23 = smov [#allocation49]   ;;  %s496_s22 = int_to_ptr.vmem [resolvable:$true] %s495_s22 }
 0x177   :  { %s515_s13 = sshll.u32 %s8997_s23, 4  ;;  %s516_s13 = int_to_ptr.vmem [resolvable:$true] %s515_s13 }
 0x17a   :  { %s8210_s20 = scalar_lea.hbm %s10490_s4, 16 }
 0x17b   :  { %p8211_p0 = scmp.ne.s32.totalorder %s10490_s4, %s8210_s20  ;;  %p8214_p1 = scmp.lt.u32.totalorder %s8210_s20, %s10490_s4 }
 0x17d   :  { %p8216_p2 = pnand %p8214_p1, %p8211_p0 }
 0x17f   :  { %8219 = shalt.err (!%p8216_p2)
}
 0x180   :  { %s8220_s26 = scalar_lea.vmem %s496_s22, 16  ;;  %s8224_s0 = scalar_lea.vmem %s496_s22, 32 }
 0x181   :  { %p8221_p3 = scmp.ne.s32.totalorder %s496_s22, %s8220_s26  ;;  %p8225_p4 = scmp.lt.s32.totalorder %s496_s22, %s496_s22 }
 0x182   :  { %p8226_p5 = scmp.lt.s32.totalorder %s8224_s0, %s8220_s26 }
 0x184   :  { %p8227_p6 = por %p8226_p5, %p8225_p4 }
 0x186   :  { %p8228_p7 = pnand %p8227_p6, %p8221_p3 }
 0x188   :  { %8231 = shalt.err (!%p8228_p7)
}
 0x189   :  { %s10491_s12 = sld [smem:[#allocation121_spill]] }
 0x18a   :  { %498 = dma.hbm_to_vmem [thread:$0]  %s10490_s4, 16, %s496_s22, [#allocation47]  }
 0x18f   :  { %s8232_s17 = scalar_lea.hbm %s10491_s12, 16 }
 0x190   :  { %p8233_p8 = scmp.ne.s32.totalorder %s10491_s12, %s8232_s17  ;;  %p8236_p9 = scmp.lt.u32.totalorder %s8232_s17, %s10491_s12 }
 0x192   :  { %p8238_p10 = pnand %p8236_p9, %p8233_p8 }
 0x194   :  { %8241 = shalt.err (!%p8238_p10)
}
 0x195   :  { %s8242_s28 = scalar_lea.vmem %s516_s13, 16  ;;  %s8246_s6 = scalar_lea.vmem %s516_s13, 32 }
 0x196   :  { %p8243_p11 = scmp.ne.s32.totalorder %s516_s13, %s8242_s28  ;;  %p8247_p12 = scmp.lt.s32.totalorder %s516_s13, %s516_s13 }
 0x197   :  { %p8248_p13 = scmp.lt.s32.totalorder %s8246_s6, %s8242_s28 }
 0x199   :  { %p8249_p0 = por %p8248_p13, %p8247_p12 }
 0x19b   :  { %p8250_p1 = pnand %p8249_p0, %p8243_p11 }
 0x19d   :  { %8253 = shalt.err (!%p8250_p1)
}
 0x19e   :  { %s10492_s1 = sld [smem:[#allocation123_spill]]  ;;  %s8998_s7 = smov [#allocation52]  }
 0x19f   :  { %518 = dma.hbm_to_vmem [thread:$0]  %s10491_s12, 16, %s516_s13, [#allocation50]  }
 0x1a0   :  { %s535_s5 = sshll.u32 %s8998_s7, 4  ;;  %s8999_s8 = smov [#allocation55]   ;;  %s536_s5 = int_to_ptr.vmem [resolvable:$true] %s535_s5 }
 0x1a1   :  { %s555_s2 = sshll.u32 %s8999_s8, 4  ;;  %s556_s2 = int_to_ptr.vmem [resolvable:$true] %s555_s2 }
 0x1a4   :  { %s8254_s10 = scalar_lea.hbm %s10492_s1, 16 }
 0x1a5   :  { %p8255_p2 = scmp.ne.s32.totalorder %s10492_s1, %s8254_s10  ;;  %p8258_p3 = scmp.lt.u32.totalorder %s8254_s10, %s10492_s1 }
 0x1a7   :  { %p8260_p4 = pnand %p8258_p3, %p8255_p2 }
 0x1a9   :  { %8263 = shalt.err (!%p8260_p4)
}
 0x1aa   :  { %s8264_s19 = scalar_lea.vmem %s536_s5, 16  ;;  %s8268_s3 = scalar_lea.vmem %s536_s5, 32 }
 0x1ab   :  { %p8265_p5 = scmp.ne.s32.totalorder %s536_s5, %s8264_s19  ;;  %p8269_p6 = scmp.lt.s32.totalorder %s536_s5, %s536_s5 }
 0x1ac   :  { %p8270_p7 = scmp.lt.s32.totalorder %s8268_s3, %s8264_s19 }
 0x1ae   :  { %p8271_p8 = por %p8270_p7, %p8269_p6 }
 0x1b0   :  { %p8272_p9 = pnand %p8271_p8, %p8265_p5 }
 0x1b2   :  { %8275 = shalt.err (!%p8272_p9)
}
 0x1b3   :  { %s10493_s11 = sld [smem:[#allocation125_spill]] }
 0x1b4   :  { %538 = dma.hbm_to_vmem [thread:$0]  %s10492_s1, 16, %s536_s5, [#allocation53]  }
 0x1b9   :  { %s8276_s14 = scalar_lea.hbm %s10493_s11, 32 }
 0x1ba   :  { %p8277_p10 = scmp.ne.s32.totalorder %s10493_s11, %s8276_s14  ;;  %p8280_p11 = scmp.lt.u32.totalorder %s8276_s14, %s10493_s11 }
 0x1bc   :  { %p8282_p12 = pnand %p8280_p11, %p8277_p10 }
 0x1be   :  { %8285 = shalt.err (!%p8282_p12)
}
 0x1bf   :  { %s8286_s30 = scalar_lea.vmem %s556_s2, 32  ;;  %p8291_p0 = scmp.lt.s32.totalorder %s556_s2, %s556_s2 }
 0x1c0   :  { %p8287_p13 = scmp.ne.s32.totalorder %s556_s2, %s8286_s30  ;;  %p8292_p1 = scmp.lt.s32.totalorder %s8286_s30, %s8286_s30 }
 0x1c2   :  { %p8293_p2 = por %p8292_p1, %p8291_p0 }
 0x1c4   :  { %p8294_p3 = pnand %p8293_p2, %p8287_p13 }
 0x1c6   :  { %8297 = shalt.err (!%p8294_p3)
}
 0x1c7   :  { %s10494_s27 = sld [smem:[#allocation127_spill]]  ;;  %s9000_s15 = smov [#allocation58]  }
 0x1c8   :  { %558 = dma.hbm_to_vmem [thread:$0]  %s10493_s11, 32, %s556_s2, [#allocation56]  }
 0x1c9   :  { %s575_s4 = sshll.u32 %s9000_s15, 4  ;;  %s9001_s16 = smov [#allocation61]   ;;  %s576_s4 = int_to_ptr.vmem [resolvable:$true] %s575_s4 }
 0x1ca   :  { %s598_s22 = sshll.u32 %s9001_s16, 4  ;;  %s9469_s22 = int_to_ptr.vmem [resolvable:$true] %s598_s22 }
 0x1cd   :  { %s8298_s23 = scalar_lea.hbm %s10494_s27, 16 }
 0x1ce   :  { %p8299_p4 = scmp.ne.s32.totalorder %s10494_s27, %s8298_s23  ;;  %p8302_p5 = scmp.lt.u32.totalorder %s8298_s23, %s10494_s27 }
 0x1d0   :  { %p8304_p6 = pnand %p8302_p5, %p8299_p4 }
 0x1d2   :  { %8307 = shalt.err (!%p8304_p6)
}
 0x1d3   :  { %s8308_s13 = scalar_lea.vmem %s576_s4, 16  ;;  %s8312_s20 = scalar_lea.vmem %s576_s4, 32 }
 0x1d4   :  { %p8309_p7 = scmp.ne.s32.totalorder %s576_s4, %s8308_s13  ;;  %p8313_p8 = scmp.lt.s32.totalorder %s576_s4, %s576_s4 }
 0x1d5   :  { %p8314_p9 = scmp.lt.s32.totalorder %s8312_s20, %s8308_s13 }
 0x1d7   :  { %p8315_p10 = por %p8314_p9, %p8313_p8 }
 0x1d9   :  { %p8316_p11 = pnand %p8315_p10, %p8309_p7 }
 0x1db   :  { %8319 = shalt.err (!%p8316_p11)
}
 0x1dc   :  { %s10495_s26 = sld [smem:[#allocation131_spill]] }
 0x1dd   :  { %578 = dma.hbm_to_vmem [thread:$0]  %s10494_s27, 16, %s576_s4, [#allocation59]  }
 0x1e2   :  { %s8320_s0 = scalar_lea.hbm %s10495_s26, 512 }
 0x1e3   :  { %p8321_p12 = scmp.ne.s32.totalorder %s10495_s26, %s8320_s0  ;;  %p8324_p13 = scmp.lt.u32.totalorder %s8320_s0, %s10495_s26 }
 0x1e5   :  { %p8326_p0 = pnand %p8324_p13, %p8321_p12 }
 0x1e7   :  { %8329 = shalt.err (!%p8326_p0)
}
 0x1e8   :  { %s8330_s12 = scalar_lea.vmem %s9469_s22, 512  ;;  %p8335_p2 = scmp.lt.s32.totalorder %s9469_s22, %s9469_s22 }
 0x1e9   :  { %p8331_p1 = scmp.ne.s32.totalorder %s9469_s22, %s8330_s12  ;;  %p8336_p3 = scmp.lt.s32.totalorder %s8330_s12, %s8330_s12 }
 0x1eb   :  { %p8337_p4 = por %p8336_p3, %p8335_p2 }
 0x1ed   :  { %p8338_p5 = pnand %p8337_p4, %p8331_p1 }
 0x1ef   :  { %8341 = shalt.err (!%p8338_p5)
}
 0x1f0   :  { %s10496_s17 = sld [smem:[#allocation133_spill]]  ;;  %s9002_s28 = smov [#allocation64]  }
 0x1f1   :  { %604 = dma.hbm_to_vmem [thread:$0]  %s10495_s26, 512, %s9469_s22, [#allocation62], %s8982_s18, %s8982_s18, %s8983_s25  }
 0x1f2   :  { %s621_s6 = sshll.u32 %s9002_s28, 4  ;;  %s9003_s1 = smov [#allocation2]   ;;  %s622_s6 = int_to_ptr.vmem [resolvable:$true] %s621_s6 }
 0x1f3   :  { %s171_s7 = sshll.u32 %s9003_s1, 4  ;;  %s172_s7 = int_to_ptr.vmem [resolvable:$true] %s171_s7 }
 0x1f6   :  { %s8342_s5 = scalar_lea.hbm %s10496_s17, 16 }
 0x1f7   :  { %p8343_p6 = scmp.ne.s32.totalorder %s10496_s17, %s8342_s5  ;;  %p8346_p7 = scmp.lt.u32.totalorder %s8342_s5, %s10496_s17 }
 0x1f9   :  { %p8348_p8 = pnand %p8346_p7, %p8343_p6 }
 0x1fb   :  { %8351 = shalt.err (!%p8348_p8)
}
 0x1fc   :  { %s8352_s8 = scalar_lea.vmem %s622_s6, 16  ;;  %s8356_s2 = scalar_lea.vmem %s622_s6, 32 }
 0x1fd   :  { %p8353_p9 = scmp.ne.s32.totalorder %s622_s6, %s8352_s8  ;;  %p8357_p10 = scmp.lt.s32.totalorder %s622_s6, %s622_s6 }
 0x1fe   :  { %p8358_p11 = scmp.lt.s32.totalorder %s8356_s2, %s8352_s8 }
 0x200   :  { %p8359_p12 = por %p8358_p11, %p8357_p10 }
 0x202   :  { %p8360_p13 = pnand %p8359_p12, %p8353_p9 }
 0x204   :  { %8363 = shalt.err (!%p8360_p13)
}
 0x205   :  { %s10497_s10 = sld [smem:[#allocation96_spill]] }
 0x206   :  { %624 = dma.hbm_to_vmem [thread:$0]  %s10496_s17, 16, %s622_s6, [#allocation65]  }
 0x20b   :  { %s8364_s19 = scalar_lea.hbm %s10497_s10, 16 }
 0x20c   :  { %p8365_p0 = scmp.ne.s32.totalorder %s10497_s10, %s8364_s19  ;;  %p8368_p1 = scmp.lt.u32.totalorder %s8364_s19, %s10497_s10 }
 0x20e   :  { %p8370_p2 = pnand %p8368_p1, %p8365_p0 }
 0x210   :  { %8373 = shalt.err (!%p8370_p2)
}
 0x211   :  { %s8374_s3 = scalar_lea.vmem %s172_s7, 16  ;;  %s8378_s11 = scalar_lea.vmem %s172_s7, 32 }
 0x212   :  { %p8375_p3 = scmp.ne.s32.totalorder %s172_s7, %s8374_s3  ;;  %p8379_p4 = scmp.lt.s32.totalorder %s172_s7, %s172_s7 }
 0x213   :  { %p8380_p5 = scmp.lt.s32.totalorder %s8378_s11, %s8374_s3 }
 0x215   :  { %p8381_p6 = por %p8380_p5, %p8379_p4 }
 0x217   :  { %p8382_p7 = pnand %p8381_p6, %p8375_p3 }
 0x219   :  { %8385 = shalt.err (!%p8382_p7)
}
 0x21a   :  { %s10498_s14 = sld [smem:[#allocation97_spill]]  ;;  %s9004_s30 = smov [#allocation6]  }
 0x21b   :  { %174 = dma.hbm_to_vmem [thread:$0]  %s10497_s10, 16, %s172_s7, [#allocation3]  }
 0x21c   :  { %s191_s27 = sshll.u32 %s9004_s30, 4  ;;  %s9005_s15 = smov [#allocation9]   ;;  %s192_s27 = int_to_ptr.vmem [resolvable:$true] %s191_s27 }
 0x21d   :  { %s219_s4 = sshll.u32 %s9005_s15, 4  ;;  %s220_s4 = int_to_ptr.vmem [resolvable:$true] %s219_s4 }
 0x220   :  { %s8386_s16 = scalar_lea.hbm %s10498_s14, 16 }
 0x221   :  { %p8387_p8 = scmp.ne.s32.totalorder %s10498_s14, %s8386_s16  ;;  %p8390_p9 = scmp.lt.u32.totalorder %s8386_s16, %s10498_s14 }
 0x223   :  { %p8392_p10 = pnand %p8390_p9, %p8387_p8 }
 0x225   :  { %8395 = shalt.err (!%p8392_p10)
}
 0x226   :  { %s8396_s22 = scalar_lea.vmem %s192_s27, 16  ;;  %s8400_s23 = scalar_lea.vmem %s192_s27, 32 }
 0x227   :  { %p8397_p11 = scmp.ne.s32.totalorder %s192_s27, %s8396_s22  ;;  %p8401_p12 = scmp.lt.s32.totalorder %s192_s27, %s192_s27 }
 0x228   :  { %p8402_p13 = scmp.lt.s32.totalorder %s8400_s23, %s8396_s22 }
 0x22a   :  { %p8403_p0 = por %p8402_p13, %p8401_p12 }
 0x22c   :  { %p8404_p1 = pnand %p8403_p0, %p8397_p11 }
 0x22e   :  { %8407 = shalt.err (!%p8404_p1)
}
 0x22f   :  { %s10499_s13 = sld [smem:[#allocation101_spill]] }
 0x230   :  { %194 = dma.hbm_to_vmem [thread:$0]  %s10498_s14, 16, %s192_s27, [#allocation5]  }
 0x235   :  { %s8408_s20 = scalar_lea.hbm %s10499_s13, 64 }
 0x236   :  { %p8409_p2 = scmp.ne.s32.totalorder %s10499_s13, %s8408_s20  ;;  %p8412_p3 = scmp.lt.u32.totalorder %s8408_s20, %s10499_s13 }
 0x238   :  { %p8414_p4 = pnand %p8412_p3, %p8409_p2 }
 0x23a   :  { %8417 = shalt.err (!%p8414_p4)
}
 0x23b   :  { %s8418_s26 = scalar_lea.vmem %s220_s4, 64  ;;  %p8423_p6 = scmp.lt.s32.totalorder %s220_s4, %s220_s4 }
 0x23c   :  { %p8419_p5 = scmp.ne.s32.totalorder %s220_s4, %s8418_s26  ;;  %p8424_p7 = scmp.lt.s32.totalorder %s8418_s26, %s8418_s26 }
 0x23e   :  { %p8425_p8 = por %p8424_p7, %p8423_p6 }
 0x240   :  { %p8426_p9 = pnand %p8425_p8, %p8419_p5 }
 0x242   :  { %8429 = shalt.err (!%p8426_p9)
}
 0x243   :  { %s10500_s0 = sld [smem:[#allocation103_spill]]  ;;  %s9006_s12 = smov [#allocation12]  }
 0x244   :  { %222 = dma.hbm_to_vmem [thread:$0]  %s10499_s13, 64, %s220_s4, [#allocation8]  }
 0x245   :  { %s241_s17 = sshll.u32 %s9006_s12, 4  ;;  %s9007_s28 = smov [#allocation15]   ;;  %s242_s17 = int_to_ptr.vmem [resolvable:$true] %s241_s17 }
 0x246   :  { %s261_s6 = sshll.u32 %s9007_s28, 4  ;;  %s262_s6 = int_to_ptr.vmem [resolvable:$true] %s261_s6 }
 0x249   :  { %s8430_s1 = scalar_lea.hbm %s10500_s0, 16 }
 0x24a   :  { %p8431_p10 = scmp.ne.s32.totalorder %s10500_s0, %s8430_s1  ;;  %p8434_p11 = scmp.lt.u32.totalorder %s8430_s1, %s10500_s0 }
 0x24c   :  { %p8436_p12 = pnand %p8434_p11, %p8431_p10 }
 0x24e   :  { %8439 = shalt.err (!%p8436_p12)
}
 0x24f   :  { %s8440_s7 = scalar_lea.vmem %s242_s17, 16  ;;  %s8444_s5 = scalar_lea.vmem %s242_s17, 32 }
 0x250   :  { %p8441_p13 = scmp.ne.s32.totalorder %s242_s17, %s8440_s7  ;;  %p8445_p0 = scmp.lt.s32.totalorder %s242_s17, %s242_s17 }
 0x251   :  { %p8446_p1 = scmp.lt.s32.totalorder %s8444_s5, %s8440_s7 }
 0x253   :  { %p8447_p2 = por %p8446_p1, %p8445_p0 }
 0x255   :  { %p8448_p3 = pnand %p8447_p2, %p8441_p13 }
 0x257   :  { %8451 = shalt.err (!%p8448_p3)
}
 0x258   :  { %s10501_s8 = sld [smem:[#allocation104_spill]] }
 0x259   :  { %244 = dma.hbm_to_vmem [thread:$0]  %s10500_s0, 16, %s242_s17, [#allocation11]  }
 0x25e   :  { %s8452_s2 = scalar_lea.hbm %s10501_s8, 16 }
 0x25f   :  { %p8453_p4 = scmp.ne.s32.totalorder %s10501_s8, %s8452_s2  ;;  %p8456_p5 = scmp.lt.u32.totalorder %s8452_s2, %s10501_s8 }
 0x261   :  { %p8458_p6 = pnand %p8456_p5, %p8453_p4 }
 0x263   :  { %8461 = shalt.err (!%p8458_p6)
}
 0x264   :  { %s8462_s10 = scalar_lea.vmem %s262_s6, 16  ;;  %s8466_s19 = scalar_lea.vmem %s262_s6, 32 }
 0x265   :  { %p8463_p7 = scmp.ne.s32.totalorder %s262_s6, %s8462_s10  ;;  %p8467_p8 = scmp.lt.s32.totalorder %s262_s6, %s262_s6 }
 0x266   :  { %p8468_p9 = scmp.lt.s32.totalorder %s8466_s19, %s8462_s10 }
 0x268   :  { %p8469_p10 = por %p8468_p9, %p8467_p8 }
 0x26a   :  { %p8470_p11 = pnand %p8469_p10, %p8463_p7 }
 0x26c   :  { %8473 = shalt.err (!%p8470_p11)
}
 0x26d   :  { %s10502_s3 = sld [smem:[#allocation106_spill]]  ;;  %s9008_s11 = smov [#allocation18]  }
 0x26e   :  { %264 = dma.hbm_to_vmem [thread:$0]  %s10501_s8, 16, %s262_s6, [#allocation14]  }
 0x26f   :  { %s284_s14 = sshll.u32 %s9008_s11, 4  ;;  %s9009_s30 = smov [#allocation21]   ;;  %s285_s14 = int_to_ptr.vmem [resolvable:$true] %s284_s14 }
 0x270   :  { %s307_s27 = sshll.u32 %s9009_s30, 4  ;;  %s308_s27 = int_to_ptr.vmem [resolvable:$true] %s307_s27 }
 0x273   :  { %s8474_s15 = scalar_lea.hbm %s10502_s3, 512 }
 0x274   :  { %p8475_p12 = scmp.ne.s32.totalorder %s10502_s3, %s8474_s15  ;;  %p8478_p13 = scmp.lt.u32.totalorder %s8474_s15, %s10502_s3 }
 0x276   :  { %p8480_p0 = pnand %p8478_p13, %p8475_p12 }
 0x278   :  { %8483 = shalt.err (!%p8480_p0)
}
 0x279   :  { %s8484_s4 = scalar_lea.vmem %s285_s14, 512  ;;  %p8489_p2 = scmp.lt.s32.totalorder %s285_s14, %s285_s14 }
 0x27a   :  { %p8485_p1 = scmp.ne.s32.totalorder %s285_s14, %s8484_s4  ;;  %p8490_p3 = scmp.lt.s32.totalorder %s8484_s4, %s8484_s4 }
 0x27c   :  { %p8491_p4 = por %p8490_p3, %p8489_p2 }
 0x27e   :  { %p8492_p5 = pnand %p8491_p4, %p8485_p1 }
 0x280   :  { %8495 = shalt.err (!%p8492_p5)
}
 0x281   :  { %s10503_s16 = sld [smem:[#allocation107_spill]] }
 0x282   :  { %290 = dma.hbm_to_vmem [thread:$0]  %s10502_s3, 512, %s285_s14, [#allocation17], %s8982_s18, %s8982_s18, %s8983_s25  }
 0x287   :  { %s8496_s22 = scalar_lea.hbm %s10503_s16, 16 }
 0x288   :  { %p8497_p6 = scmp.ne.s32.totalorder %s10503_s16, %s8496_s22  ;;  %p8500_p7 = scmp.lt.u32.totalorder %s8496_s22, %s10503_s16 }
 0x28a   :  { %p8502_p8 = pnand %p8500_p7, %p8497_p6 }
 0x28c   :  { %8505 = shalt.err (!%p8502_p8)
}
 0x28d   :  { %s8506_s23 = scalar_lea.vmem %s308_s27, 16  ;;  %s8510_s13 = scalar_lea.vmem %s308_s27, 32 }
 0x28e   :  { %p8507_p9 = scmp.ne.s32.totalorder %s308_s27, %s8506_s23  ;;  %p8511_p10 = scmp.lt.s32.totalorder %s308_s27, %s308_s27 }
 0x28f   :  { %p8512_p11 = scmp.lt.s32.totalorder %s8510_s13, %s8506_s23 }
 0x291   :  { %p8513_p12 = por %p8512_p11, %p8511_p10 }
 0x293   :  { %p8514_p13 = pnand %p8513_p12, %p8507_p9 }
 0x295   :  { %8517 = shalt.err (!%p8514_p13)
}
 0x296   :  { %s10504_s20 = sld [smem:[#allocation108_spill]]  ;;  %s9010_s26 = smov [#allocation24]  }
 0x297   :  { %310 = dma.hbm_to_vmem [thread:$0]  %s10503_s16, 16, %s308_s27, [#allocation20]  }
 0x298   :  { %s326_s0 = sshll.u32 %s9010_s26, 4  ;;  %s9011_s12 = smov [#allocation27]   ;;  %s327_s0 = int_to_ptr.vmem [resolvable:$true] %s326_s0 }
 0x299   :  { %s350_s17 = sshll.u32 %s9011_s12, 4  ;;  %s9522_s17 = int_to_ptr.vmem [resolvable:$true] %s350_s17 }
 0x29c   :  { %s8518_s28 = scalar_lea.hbm %s10504_s20, 512 }
 0x29d   :  { %p8519_p0 = scmp.ne.s32.totalorder %s10504_s20, %s8518_s28  ;;  %p8522_p1 = scmp.lt.u32.totalorder %s8518_s28, %s10504_s20 }
 0x29f   :  { %p8524_p2 = pnand %p8522_p1, %p8519_p0 }
 0x2a1   :  { %8527 = shalt.err (!%p8524_p2)
}
 0x2a2   :  { %s8528_s6 = scalar_lea.vmem %s327_s0, 512  ;;  %p8533_p4 = scmp.lt.s32.totalorder %s327_s0, %s327_s0 }
 0x2a3   :  { %p8529_p3 = scmp.ne.s32.totalorder %s327_s0, %s8528_s6  ;;  %p8534_p5 = scmp.lt.s32.totalorder %s8528_s6, %s8528_s6 }
 0x2a5   :  { %p8535_p6 = por %p8534_p5, %p8533_p4 }
 0x2a7   :  { %p8536_p7 = pnand %p8535_p6, %p8529_p3 }
 0x2a9   :  { %8539 = shalt.err (!%p8536_p7)
}
 0x2aa   :  { %s10505_s1 = sld [smem:[#allocation109_spill]] }
 0x2ab   :  { %332 = dma.hbm_to_vmem [thread:$0]  %s10504_s20, 512, %s327_s0, [#allocation23], %s8982_s18, %s8982_s18, %s8983_s25  }
 0x2b0   :  { %s8540_s7 = scalar_lea.hbm %s10505_s1, 512 }
 0x2b1   :  { %p8541_p8 = scmp.ne.s32.totalorder %s10505_s1, %s8540_s7  ;;  %p8544_p9 = scmp.lt.u32.totalorder %s8540_s7, %s10505_s1 }
 0x2b3   :  { %p8546_p10 = pnand %p8544_p9, %p8541_p8 }
 0x2b5   :  { %8549 = shalt.err (!%p8546_p10)
}
 0x2b6   :  { %s8550_s5 = scalar_lea.vmem %s9522_s17, 512  ;;  %p8555_p12 = scmp.lt.s32.totalorder %s9522_s17, %s9522_s17 }
 0x2b7   :  { %p8551_p11 = scmp.ne.s32.totalorder %s9522_s17, %s8550_s5  ;;  %p8556_p13 = scmp.lt.s32.totalorder %s8550_s5, %s8550_s5 }
 0x2b9   :  { %p8557_p0 = por %p8556_p13, %p8555_p12 }
 0x2bb   :  { %p8558_p1 = pnand %p8557_p0, %p8551_p11 }
 0x2bd   :  { %8561 = shalt.err (!%p8558_p1)
}
 0x2be   :  { %s10506_s8 = sld [smem:[#allocation111_spill]]  ;;  %s9012_s2 = smov [#allocation30]  }
 0x2bf   :  { %356 = dma.hbm_to_vmem [thread:$0]  %s10505_s1, 512, %s9522_s17, [#allocation26], %s8982_s18, %s8982_s18, %s8983_s25  }
 0x2c0   :  { %s377_s10 = sshll.u32 %s9012_s2, 4  ;;  %s9013_s19 = smov [#allocation33]   ;;  %s378_s10 = int_to_ptr.vmem [resolvable:$true] %s377_s10 }
 0x2c1   :  { %s397_s3 = sshll.u32 %s9013_s19, 4  ;;  %s398_s3 = int_to_ptr.vmem [resolvable:$true] %s397_s3 }
 0x2c4   :  { %s8562_s11 = scalar_lea.hbm %s10506_s8, 16 }
 0x2c5   :  { %p8563_p2 = scmp.ne.s32.totalorder %s10506_s8, %s8562_s11  ;;  %p8566_p3 = scmp.lt.u32.totalorder %s8562_s11, %s10506_s8 }
 0x2c7   :  { %p8568_p4 = pnand %p8566_p3, %p8563_p2 }
 0x2c9   :  { %8571 = shalt.err (!%p8568_p4)
}
 0x2ca   :  { %s8572_s14 = scalar_lea.vmem %s378_s10, 16  ;;  %s8576_s30 = scalar_lea.vmem %s378_s10, 32 }
 0x2cb   :  { %p8573_p5 = scmp.ne.s32.totalorder %s378_s10, %s8572_s14  ;;  %p8577_p6 = scmp.lt.s32.totalorder %s378_s10, %s378_s10 }
 0x2cc   :  { %p8578_p7 = scmp.lt.s32.totalorder %s8576_s30, %s8572_s14 }
 0x2ce   :  { %p8579_p8 = por %p8578_p7, %p8577_p6 }
 0x2d0   :  { %p8580_p9 = pnand %p8579_p8, %p8573_p5 }
 0x2d2   :  { %8583 = shalt.err (!%p8580_p9)
}
 0x2d3   :  { %s10507_s27 = sld [smem:[#allocation112_spill]] }
 0x2d4   :  { %380 = dma.hbm_to_vmem [thread:$0]  %s10506_s8, 16, %s378_s10, [#allocation29]  }
 0x2d9   :  { %s8584_s15 = scalar_lea.hbm %s10507_s27, 16 }
 0x2da   :  { %p8585_p10 = scmp.ne.s32.totalorder %s10507_s27, %s8584_s15  ;;  %p8588_p11 = scmp.lt.u32.totalorder %s8584_s15, %s10507_s27 }
 0x2dc   :  { %p8590_p12 = pnand %p8588_p11, %p8585_p10 }
 0x2de   :  { %8593 = shalt.err (!%p8590_p12)
}
 0x2df   :  { %s8594_s4 = scalar_lea.vmem %s398_s3, 16  ;;  %s8598_s16 = scalar_lea.vmem %s398_s3, 32 }
 0x2e0   :  { %p8595_p13 = scmp.ne.s32.totalorder %s398_s3, %s8594_s4  ;;  %p8599_p0 = scmp.lt.s32.totalorder %s398_s3, %s398_s3 }
 0x2e1   :  { %p8600_p1 = scmp.lt.s32.totalorder %s8598_s16, %s8594_s4 }
 0x2e3   :  { %p8601_p2 = por %p8600_p1, %p8599_p0 }
 0x2e5   :  { %p8602_p3 = pnand %p8601_p2, %p8595_p13 }
 0x2e7   :  { %8605 = shalt.err (!%p8602_p3)
}
 0x2e8   :  { %s10508_s22 = sld [smem:[#allocation113_spill]]  ;;  %s9014_s23 = smov [#allocation36]  }
 0x2e9   :  { %400 = dma.hbm_to_vmem [thread:$0]  %s10507_s27, 16, %s398_s3, [#allocation32]  }
 0x2ea   :  { %s417_s13 = sshll.u32 %s9014_s23, 4  ;;  %s9015_s20 = smov [#allocation39]   ;;  %s418_s13 = int_to_ptr.vmem [resolvable:$true] %s417_s13 }
 0x2eb   :  { %s437_s26 = sshll.u32 %s9015_s20, 4  ;;  %s438_s26 = int_to_ptr.vmem [resolvable:$true] %s437_s26 }
 0x2ee   :  { %s8606_s0 = scalar_lea.hbm %s10508_s22, 16 }
 0x2ef   :  { %p8607_p4 = scmp.ne.s32.totalorder %s10508_s22, %s8606_s0  ;;  %p8610_p5 = scmp.lt.u32.totalorder %s8606_s0, %s10508_s22 }
 0x2f1   :  { %p8612_p6 = pnand %p8610_p5, %p8607_p4 }
 0x2f3   :  { %8615 = shalt.err (!%p8612_p6)
}
 0x2f4   :  { %s8616_s12 = scalar_lea.vmem %s418_s13, 16  ;;  %s8620_s17 = scalar_lea.vmem %s418_s13, 32 }
 0x2f5   :  { %p8617_p7 = scmp.ne.s32.totalorder %s418_s13, %s8616_s12  ;;  %p8621_p8 = scmp.lt.s32.totalorder %s418_s13, %s418_s13 }
 0x2f6   :  { %p8622_p9 = scmp.lt.s32.totalorder %s8620_s17, %s8616_s12 }
 0x2f8   :  { %p8623_p10 = por %p8622_p9, %p8621_p8 }
 0x2fa   :  { %p8624_p11 = pnand %p8623_p10, %p8617_p7 }
 0x2fc   :  { %8627 = shalt.err (!%p8624_p11)
}
 0x2fd   :  { %s10509_s28 = sld [smem:[#allocation114_spill]] }
 0x2fe   :  { %420 = dma.hbm_to_vmem [thread:$0]  %s10508_s22, 16, %s418_s13, [#allocation35]  }
 0x303   :  { %s8628_s6 = scalar_lea.hbm %s10509_s28, 32 }
 0x304   :  { %p8629_p12 = scmp.ne.s32.totalorder %s10509_s28, %s8628_s6  ;;  %p8632_p13 = scmp.lt.u32.totalorder %s8628_s6, %s10509_s28 }
 0x306   :  { %p8634_p0 = pnand %p8632_p13, %p8629_p12 }
 0x308   :  { %8637 = shalt.err (!%p8634_p0)
}
 0x309   :  { %s8638_s1 = scalar_lea.vmem %s438_s26, 32  ;;  %p8643_p2 = scmp.lt.s32.totalorder %s438_s26, %s438_s26 }
 0x30a   :  { %p8639_p1 = scmp.ne.s32.totalorder %s438_s26, %s8638_s1  ;;  %p8644_p3 = scmp.lt.s32.totalorder %s8638_s1, %s8638_s1 }
 0x30c   :  { %p8645_p4 = por %p8644_p3, %p8643_p2 }
 0x30e   :  { %p8646_p5 = pnand %p8645_p4, %p8639_p1 }
 0x310   :  { %8649 = shalt.err (!%p8646_p5)
}
 0x311   :  { %s10510_s7 = sld [smem:[#allocation116_spill]]  ;;  %s9016_s5 = smov [#allocation42]  }
 0x312   :  { %440 = dma.hbm_to_vmem [thread:$0]  %s10509_s28, 32, %s438_s26, [#allocation38]  }
 0x313   :  { %s459_s8 = sshll.u32 %s9016_s5, 4  ;;  %s9017_s2 = smov [#allocation45]   ;;  %s460_s8 = int_to_ptr.vmem [resolvable:$true] %s459_s8 }
 0x314   :  { %s482_s10 = sshll.u32 %s9017_s2, 4  ;;  %s9559_s10 = int_to_ptr.vmem [resolvable:$true] %s482_s10 }
 0x317   :  { %s8650_s19 = scalar_lea.hbm %s10510_s7, 16 }
 0x318   :  { %p8651_p6 = scmp.ne.s32.totalorder %s10510_s7, %s8650_s19  ;;  %p8654_p7 = scmp.lt.u32.totalorder %s8650_s19, %s10510_s7 }
 0x31a   :  { %p8656_p8 = pnand %p8654_p7, %p8651_p6 }
 0x31c   :  { %8659 = shalt.err (!%p8656_p8)
}
 0x31d   :  { %s8660_s3 = scalar_lea.vmem %s460_s8, 16  ;;  %s8664_s11 = scalar_lea.vmem %s460_s8, 32 }
 0x31e   :  { %p8661_p9 = scmp.ne.s32.totalorder %s460_s8, %s8660_s3  ;;  %p8665_p10 = scmp.lt.s32.totalorder %s460_s8, %s460_s8 }
 0x31f   :  { %p8666_p11 = scmp.lt.s32.totalorder %s8664_s11, %s8660_s3 }
 0x321   :  { %p8667_p12 = por %p8666_p11, %p8665_p10 }
 0x323   :  { %p8668_p13 = pnand %p8667_p12, %p8661_p9 }
 0x325   :  { %8671 = shalt.err (!%p8668_p13)
}
 0x326   :  { %s10511_s14 = sld [smem:[#allocation118_spill]] }
 0x327   :  { %462 = dma.hbm_to_vmem [thread:$0]  %s10510_s7, 16, %s460_s8, [#allocation41]  }
 0x32c   :  { %s8672_s30 = scalar_lea.hbm %s10511_s14, 512 }
 0x32d   :  { %p8673_p0 = scmp.ne.s32.totalorder %s10511_s14, %s8672_s30  ;;  %p8676_p1 = scmp.lt.u32.totalorder %s8672_s30, %s10511_s14 }
 0x32f   :  { %p8678_p2 = pnand %p8676_p1, %p8673_p0 }
 0x331   :  { %8681 = shalt.err (!%p8678_p2)
}
 0x332   :  { %s8682_s27 = scalar_lea.vmem %s9559_s10, 512  ;;  %p8687_p4 = scmp.lt.s32.totalorder %s9559_s10, %s9559_s10 }
 0x333   :  { %p8683_p3 = scmp.ne.s32.totalorder %s9559_s10, %s8682_s27  ;;  %p8688_p5 = scmp.lt.s32.totalorder %s8682_s27, %s8682_s27 }
 0x335   :  { %p8689_p6 = por %p8688_p5, %p8687_p4 }
 0x337   :  { %p8690_p7 = pnand %p8689_p6, %p8683_p3 }
 0x339   :  { %8693 = shalt.err (!%p8690_p7)
}
 0x33a   :  { %s10512_s15 = sld [smem:[#allocation120_spill]]  ;;  %s9018_s4 = smov [#allocation48]  }
 0x33b   :  { %488 = dma.hbm_to_vmem [thread:$0]  %s10511_s14, 512, %s9559_s10, [#allocation44], %s8982_s18, %s8982_s18, %s8983_s25  }
 0x33c   :  { %s505_s16 = sshll.u32 %s9018_s4, 4  ;;  %s9019_s22 = smov [#allocation51]   ;;  %s506_s16 = int_to_ptr.vmem [resolvable:$true] %s505_s16 }
 0x33d   :  { %s525_s23 = sshll.u32 %s9019_s22, 4  ;;  %s526_s23 = int_to_ptr.vmem [resolvable:$true] %s525_s23 }
 0x340   :  { %s8694_s13 = scalar_lea.hbm %s10512_s15, 64 }
 0x341   :  { %p8695_p8 = scmp.ne.s32.totalorder %s10512_s15, %s8694_s13  ;;  %p8698_p9 = scmp.lt.u32.totalorder %s8694_s13, %s10512_s15 }
 0x343   :  { %p8700_p10 = pnand %p8698_p9, %p8695_p8 }
 0x345   :  { %8703 = shalt.err (!%p8700_p10)
}
 0x346   :  { %s8704_s20 = scalar_lea.vmem %s506_s16, 64  ;;  %p8709_p12 = scmp.lt.s32.totalorder %s506_s16, %s506_s16 }
 0x347   :  { %p8705_p11 = scmp.ne.s32.totalorder %s506_s16, %s8704_s20  ;;  %p8710_p13 = scmp.lt.s32.totalorder %s8704_s20, %s8704_s20 }
 0x349   :  { %p8711_p0 = por %p8710_p13, %p8709_p12 }
 0x34b   :  { %p8712_p1 = pnand %p8711_p0, %p8705_p11 }
 0x34d   :  { %8715 = shalt.err (!%p8712_p1)
}
 0x34e   :  { %s10513_s26 = sld [smem:[#allocation122_spill]] }
 0x34f   :  { %508 = dma.hbm_to_vmem [thread:$0]  %s10512_s15, 64, %s506_s16, [#allocation47]  }
 0x354   :  { %s8716_s0 = scalar_lea.hbm %s10513_s26, 16 }
 0x355   :  { %p8717_p2 = scmp.ne.s32.totalorder %s10513_s26, %s8716_s0  ;;  %p8720_p3 = scmp.lt.u32.totalorder %s8716_s0, %s10513_s26 }
 0x357   :  { %p8722_p4 = pnand %p8720_p3, %p8717_p2 }
 0x359   :  { %8725 = shalt.err (!%p8722_p4)
}
 0x35a   :  { %s8726_s12 = scalar_lea.vmem %s526_s23, 16  ;;  %s8730_s17 = scalar_lea.vmem %s526_s23, 32 }
 0x35b   :  { %p8727_p5 = scmp.ne.s32.totalorder %s526_s23, %s8726_s12  ;;  %p8731_p6 = scmp.lt.s32.totalorder %s526_s23, %s526_s23 }
 0x35c   :  { %p8732_p7 = scmp.lt.s32.totalorder %s8730_s17, %s8726_s12 }
 0x35e   :  { %p8733_p8 = por %p8732_p7, %p8731_p6 }
 0x360   :  { %p8734_p9 = pnand %p8733_p8, %p8727_p5 }
 0x362   :  { %8737 = shalt.err (!%p8734_p9)
}
 0x363   :  { %s10514_s28 = sld [smem:[#allocation124_spill]]  ;;  %s9020_s6 = smov [#allocation54]  }
 0x364   :  { %528 = dma.hbm_to_vmem [thread:$0]  %s10513_s26, 16, %s526_s23, [#allocation50]  }
 0x365   :  { %s545_s1 = sshll.u32 %s9020_s6, 4  ;;  %s9021_s7 = smov [#allocation57]   ;;  %s546_s1 = int_to_ptr.vmem [resolvable:$true] %s545_s1 }
 0x366   :  { %s565_s5 = sshll.u32 %s9021_s7, 4  ;;  %s566_s5 = int_to_ptr.vmem [resolvable:$true] %s565_s5 }
 0x369   :  { %s8738_s8 = scalar_lea.hbm %s10514_s28, 64 }
 0x36a   :  { %p8739_p10 = scmp.ne.s32.totalorder %s10514_s28, %s8738_s8  ;;  %p8742_p11 = scmp.lt.u32.totalorder %s8738_s8, %s10514_s28 }
 0x36c   :  { %p8744_p12 = pnand %p8742_p11, %p8739_p10 }
 0x36e   :  { %8747 = shalt.err (!%p8744_p12)
}
 0x36f   :  { %s8748_s2 = scalar_lea.vmem %s546_s1, 64  ;;  %p8753_p0 = scmp.lt.s32.totalorder %s546_s1, %s546_s1 }
 0x370   :  { %p8749_p13 = scmp.ne.s32.totalorder %s546_s1, %s8748_s2  ;;  %p8754_p1 = scmp.lt.s32.totalorder %s8748_s2, %s8748_s2 }
 0x372   :  { %p8755_p2 = por %p8754_p1, %p8753_p0 }
 0x374   :  { %p8756_p3 = pnand %p8755_p2, %p8749_p13 }
 0x376   :  { %8759 = shalt.err (!%p8756_p3)
}
 0x377   :  { %s10515_s10 = sld [smem:[#allocation126_spill]] }
 0x378   :  { %548 = dma.hbm_to_vmem [thread:$0]  %s10514_s28, 64, %s546_s1, [#allocation53]  }
 0x37d   :  { %s8760_s19 = scalar_lea.hbm %s10515_s10, 16 }
 0x37e   :  { %p8761_p4 = scmp.ne.s32.totalorder %s10515_s10, %s8760_s19  ;;  %p8764_p5 = scmp.lt.u32.totalorder %s8760_s19, %s10515_s10 }
 0x380   :  { %p8766_p6 = pnand %p8764_p5, %p8761_p4 }
 0x382   :  { %8769 = shalt.err (!%p8766_p6)
}
 0x383   :  { %s8770_s3 = scalar_lea.vmem %s566_s5, 16  ;;  %s8774_s11 = scalar_lea.vmem %s566_s5, 32 }
 0x384   :  { %p8771_p7 = scmp.ne.s32.totalorder %s566_s5, %s8770_s3  ;;  %p8775_p8 = scmp.lt.s32.totalorder %s566_s5, %s566_s5 }
 0x385   :  { %p8776_p9 = scmp.lt.s32.totalorder %s8774_s11, %s8770_s3 }
 0x387   :  { %p8777_p10 = por %p8776_p9, %p8775_p8 }
 0x389   :  { %p8778_p11 = pnand %p8777_p10, %p8771_p7 }
 0x38b   :  { %8781 = shalt.err (!%p8778_p11)
}
 0x38c   :  { %s10516_s14 = sld [smem:[#allocation128_spill]]  ;;  %s9022_s30 = smov [#allocation60]  }
 0x38d   :  { %568 = dma.hbm_to_vmem [thread:$0]  %s10515_s10, 16, %s566_s5, [#allocation56]  }
 0x38e   :  { %s585_s27 = sshll.u32 %s9022_s30, 4  ;;  %s9023_s15 = smov [#allocation63]   ;;  %s586_s27 = int_to_ptr.vmem [resolvable:$true] %s585_s27 }
 0x38f   :  { %s611_s4 = sshll.u32 %s9023_s15, 4  ;;  %s612_s4 = int_to_ptr.vmem [resolvable:$true] %s611_s4 }
 0x392   :  { %s8782_s16 = scalar_lea.hbm %s10516_s14, 16 }
 0x393   :  { %p8783_p12 = scmp.ne.s32.totalorder %s10516_s14, %s8782_s16  ;;  %p8786_p13 = scmp.lt.u32.totalorder %s8782_s16, %s10516_s14 }
 0x395   :  { %p8788_p0 = pnand %p8786_p13, %p8783_p12 }
 0x397   :  { %8791 = shalt.err (!%p8788_p0)
}
 0x398   :  { %s8792_s22 = scalar_lea.vmem %s586_s27, 16  ;;  %s8796_s23 = scalar_lea.vmem %s586_s27, 32 }
 0x399   :  { %p8793_p1 = scmp.ne.s32.totalorder %s586_s27, %s8792_s22  ;;  %p8797_p2 = scmp.lt.s32.totalorder %s586_s27, %s586_s27 }
 0x39a   :  { %p8798_p3 = scmp.lt.s32.totalorder %s8796_s23, %s8792_s22 }
 0x39c   :  { %p8799_p4 = por %p8798_p3, %p8797_p2 }
 0x39e   :  { %p8800_p5 = pnand %p8799_p4, %p8793_p1 }
 0x3a0   :  { %8803 = shalt.err (!%p8800_p5)
}
 0x3a1   :  { %s10517_s13 = sld [smem:[#allocation132_spill]] }
 0x3a2   :  { %588 = dma.hbm_to_vmem [thread:$0]  %s10516_s14, 16, %s586_s27, [#allocation59]  }
 0x3a7   :  { %s8804_s20 = scalar_lea.hbm %s10517_s13, 16 }
 0x3a8   :  { %p8805_p6 = scmp.ne.s32.totalorder %s10517_s13, %s8804_s20  ;;  %p8808_p7 = scmp.lt.u32.totalorder %s8804_s20, %s10517_s13 }
 0x3aa   :  { %p8810_p8 = pnand %p8808_p7, %p8805_p6 }
 0x3ac   :  { %8813 = shalt.err (!%p8810_p8)
}
 0x3ad   :  { %s8814_s26 = scalar_lea.vmem %s612_s4, 16  ;;  %s8818_s0 = scalar_lea.vmem %s612_s4, 32 }
 0x3ae   :  { %p8815_p9 = scmp.ne.s32.totalorder %s612_s4, %s8814_s26  ;;  %p8819_p10 = scmp.lt.s32.totalorder %s612_s4, %s612_s4 }
 0x3af   :  { %p8820_p11 = scmp.lt.s32.totalorder %s8818_s0, %s8814_s26 }
 0x3b1   :  { %p8821_p12 = por %p8820_p11, %p8819_p10 }
 0x3b3   :  { %p8822_p13 = pnand %p8821_p12, %p8815_p9 }
 0x3b5   :  { %8825 = shalt.err (!%p8822_p13)
}
 0x3b6   :  { %s10518_s12 = sld [smem:[#allocation134_spill]]  ;;  %s9024_s17 = smov [#allocation66]  }
 0x3b7   :  { %614 = dma.hbm_to_vmem [thread:$0]  %s10517_s13, 16, %s612_s4, [#allocation62]  }
 0x3b8   :  { %s630_s28 = sshll.u32 %s9024_s17, 4  ;;  %s9025_s6 = smov [#allocation67]   ;;  %s631_s28 = int_to_ptr.vmem [resolvable:$true] %s630_s28 }
 0x3b9   :  { %s642_s1 = sshll.u32 %s9025_s6, 4  ;;  %s9601_s1 = int_to_ptr.vmem [resolvable:$true] %s642_s1 }
 0x3bc   :  { %s8826_s7 = scalar_lea.hbm %s10518_s12, 512 }
 0x3bd   :  { %p8827_p0 = scmp.ne.s32.totalorder %s10518_s12, %s8826_s7  ;;  %p8830_p1 = scmp.lt.u32.totalorder %s8826_s7, %s10518_s12 }
 0x3bf   :  { %p8832_p2 = pnand %p8830_p1, %p8827_p0 }
 0x3c1   :  { %8835 = shalt.err (!%p8832_p2)
}
 0x3c2   :  { %s8836_s5 = scalar_lea.vmem %s631_s28, 512  ;;  %p8841_p4 = scmp.lt.s32.totalorder %s631_s28, %s631_s28 }
 0x3c3   :  { %p8837_p3 = scmp.ne.s32.totalorder %s631_s28, %s8836_s5  ;;  %p8842_p5 = scmp.lt.s32.totalorder %s8836_s5, %s8836_s5 }
 0x3c5   :  { %p8843_p6 = por %p8842_p5, %p8841_p4 }
 0x3c7   :  { %p8844_p7 = pnand %p8843_p6, %p8837_p3 }
 0x3c9   :  { %8847 = shalt.err (!%p8844_p7)
}
 0x3ca   :  { %s10519_s8 = sld [smem:[#allocation135_spill]] }
 0x3cb   :  { %636 = dma.hbm_to_vmem [thread:$0]  %s10518_s12, 512, %s631_s28, [#allocation65], %s8982_s18, %s8982_s18, %s8983_s25  }
 0x3d0   :  { %s8848_s2 = scalar_lea.hbm %s10519_s8, 512 }
 0x3d1   :  { %p8849_p8 = scmp.ne.s32.totalorder %s10519_s8, %s8848_s2  ;;  %p8852_p9 = scmp.lt.u32.totalorder %s8848_s2, %s10519_s8 }
 0x3d3   :  { %p8854_p10 = pnand %p8852_p9, %p8849_p8 }
 0x3d5   :  { %8857 = shalt.err (!%p8854_p10)
}
 0x3d6   :  { %s8858_s10 = scalar_lea.vmem %s9601_s1, 512  ;;  %p8863_p12 = scmp.lt.s32.totalorder %s9601_s1, %s9601_s1 }
 0x3d7   :  { %p8859_p11 = scmp.ne.s32.totalorder %s9601_s1, %s8858_s10  ;;  %p8864_p13 = scmp.lt.s32.totalorder %s8858_s10, %s8858_s10 }
 0x3d9   :  { %p8865_p0 = por %p8864_p13, %p8863_p12 }
 0x3db   :  { %p8866_p1 = pnand %p8865_p0, %p8859_p11 }
 0x3dd   :  { %8869 = shalt.err (!%p8866_p1)
}
 0x3de   :  { %648 = dma.hbm_to_vmem [thread:$0]  %s10519_s8, 512, %s9601_s1, [#allocation68], %s8982_s18, %s8982_s18, %s8983_s25  }
 0x3df   :  { %8870 = dma.done.wait [#allocation3], 16  }
 0x3e0   :  { %8871 = vsyncadd [#allocation3], 4294967280 }
 0x3e1   :  { %8872 = dma.done.wait [#allocation5], 32  }
 0x3e2   :  { %8873 = vsyncadd [#allocation5], 4294967264 }
 0x3e3   :  { %8874 = dma.done.wait [#allocation8], 576  }
 0x3e4   :  { %8875 = vsyncadd [#allocation8], 4294966720 }
 0x3e5   :  { %8876 = dma.done.wait [#allocation11], 32  }
 0x3e6   :  { %8877 = vsyncadd [#allocation11], 4294967264 }
 0x3e7   :  { %8878 = dma.done.wait [#allocation14], 32  }
 0x3e8   :  { %8879 = vsyncadd [#allocation14], 4294967264 }
 0x3e9   :  { %8880 = dma.done.wait [#allocation17], 1024  }
 0x3ea   :  { %8881 = vsyncadd [#allocation17], 4294966272 }
 0x3eb   :  { %8882 = dma.done.wait [#allocation20], 32  }
 0x3ec   :  { %8883 = vsyncadd [#allocation20], 4294967264 }
 0x3ed   :  { %8884 = dma.done.wait [#allocation23], 528  }
 0x3ee   :  { %8885 = vsyncadd [#allocation23], 4294966768 }
 0x3ef   :  { %8886 = dma.done.wait [#allocation26], 1024  }
 0x3f0   :  { %8887 = vsyncadd [#allocation26], 4294966272 }
 0x3f1   :  { %8888 = dma.done.wait [#allocation29], 528  }
 0x3f2   :  { %8889 = vsyncadd [#allocation29], 4294966768 }
 0x3f3   :  { %8890 = dma.done.wait [#allocation32], 80  }
 0x3f4   :  { %8891 = vsyncadd [#allocation32], 4294967216 }
 0x3f5   :  { %8892 = dma.done.wait [#allocation35], 32  }
 0x3f6   :  { %8893 = vsyncadd [#allocation35], 4294967264 }
 0x3f7   :  { %8894 = dma.done.wait [#allocation38], 96  }
 0x3f8   :  { %8895 = vsyncadd [#allocation38], 4294967200 }
 0x3f9   :  { %8896 = dma.done.wait [#allocation41], 32  }
 0x3fa   :  { %8897 = vsyncadd [#allocation41], 4294967264 }
 0x3fb   :  { %8898 = dma.done.wait [#allocation44], 1024  }
 0x3fc   :  { %8899 = vsyncadd [#allocation44], 4294966272 }
 0x3fd   :  { %8900 = dma.done.wait [#allocation47], 80  }
 0x3fe   :  { %8901 = vsyncadd [#allocation47], 4294967216 }
 0x3ff   :  { %8902 = dma.done.wait [#allocation50], 32  }
 0x400   :  { %8903 = vsyncadd [#allocation50], 4294967264 }
 0x401   :  { %8904 = dma.done.wait [#allocation53], 80  }
 0x402   :  { %8905 = vsyncadd [#allocation53], 4294967216 }
 0x403   :  { %8906 = dma.done.wait [#allocation56], 48  }
 0x404   :  { %8907 = vsyncadd [#allocation56], 4294967248 }
 0x405   :  { %8908 = dma.done.wait [#allocation59], 32  }
 0x406   :  { %8909 = vsyncadd [#allocation59], 4294967264 }
 0x407   :  { %8910 = dma.done.wait [#allocation62], 528  }
 0x408   :  { %8911 = vsyncadd [#allocation62], 4294966768 }
 0x409   :  { %8912 = dma.done.wait [#allocation65], 528  }
 0x40a   :  { %8913 = vsyncadd [#allocation65], 4294966768 }
 0x40b   :  { %8914 = dma.done.wait [#allocation68], 512  }
 0x40c   :  { %8915 = vsyncadd [#allocation68], 4294966784  ;;  %s10520_s18 = sld [smem:[#allocation93_spill]]  ;;  %s10521_s25 = sld [smem:[#allocation92_spill]]  ;;  %vm808_vm0 = vcmask 1041408   ;;  %vm894_vm1 = vcmask 1042432  }
 0x40d   :  { %vm801_vm2 = vcmask 15360   ;;  %v800_v0 = vld [vmem:[#allocation55] sm:$0x3]  ;;  %v799_v1 = vld [vmem:[#allocation54] sm:$0x7]  ;;  %vm887_vm3 = vcmask 23552  }
 0x40e   :  { %6678 = vmatprep.subr.msk.mxu1 %vm808_vm0, %v800_v0  ;;  %6683 = vmatprep.subr.msk.mxu0 %vm894_vm1, %v799_v1  ;;  %v6162_v11 = vld [vmem:[#allocation49] ss:$0 sm:$0xff]  ;;  %vm982_vm4 = vcmask 261120   ;;  %v1028_v27 = vld [vmem:[#allocation61] sm:$0xff]  ;;  %v1030_v30 = vld [vmem:[#allocation61 + $0x10] sm:$0xff]  ;;  %vm1137_vm5 = vcmask 130048  }
 0x40f   :  { %6679 = vmatpush3.msk.msra.mxu1 %vm808_vm0, %v800_v0  ;;  %6684 = vmatpush3.msk.msra.mxu0 %vm894_vm1, %v799_v1  ;;  %v1029_v28 = vld [vmem:[#allocation61 + $0x8] sm:$0xff]  ;;  %v1031_v31 = vld [vmem:[#allocation61 + $0x18] sm:$0xff]  ;;  %v6163_v40 = vld [vmem:[#allocation52] ss:$0 sm:$0xff]  ;;  %s9026_s19 = smov 64   ;;  %s10524_s3 = sld [smem:[#allocation138_spill]] }
 0x410   :  { %v7240_v29 = vpack.c.bf16 %v1029_v28, %v1028_v27  ;;  %v7244_v32 = vpack.c.bf16 %v1031_v31, %v1030_v30  ;;  %v6164_v42 = vld [vmem:[#allocation51] ss:$0 sm:$0xff]  ;;  %v9659_v49 = vld [vmem:[%s9344_s24] sm:$0xff]  ;;  %vm9665_vm6 = vmpackc.low %vm982_vm4, %vm982_vm4  ;;  %s10525_s11 = sld [smem:[#allocation136_spill]]  ;;  %s9027_s14 = smov 96   ;;  %vm1665_vm7 = vcmask 523264  }
 0x411   :  { %v9678_v59 = vld [vmem:[%s9344_s24 + $0x8] sm:$0xff]  ;;  %v9681_v60 = vld [vmem:[%s9344_s24 + $0x10] sm:$0xff]  ;;  %v9688_v61 = vld [vmem:[%s9344_s24 + $0x18] sm:$0xff]  ;;  %s10526_s30 = sld [smem:[#allocation137_spill]]  ;;  %s10528_s15 = sld [smem:[#allocation130_spill]]  ;;  %vm9029_vm8 = vmmov 0  }
 0x412   :  { %v9623_v2 = vld [vmem:[%s10520_s18] sm:$0xff]  ;;  %v9631_v4 = vld [vmem:[%s10520_s18 + $0x8] sm:$0xff]  ;;  %7241 = vmatprep.subr.bf16.mxu1 %v7240_v29  ;;  %v9701_v0 = vld [vmem:[%s9344_s24 + $0x30] sm:$0xff]  ;;  %s10527_s27 = sld [smem:[#allocation129_spill]]  ;;  %s10530_s4 = sld [smem:[#allocation94_spill]]  ;;  %vm4985_vm9 = vcmask 785408  }
 0x413   :  { %v9628_v3 = vld [vmem:[%s10521_s25] sm:$0xff]  ;;  %v9634_v5 = vld [vmem:[%s10521_s25 + $0x8] sm:$0xff]  ;;  %6680 = vmatprep.mubr.msk.f32.mxu1 %vm801_vm2, %v9623_v2  ;;  %v9708_v1 = vld [vmem:[%s9344_s24 + $0x38] sm:$0xff]  ;;  %s10531_s16 = sld [smem:[#allocation110_spill]]  ;;  %s10532_s22 = sld [smem:[#allocation115_spill]]  ;;  %vm6062_vm11 = vcmask 31744  }
 0x414   :  { %6685 = vmatprep.mubr.msk.f32.mxu0 %vm887_vm3, %v9628_v3  ;;  %6681 = vmatmul.mubr.msk.f32.vlgmr.msra.gmra.mrb[0].mxu1 %vm801_vm2, %v9631_v4  ;;  %v9691_v62 = vld [vmem:[%s9344_s24 + $0x20] sm:$0xff]  ;;  %v9698_v63 = vld [vmem:[%s9344_s24 + $0x28] sm:$0xff]  ;;  %s10535_s23 = sld [smem:[#allocation98_spill]]  ;;  %s10536_s13 = sld [smem:[#allocation100_spill]] }
 0x415   :  { %6686 = vmatmul.mubr.msk.f32.vlgmr.msra.gmra.mrb[0].mxu0 %vm887_vm3, %v9634_v5  ;;  %7243 = vmatpush3.bf16.msra.mxu1 %v7240_v29  ;;  %s10537_s20 = sld [smem:[#allocation105_spill]]  ;;  %s10538_s26 = sld [smem:[#allocation102_spill]] }
 0x416   :  { %7245 = vmatprep.subr.bf16.mxu1 %v7244_v32  ;;  %6703 = vmatprep.mubr.msk.f32.mxu0 %vm1137_vm5, %v9659_v49  ;;  %v9753_v31 = vld [vmem:[%s10525_s11 + $0x8] sm:$0xff] }
 0x419   :  { %7247 = vmatpush3.bf16.msra.mxu1 %v7244_v32 }
 0x4e7   :  { %v6682_v6 = vpop.f32.mrb[0].mxu1 }
 0x4e8   :  { %v6687_v7 = vpop.f32.mrb[0].mxu0  ;;  %v878_v9 = vpop.f32.mrb[1].mxu1 }
 0x4e9   :  { %v970_v8 = vadd.f32 %v6687_v7, %v6682_v6  ;;  %v964_v10 = vpop.f32.mrb[1].mxu0  ;;  %v9713_v6 = vld [vmem:[%s10524_s3] sm:$0xff]  ;;  %v9716_v7 = vld [vmem:[%s10524_s3 + $0x8] sm:$0xff] }
 0x4ea   :  { %v965_v12 = vadd.f32 %v964_v10, %v878_v9 }
 0x4eb   :  { %v981_v15 = vadd.f32 %v6162_v11, %v970_v8 }
 0x4ec   :  { %v980_v13 = vadd.f32 %v6162_v11, %v965_v12  ;;  %v9720_v11 = vld [vmem:[%s10524_s3 + $0x18] sm:$0xff] }
 0x4ed   :  { %v986_v16 = vsel %vm982_vm4, %v981_v15, 0.0 }
 0x4ee   :  { %v983_v14 = vsel %vm982_vm4, %v980_v13, 0.0 }
 0x4ef   :  { %984 = vadd.xlane.f32.xlu0 %v983_v14 }
 0x4f3   :  { %987 = vadd.xlane.f32.xlu0 %v986_v16 }
 0x57c   :  { %v985_v17 = vpop.xlane.xlu0 %984 }
 0x57d   :  { %v990_v18 = vmul.f32 0.03125, %v985_v17 }
 0x57f   :  { %v992_v19 = vsub.f32 %v980_v13, %v990_v18  ;;  %v9724_v13 = vld [vmem:[%s10524_s3 + $0x10] sm:$0xff]  ;;  %v9731_v18 = vld [vmem:[%s10524_s3 + $0x28] sm:$0xff] }
 0x580   :  { %v988_v20 = vpop.xlane.xlu0 %987 }
 0x581   :  { %v991_v21 = vmul.f32 0.03125, %v988_v20  ;;  %v994_v22 = vmul.f32 %v992_v19, %v992_v19 }
 0x583   :  { %v993_v23 = vsub.f32 %v981_v15, %v991_v21  ;;  %v996_v24 = vsel %vm982_vm4, %v994_v22, 0.0 }
 0x584   :  { %997 = vadd.xlane.f32.xlu1 %v996_v24  ;;  %v9741_v24 = vld [vmem:[%s10524_s3 + $0x38] sm:$0xff] }
 0x585   :  { %v995_v25 = vmul.f32 %v993_v23, %v993_v23 }
 0x587   :  { %v999_v26 = vsel %vm982_vm4, %v995_v25, 0.0  ;;  %v9744_v25 = vld [vmem:[%s10524_s3 + $0x30] sm:$0xff] }
 0x588   :  { %1000 = vadd.xlane.f32.xlu1 %v999_v26 }
 0x611   :  { %v998_v33 = vpop.xlane.xlu1 %997 }
 0x612   :  { %v1002_v34 = vmul.f32 0.03125, %v998_v33 }
 0x614   :  { %v1004_v35 = vadd.f32 1e-05, %v1002_v34 }
 0x615   :  { %v1001_v36 = vpop.xlane.xlu1 %1000 }
 0x616   :  { %7704 = vrsqrt.f32 %v1004_v35  ;;  %v1003_v37 = vmul.f32 0.03125, %v1001_v36  ;;  %v9756_v35 = vld [vmem:[%s10525_s11] sm:$0xff] }
 0x618   :  { %v1005_v38 = vadd.f32 1e-05, %v1003_v37 }
 0x61a   :  { %7706 = vrsqrt.f32 %v1005_v38 }
 0x620   :  { %v7705_v39 = vpop.eup %7704 }
 0x621   :  { %v1008_v41 = vmul.f32 %v7705_v39, %v992_v19  ;;  %v9734_v19 = vld [vmem:[%s10524_s3 + $0x20] sm:$0xff] }
 0x623   :  { %v1017_v43 = vmul.f32 %v6163_v40, %v1008_v41 }
 0x624   :  { %v7707_v44 = vpop.eup %7706 }
 0x625   :  { %v1009_v45 = vmul.f32 %v7707_v44, %v993_v23  ;;  %v9650_v46 = vadd.f32 %v6164_v42, %v1017_v43 }
 0x627   :  { %v1018_v47 = vmul.f32 %v6163_v40, %v1009_v45  ;;  %6696 = vmatprep.mubr.msk.f32.mxu1 %vm982_vm4, %v9650_v46 }
 0x629   :  { %v9654_v48 = vadd.f32 %v6164_v42, %v1018_v47  ;;  %v9762_v42 = vld [vmem:[%s10525_s11 + $0x18] sm:$0xff] }
 0x62b   :  { %6697 = vmatmul.mubr.msk.f32.vlgmr.msra.gmra.mrb[2].mxu1 %vm982_vm4, %v9654_v48 }
 0x6fe   :  { %v6698_v50 = vpop.f32.mrb[2].mxu1 }
 0x6ff   :  { %v1104_v51 = vpop.f32.mrb[3].mxu1 }
 0x700   :  { %v9669_v53 = vpack.i.bf16 %v6698_v50, %v1104_v51  ;;  %v7252_v54 = vpack.c.bf16 %v6698_v50, %v1104_v51  ;;  %v9767_v51 = vld [vmem:[%s10525_s11 + $0x10] sm:$0xff] }
 0x702   :  { %7675 = vrot.lane.b32.xlu0 %v9669_v53, %s9026_s19  ;;  %7254 = vmatprep.subr.msk.bf16.mxu1 %vm9665_vm6, %v7252_v54 }
 0x703   :  { %7257 = vmatpush3.bf16.xpose.msk.msra.mxu1 %vm9665_vm6, %v7252_v54 }
 0x774   :  { %v7676_v55 = vpop.permute.xlu0 %7675 }
 0x775   :  { %v7678_v56 = vunpack.i.h.bf16 %v7676_v55  ;;  %v7677_v57 = vunpack.i.l.bf16 %v7676_v55 }
 0x777   :  { %v7248_v58 = vpack.c.bf16 %v7678_v56, %v7677_v57 }
 0x779   :  { %7249 = vmatprep.subr.bf16.mxu0 %v7248_v58 }
 0x77a   :  { %7251 = vmatpush3.bf16.msra.mxu0 %v7248_v58 }
 0x77d   :  { %6704 = vmatmul.mubr.msk.f32.vlgmr.msra.gmra.mrb[2].mxu0 %vm1137_vm5, %v9678_v59 }
 0x77e   :  { %6706 = vmatprep.mubr.msk.f32.mxu0 %vm1137_vm5, %v9681_v60 }
 0x781   :  { %6707 = vmatmul.mubr.msk.f32.gmra.mrb[4].mxu0 %vm1137_vm5, %v9688_v61 }
 0x782   :  { %6709 = vmatprep.mubr.msk.f32.mxu0 %vm1137_vm5, %v9691_v62 }
 0x785   :  { %6710 = vmatmul.mubr.msk.f32.gmra.mrb[6].mxu0 %vm1137_vm5, %v9698_v63 }
 0x786   :  { %6712 = vmatprep.mubr.msk.f32.mxu0 %vm1137_vm5, %v9701_v0 }
 0x789   :  { %6713 = vmatmul.mubr.msk.f32.gmra.mrb[8].mxu0 %vm1137_vm5, %v9708_v1 }
 0x850   :  { %v6705_v8 = vpop.f32.mrb[2].mxu0 }
 0x851   :  { %v1228_v9 = vpop.f32.mrb[3].mxu0  ;;  %v1268_v12 = vmul.f32 %v6705_v8, %v9716_v7  ;;  %v9772_v8 = vld [vmem:[%s10525_s11 + $0x30] sm:$0xff] }
 0x852   :  { %v1267_v10 = vmul.f32 %v1228_v9, %v9713_v6 }
 0x854   :  { %v6708_v14 = vpop.f32.mrb[4].mxu0  ;;  %6719 = vmatprep.mubr.msk.f32.mxu1 %vm982_vm4, %v1267_v10  ;;  %v9775_v10 = vld [vmem:[%s10525_s11 + $0x20] sm:$0xff] }
 0x855   :  { %v1270_v15 = vmul.f32 %v6708_v14, %v9720_v11  ;;  %v1238_v16 = vpop.f32.mrb[5].mxu0  ;;  %6720 = vmatmul.mubr.msk.f32.vlgmr.msra.gmra.mrb[4].mxu1 %vm982_vm4, %v1268_v12 }
 0x856   :  { %v1269_v17 = vmul.f32 %v1238_v16, %v9724_v13 }
 0x858   :  { %v6711_v20 = vpop.f32.mrb[6].mxu0  ;;  %6722 = vmatprep.mubr.msk.f32.mxu1 %vm982_vm4, %v1269_v17 }
 0x859   :  { %v1272_v21 = vmul.f32 %v6711_v20, %v9731_v18  ;;  %v1248_v22 = vpop.f32.mrb[7].mxu0  ;;  %6723 = vmatmul.mubr.msk.f32.gmra.mrb[6].mxu1 %vm982_vm4, %v1270_v15  ;;  %v9782_v20 = vld [vmem:[%s10525_s11 + $0x28] sm:$0xff] }
 0x85a   :  { %v1271_v23 = vmul.f32 %v1248_v22, %v9734_v19  ;;  %v9785_v22 = vld [vmem:[%s10525_s11 + $0x38] sm:$0xff] }
 0x85c   :  { %v6714_v26 = vpop.f32.mrb[8].mxu0  ;;  %6725 = vmatprep.mubr.msk.f32.mxu1 %vm982_vm4, %v1271_v23 }
 0x85d   :  { %v1274_v27 = vmul.f32 %v6714_v26, %v9741_v24  ;;  %v1258_v28 = vpop.f32.mrb[9].mxu0  ;;  %6726 = vmatmul.mubr.msk.f32.gmra.mrb[8].mxu1 %vm982_vm4, %v1272_v21 }
 0x85e   :  { %v1273_v29 = vmul.f32 %v1258_v28, %v9744_v25 }
 0x860   :  { %6728 = vmatprep.mubr.msk.f32.mxu1 %vm982_vm4, %v1273_v29 }
 0x861   :  { %6729 = vmatmul.mubr.msk.f32.gmra.mrb[10].mxu1 %vm982_vm4, %v1274_v27 }
 0x928   :  { %v6721_v30 = vpop.f32.mrb[4].mxu1 }
 0x929   :  { %v1409_v32 = vmul.f32 0.35355338, %v6721_v30  ;;  %v1369_v33 = vpop.f32.mrb[5].mxu1 }
 0x92a   :  { %v1408_v34 = vmul.f32 0.35355338, %v1369_v33 }
 0x92b   :  { %v1425_v36 = vadd.f32 %v9753_v31, %v1409_v32 }
 0x92c   :  { %v6724_v37 = vpop.f32.mrb[6].mxu1  ;;  %v1424_v41 = vadd.f32 %v9756_v35, %v1408_v34 }
 0x92d   :  { %v1411_v38 = vmul.f32 0.35355338, %v6724_v37  ;;  %v1435_v39 = vsel %vm1137_vm5, %v1425_v36, -inf  ;;  %v1379_v40 = vpop.f32.mrb[7].mxu1 }
 0x92e   :  { %1436 = vmax.xlane.f32.xlu1 %v1435_v39  ;;  %v1410_v44 = vmul.f32 0.35355338, %v1379_v40  ;;  %v1432_v45 = vsel %vm1137_vm5, %v1424_v41, -inf }
 0x92f   :  { %v1427_v50 = vadd.f32 %v9762_v42, %v1411_v38 }
 0x930   :  { %v6727_v43 = vpop.f32.mrb[8].mxu1  ;;  %v1426_v58 = vadd.f32 %v9767_v51, %v1410_v44 }
 0x931   :  { %v1389_v47 = vpop.f32.mrb[9].mxu1  ;;  %v1441_v57 = vsel %vm1137_vm5, %v1427_v50, -inf  ;;  %v1413_v14 = vmul.f32 0.35355338, %v6727_v43 }
 0x932   :  { %1433 = vmax.xlane.f32.xlu1 %v1432_v45  ;;  %v1412_v55 = vmul.f32 0.35355338, %v1389_v47  ;;  %v1438_v15 = vsel %vm1137_vm5, %v1426_v58, -inf }
 0x933   :  { %v1429_v26 = vadd.f32 %v9782_v20, %v1413_v14 }
 0x934   :  { %v6730_v54 = vpop.f32.mrb[10].mxu1  ;;  %v1428_v16 = vadd.f32 %v9775_v10, %v1412_v55 }
 0x935   :  { %v1399_v56 = vpop.f32.mrb[11].mxu1  ;;  %v1415_v21 = vmul.f32 0.35355338, %v6730_v54  ;;  %v1447_v28 = vsel %vm1137_vm5, %v1429_v26, -inf }
 0x936   :  { %v1414_v9 = vmul.f32 0.35355338, %v1399_v56  ;;  %1442 = vmax.xlane.f32.xlu1 %v1441_v57  ;;  %v1444_v23 = vsel %vm1137_vm5, %v1428_v16, -inf }
 0x937   :  { %v1431_v27 = vadd.f32 %v9785_v22, %v1415_v21 }
 0x938   :  { %v1430_v12 = vadd.f32 %v9772_v8, %v1414_v9 }
 0x939   :  { %v1453_v29 = vsel %vm1137_vm5, %v1431_v27, -inf }
 0x93a   :  { %1439 = vmax.xlane.f32.xlu1 %v1438_v15  ;;  %v1450_v17 = vsel %vm1137_vm5, %v1430_v12, -inf }
 0x93b   :  { %1451 = vmax.xlane.f32.xlu0 %v1450_v17 }
 0x93e   :  { %1445 = vmax.xlane.f32.xlu1 %v1444_v23 }
 0x942   :  { %1448 = vmax.xlane.f32.xlu1 %v1447_v28 }
 0x946   :  { %1454 = vmax.xlane.f32.xlu1 %v1453_v29 }
 0x9bb   :  { %v1437_v30 = vpop.xlane.xlu1 %1436 }
 0x9bc   :  { %v1457_v32 = vsub.f32 %v1425_v36, %v1437_v30 }
 0x9be   :  { %v1466_v33 = vmul.f32 1.442695, %v1457_v32 }
 0x9bf   :  { %v1434_v34 = vpop.xlane.xlu1 %1433 }
 0x9c0   :  { %7708 = vpow2.f32 %v1466_v33  ;;  %v1456_v37 = vsub.f32 %v1424_v41, %v1434_v34 }
 0x9c2   :  { %v1464_v38 = vmul.f32 1.442695, %v1456_v37 }
 0x9c3   :  { %v1443_v39 = vpop.xlane.xlu1 %1442 }
 0x9c4   :  { %7710 = vpow2.f32 %v1464_v38  ;;  %v1459_v40 = vsub.f32 %v1427_v50, %v1443_v39 }
 0x9c6   :  { %v1470_v43 = vmul.f32 1.442695, %v1459_v40 }
 0x9c7   :  { %v1440_v44 = vpop.xlane.xlu1 %1439 }
 0x9c8   :  { %7712 = vpow2.f32 %v1470_v43  ;;  %v1458_v45 = vsub.f32 %v1426_v58, %v1440_v44  ;;  %v1452_v41 = vpop.xlane.xlu0 %1451 }
 0x9c9   :  { %v1462_v58 = vsub.f32 %v1430_v12, %v1452_v41 }
 0x9ca   :  { %v9792_v47 = vpop.eup %7708  ;;  %v1468_v54 = vmul.f32 1.442695, %v1458_v45 }
 0x9cb   :  { %v1446_v55 = vpop.xlane.xlu1 %1445  ;;  %v1483_v56 = vsel %vm1137_vm5, %v9792_v47, 0.0 }
 0x9cc   :  { %7714 = vpow2.f32 %v1468_v54  ;;  %1484 = vadd.xlane.f32.xlu1 %v1483_v56  ;;  %v1460_v57 = vsub.f32 %v1428_v16, %v1446_v55  ;;  %v1476_v16 = vmul.f32 1.442695, %v1462_v58 }
 0x9ce   :  { %v7711_v36 = vpop.eup %7710  ;;  %v1472_v17 = vmul.f32 1.442695, %v1460_v57 }
 0x9cf   :  { %v1449_v9 = vpop.xlane.xlu1 %1448  ;;  %v1480_v14 = vsel %vm1137_vm5, %v7711_v36, 0.0 }
 0x9d0   :  { %v1461_v50 = vsub.f32 %v1429_v26, %v1449_v9  ;;  %1481 = vadd.xlane.f32.xlu1 %v1480_v14 }
 0x9d2   :  { %v9797_v15 = vpop.eup %7712  ;;  %v1474_v21 = vmul.f32 1.442695, %v1461_v50 }
 0x9d3   :  { %v1455_v23 = vpop.xlane.xlu1 %1454  ;;  %v1489_v28 = vsel %vm1137_vm5, %v9797_v15, 0.0 }
 0x9d4   :  { %7716 = vpow2.f32 %v1474_v21  ;;  %v1463_v29 = vsub.f32 %v1431_v27, %v1455_v23  ;;  %1490 = vadd.xlane.f32.xlu1 %v1489_v28 }
 0x9d5   :  { %7718 = vpow2.f32 %v1472_v17 }
 0x9d6   :  { %v7715_v30 = vpop.eup %7714  ;;  %v1478_v32 = vmul.f32 1.442695, %v1463_v29 }
 0x9d7   :  { %v1486_v33 = vsel %vm1137_vm5, %v7715_v30, 0.0 }
 0x9d8   :  { %7720 = vpow2.f32 %v1478_v32  ;;  %1487 = vadd.xlane.f32.xlu1 %v1486_v33 }
 0x9d9   :  { %7722 = vpow2.f32 %v1476_v16 }
 0x9de   :  { %v7717_v26 = vpop.eup %7716 }
 0x9df   :  { %v1495_v12 = vsel %vm1137_vm5, %v7717_v26, 0.0  ;;  %v7719_v34 = vpop.eup %7718 }
 0x9e0   :  { %1496 = vadd.xlane.f32.xlu1 %v1495_v12  ;;  %v1492_v38 = vsel %vm1137_vm5, %v7719_v34, 0.0 }
 0x9e2   :  { %v7721_v37 = vpop.eup %7720 }
 0x9e3   :  { %v1501_v27 = vsel %vm1137_vm5, %v7721_v37, 0.0  ;;  %v7723_v39 = vpop.eup %7722 }
 0x9e4   :  { %1493 = vadd.xlane.f32.xlu1 %v1492_v38  ;;  %1502 = vadd.xlane.f32.xlu0 %v1501_v27  ;;  %v1498_v40 = vsel %vm1137_vm5, %v7723_v39, 0.0 }
 0x9e8   :  { %1499 = vadd.xlane.f32.xlu1 %v1498_v40 }
 0x9f9   :  { %7680 = vrot.lane.b32.xlu1 %v9669_v53, %s9027_s14 }
 0xa59   :  { %v1485_v43 = vpop.xlane.xlu1 %1484 }
 0xa5d   :  { %v1482_v44 = vpop.xlane.xlu1 %1481 }
 0xa5e   :  { %7724 = vrcp.f32 %v1482_v44  ;;  %v1753_v44 = vld [vmem:[%s10527_s27 + $0x10] sm:$0xff] }
 0xa5f   :  { %7726 = vrcp.f32 %v1485_v43  ;;  %v1752_v43 = vld [vmem:[%s10527_s27 + $0x8] sm:$0xff] }
 0xa61   :  { %v1491_v45 = vpop.xlane.xlu1 %1490 }
 0xa65   :  { %v1488_v55 = vpop.xlane.xlu1 %1487 }
 0xa66   :  { %7728 = vrcp.f32 %v1488_v55 }
 0xa67   :  { %7730 = vrcp.f32 %v1491_v45 }
 0xa68   :  { %v7725_v54 = vpop.eup %7724 }
 0xa69   :  { %v1512_v56 = vmul.f32 %v7725_v54, %v7711_v36  ;;  %v7727_v21 = vpop.eup %7726 }
 0xa6a   :  { %v1513_v36 = vmul.f32 %v7727_v21, %v9792_v47 }
 0xa6b   :  { %6735 = vmatprep.mubr.msk.f32.mxu0 %vm1137_vm5, %v1512_v56 }
 0xa6d   :  { %v1497_v57 = vpop.xlane.xlu1 %1496 }
 0xa70   :  { %v7729_v23 = vpop.eup %7728 }
 0xa71   :  { %v1494_v41 = vpop.xlane.xlu1 %1493  ;;  %v1503_v53 = vpop.xlane.xlu0 %1502  ;;  %v1514_v29 = vmul.f32 %v7729_v23, %v7715_v30 }
 0xa72   :  { %7732 = vrcp.f32 %v1494_v41  ;;  %v7731_v28 = vpop.eup %7730 }
 0xa73   :  { %7734 = vrcp.f32 %v1497_v57  ;;  %v1515_v32 = vmul.f32 %v7731_v28, %v9797_v15  ;;  %v9819_v15 = vld [vmem:[%s10526_s30] sm:$0xff] }
 0xa75   :  { %v1500_v9 = vpop.xlane.xlu1 %1499 }
 0xa76   :  { %7736 = vrcp.f32 %v1500_v9 }
 0xa77   :  { %7738 = vrcp.f32 %v1503_v53 }
 0xa79   :  { %v7681_v14 = vpop.permute.xlu1 %7680 }
 0xa7a   :  { %v7683_v50 = vunpack.i.h.bf16 %v7681_v14  ;;  %v7682_v58 = vunpack.i.l.bf16 %v7681_v14 }
 0xa7c   :  { %v7258_v17 = vpack.c.bf16 %v7683_v50, %v7682_v58  ;;  %v7733_v16 = vpop.eup %7732 }
 0xa7d   :  { %v7735_v33 = vpop.eup %7734  ;;  %v1516_v12 = vmul.f32 %v7733_v16, %v7719_v34  ;;  %v1751_v34 = vld [vmem:[%s10527_s27] sm:$0xff] }
 0xa7e   :  { %7259 = vmatprep.subr.bf16.mxu0 %v7258_v17  ;;  %v1517_v47 = vmul.f32 %v7735_v33, %v7717_v26  ;;  %v7278_v45 = vpack.c.bf16 %v1752_v43, %v1751_v34  ;;  %v1754_v26 = vld [vmem:[%s10527_s27 + $0x18] sm:$0xff] }
 0xa7f   :  { %7261 = vmatpush3.bf16.msra.mxu0 %v7258_v17  ;;  %v7282_v54 = vpack.c.bf16 %v1754_v26, %v1753_v44 }
 0xa80   :  { %v7737_v38 = vpop.eup %7736  ;;  %7279 = vmatprep.subr.bf16.mxu1 %v7278_v45 }
 0xa81   :  { %v7739_v30 = vpop.eup %7738  ;;  %v1518_v27 = vmul.f32 %v7737_v38, %v7723_v39  ;;  %7281 = vmatpush3.bf16.msra.mxu1 %v7278_v45  ;;  %v1747_v38 = vld [vmem:[%s10528_s15] sm:$0xff] }
 0xa82   :  { %6736 = vmatmul.mubr.msk.f32.vlgmr.msra.gmra.mrb[10].mxu0 %vm1137_vm5, %v1513_v36  ;;  %v1519_v40 = vmul.f32 %v7739_v30, %v7721_v37  ;;  %7283 = vmatprep.subr.bf16.mxu1 %v7282_v54  ;;  %v6199_v45 = vld [vmem:[#allocation57] ss:$0 sm:$0xff] }
 0xa83   :  { %6738 = vmatprep.mubr.msk.f32.mxu0 %vm1137_vm5, %v1514_v29 }
 0xa85   :  { %7285 = vmatpush3.bf16.msra.mxu1 %v7282_v54 }
 0xa86   :  { %6739 = vmatmul.mubr.msk.f32.gmra.mrb[12].mxu0 %vm1137_vm5, %v1515_v32 }
 0xa87   :  { %6741 = vmatprep.mubr.msk.f32.mxu0 %vm1137_vm5, %v1516_v12  ;;  %v9836_v12 = vld [vmem:[%s10526_s30 + $0x8] sm:$0xff] }
 0xa8a   :  { %6742 = vmatmul.mubr.msk.f32.gmra.mrb[14].mxu0 %vm1137_vm5, %v1517_v47  ;;  %v1748_v47 = vld [vmem:[%s10528_s15 + $0x8] sm:$0xff] }
 0xa8b   :  { %6744 = vmatprep.mubr.msk.f32.mxu0 %vm1137_vm5, %v1518_v27  ;;  %v7286_v30 = vpack.c.bf16 %v1748_v47, %v1747_v38  ;;  %v1749_v27 = vld [vmem:[%s10528_s15 + $0x10] sm:$0xff] }
 0xa8d   :  { %7287 = vmatprep.subr.bf16.mxu1 %v7286_v30 }
 0xa8e   :  { %6745 = vmatmul.mubr.msk.f32.gmra.mrb[16].mxu0 %vm1137_vm5, %v1519_v40  ;;  %v1750_v40 = vld [vmem:[%s10528_s15 + $0x18] sm:$0xff] }
 0xa8f   :  { %6763 = vmatprep.mubr.msk.f32.mxu0 %vm1665_vm7, %v9819_v15  ;;  %v7290_v44 = vpack.c.bf16 %v1750_v40, %v1749_v27  ;;  %v6200_v40 = vld [vmem:[#allocation60] ss:$0 sm:$0xff] }
 0xb55   :  { %v6737_v39 = vpop.f32.mrb[10].mxu0 }
 0xb56   :  { %v1656_v37 = vmul.f32 %v6737_v39, %v9716_v7  ;;  %v1616_v55 = vpop.f32.mrb[11].mxu0 }
 0xb57   :  { %v1655_v56 = vmul.f32 %v1616_v55, %v9713_v6 }
 0xb59   :  { %v7262_v57 = vpack.c.bf16 %v1656_v37, %v1655_v56  ;;  %v6740_v41 = vpop.f32.mrb[12].mxu0 }
 0xb5a   :  { %v1658_v9 = vmul.f32 %v6740_v41, %v9720_v11  ;;  %v1626_v14 = vpop.f32.mrb[13].mxu0 }
 0xb5b   :  { %v1657_v50 = vmul.f32 %v1626_v14, %v9724_v13  ;;  %7263 = vmatprep.subr.bf16.mxu0 %v7262_v57 }
 0xb5c   :  { %7265 = vmatpush3.bf16.msra.mxu0 %v7262_v57 }
 0xb5d   :  { %v7266_v58 = vpack.c.bf16 %v1658_v9, %v1657_v50  ;;  %v6743_v53 = vpop.f32.mrb[14].mxu0 }
 0xb5e   :  { %v1660_v17 = vmul.f32 %v6743_v53, %v9731_v18  ;;  %v1636_v21 = vpop.f32.mrb[15].mxu0 }
 0xb5f   :  { %v1659_v23 = vmul.f32 %v1636_v21, %v9734_v19  ;;  %7267 = vmatprep.subr.bf16.mxu0 %v7266_v58 }
 0xb60   :  { %7269 = vmatpush3.bf16.msra.mxu0 %v7266_v58 }
 0xb61   :  { %v7270_v36 = vpack.c.bf16 %v1660_v17, %v1659_v23  ;;  %v6746_v28 = vpop.f32.mrb[16].mxu0 }
 0xb62   :  { %v1662_v29 = vmul.f32 %v6746_v28, %v9741_v24  ;;  %v1646_v16 = vpop.f32.mrb[17].mxu0  ;;  %v9028_v28 = vmov 0.0|0.0  }
 0xb63   :  { %v1661_v32 = vmul.f32 %v1646_v16, %v9744_v25  ;;  %7271 = vmatprep.subr.bf16.mxu0 %v7270_v36 }
 0xb64   :  { %7273 = vmatpush3.bf16.msra.mxu0 %v7270_v36 }
 0xb65   :  { %v7274_v33 = vpack.c.bf16 %v1662_v29, %v1661_v32 }
 0xb67   :  { %7275 = vmatprep.subr.bf16.mxu0 %v7274_v33 }
 0xb68   :  { %7277 = vmatpush3.bf16.msra.mxu0 %v7274_v33 }
 0xb69   :  { %7294 = vmatprep.subr.bf16.mxu0 %v9028_v28 }
 0xb6b   :  { %6764 = vmatmul.mubr.msk.f32.vlgmr.msra.gmra.mrb[18].mxu0 %vm1665_vm7, %v9836_v12 }
 0xc3e   :  { %v6765_v34 = vpop.f32.mrb[18].mxu0 }
 0xc3f   :  { %v1738_v43 = vpop.f32.mrb[19].mxu0 }
 0xc40   :  { %6774 = vmatprep.mubr.msk.f32.mxu1 %vm982_vm4, %v1738_v43 }
 0xc41   :  { %6775 = vmatmul.mubr.msk.f32.vlgmr.msra.gmra.mrb[12].mxu1 %vm982_vm4, %v6765_v34 }
 0xc42   :  { %7289 = vmatpush3.bf16.msra.mxu1 %v7286_v30  ;;  %6785 = vmatprep.mubr.msk.f32.mxu1 %vm982_vm4, %v9650_v46 }
 0xc43   :  { %7291 = vmatprep.subr.bf16.mxu1 %v7290_v44 }
 0xc46   :  { %7293 = vmatpush3.bf16.msra.mxu1 %v7290_v44 }
 0xc47   :  { %7303 = vmatprep.subr.bf16.mxu1 %v9028_v28 }
 0xc49   :  { %6786 = vmatmul.mubr.msk.f32.vlgmr.msra.gmra.mrb[12].mxu1 %vm982_vm4, %v9654_v48 }
 0xd1c   :  { %v6787_v26 = vpop.f32.mrb[12].mxu1 }
 0xd1d   :  { %v1902_v54 = vpop.f32.mrb[13].mxu1  ;;  %v1919_v39 = vadd.f32 %v6787_v26, %v6199_v45 }
 0xd1e   :  { %v1918_v37 = vadd.f32 %v6199_v45, %v1902_v54  ;;  %v6201_v45 = vld [vmem:[#allocation58] ss:$0 sm:$0xff] }
 0xd1f   :  { %v1921_v57 = vadd.f32 %v1919_v39, %v9654_v48  ;;  %v9030_v48 = vmov 0.0  }
 0xd20   :  { %v1920_v55 = vadd.f32 %v1918_v37, %v9650_v46  ;;  %6792 = vmatprep.mubr.msk.f32.mxu0 %vm9029_vm8, %v9030_v48  ;;  %6814 = vmatprep.mubr.msk.f32.mxu1 %vm9029_vm8, %v9030_v48  ;;  %v2040_v37 = vld [vmem:[#allocation67] sm:$0xff] }
 0xd21   :  { %v1925_v41 = vsel %vm982_vm4, %v1921_v57, 0.0 }
 0xd22   :  { %v1922_v56 = vsel %vm982_vm4, %v1920_v55, 0.0 }
 0xd23   :  { %1923 = vadd.xlane.f32.xlu0 %v1922_v56 }
 0xd27   :  { %1926 = vadd.xlane.f32.xlu0 %v1925_v41 }
 0xdb0   :  { %v1924_v9 = vpop.xlane.xlu0 %1923 }
 0xdb1   :  { %v1928_v14 = vmul.f32 0.03125, %v1924_v9  ;;  %v2042_v9 = vld [vmem:[#allocation67 + $0x10] sm:$0xff] }
 0xdb3   :  { %v1930_v50 = vsub.f32 %v1920_v55, %v1928_v14  ;;  %v2041_v55 = vld [vmem:[#allocation67 + $0x8] sm:$0xff]  ;;  %v2043_v14 = vld [vmem:[#allocation67 + $0x18] sm:$0xff] }
 0xdb4   :  { %v1927_v58 = vpop.xlane.xlu0 %1926  ;;  %v7298_v41 = vpack.c.bf16 %v2041_v55, %v2040_v37 }
 0xdb5   :  { %v1929_v53 = vmul.f32 0.03125, %v1927_v58  ;;  %v1932_v17 = vmul.f32 %v1930_v50, %v1930_v50  ;;  %v2220_v58 = vld [vmem:[#allocation39] sm:$0x3] }
 0xdb7   :  { %v1931_v21 = vsub.f32 %v1921_v57, %v1929_v53  ;;  %v1934_v23 = vsel %vm982_vm4, %v1932_v17, 0.0  ;;  %v1966_v57 = vld [vmem:[%s9349_s9] sm:$0x3]  ;;  %v2125_v53 = vld [vmem:[#allocation66] sm:$0xff]  ;;  %v2126_v17 = vld [vmem:[#allocation66 + $0x8] sm:$0xff]  ;;  %s10529_s9 = sld [smem:[#allocation117_spill]] }
 0xdb8   :  { %1935 = vadd.xlane.f32.xlu0 %v1934_v23 }
 0xdb9   :  { %v1933_v36 = vmul.f32 %v1931_v21, %v1931_v21 }
 0xdbb   :  { %v1937_v46 = vsel %vm982_vm4, %v1933_v36, 0.0  ;;  %v2219_v36 = vld [vmem:[#allocation37] sm:$0x7] }
 0xdbc   :  { %1938 = vadd.xlane.f32.xlu0 %v1937_v46 }
 0xe45   :  { %v1936_v29 = vpop.xlane.xlu0 %1935 }
 0xe46   :  { %v1940_v16 = vmul.f32 0.03125, %v1936_v29 }
 0xe48   :  { %v1942_v32 = vadd.f32 1e-05, %v1940_v16 }
 0xe49   :  { %v1939_v33 = vpop.xlane.xlu0 %1938 }
 0xe4a   :  { %7740 = vrsqrt.f32 %v1942_v32  ;;  %v1941_v38 = vmul.f32 0.03125, %v1939_v33 }
 0xe4c   :  { %v1943_v47 = vadd.f32 1e-05, %v1941_v38  ;;  %v6213_v38 = vld [vmem:[#allocation33] ss:$0 sm:$0xff] }
 0xe4e   :  { %7742 = vrsqrt.f32 %v1943_v47 }
 0xe54   :  { %v7741_v30 = vpop.eup %7740 }
 0xe55   :  { %v1946_v27 = vmul.f32 %v7741_v30, %v1930_v50  ;;  %v7301_v50 = vpack.c.bf16 %v2043_v14, %v2042_v9  ;;  %v2432_v9 = vld [vmem:[#allocation45 + $0x10] sm:$0xff]  ;;  %v2433_v14 = vld [vmem:[#allocation45 + $0x18] sm:$0xff] }
 0xe57   :  { %v1955_v44 = vmul.f32 %v6200_v40, %v1946_v27 }
 0xe58   :  { %v7743_v34 = vpop.eup %7742 }
 0xe59   :  { %v1947_v43 = vmul.f32 %v7743_v34, %v1931_v21  ;;  %v1964_v54 = vadd.f32 %v6201_v45, %v1955_v44  ;;  %v7304_v21 = vpack.c.bf16 %v2126_v17, %v2125_v53 }
 0xe5b   :  { %v1956_v26 = vmul.f32 %v6200_v40, %v1947_v43  ;;  %7305 = vmatpush3.bf16.msra.mxu1 %v7304_v21 }
 0xe5c   :  { %7306 = vmatprep.subr.bf16.mxu1 %v9028_v28 }
 0xe5d   :  { %v1965_v39 = vadd.f32 %v6201_v45, %v1956_v26 }
 0xe5f   :  { %v7295_v56 = vpack.c.bf16 %v1965_v39, %v1964_v54 }
 0xe61   :  { %7296 = vmatpush3.bf16.msra.mxu0 %v7295_v56  ;;  %v2430_v56 = vld [vmem:[#allocation45] sm:$0xff] }
 0xe62   :  { %7297 = vmatprep.subr.bf16.mxu0 %v9028_v28 }
 0xe64   :  { %6793 = vmatmul.mubr.msk.f32.vlgmr.msra.gmra.mrb[20].mxu0 %vm1137_vm5, %v1966_v57  ;;  %v2431_v57 = vld [vmem:[#allocation45 + $0x8] sm:$0xff] }
 0xe65   :  { %7299 = vmatpush3.bf16.msra.mxu0 %v7298_v41  ;;  %6803 = vmatprep.mubr.msk.f32.mxu0 %vm9029_vm8, %v9030_v48  ;;  %v2128_v48 = vld [vmem:[#allocation66 + $0x18] sm:$0xff]  ;;  %v7309_v41 = vpack.c.bf16 %v2431_v57, %v2430_v56 }
 0xe66   :  { %7300 = vmatprep.subr.bf16.mxu0 %v9028_v28  ;;  %v2127_v28 = vld [vmem:[#allocation66 + $0x10] sm:$0xff] }
 0xe67   :  { %v7307_v29 = vpack.c.bf16 %v2128_v48, %v2127_v28 }
 0xe69   :  { %7302 = vmatpush3.bf16.msra.mxu0 %v7301_v50  ;;  %7308 = vmatpush3.bf16.msra.mxu1 %v7307_v29  ;;  %v7313_v50 = vpack.c.bf16 %v2433_v14, %v2432_v9  ;;  %v6214_v29 = vld [vmem:[#allocation36] ss:$0 sm:$0xff] }
 0xe6a   :  { %6817 = vmatprep.subr.msk.mxu0 %vm808_vm0, %v2220_v58  ;;  %7310 = vmatprep.subr.bf16.mxu1 %v7309_v41 }
 0xf37   :  { %v2036_v23 = vpop.f32.mrb[20].mxu0 }
 0xf38   :  { %v6794_v46 = vpop.f32.mrb[21].mxu0  ;;  %6804 = vmatmul.mubr.msk.f32.vlgmr.msra.gmra.mrb[22].mxu0 %vm982_vm4, %v2036_v23 }
 0xf39   :  { %6818 = vmatpush3.msk.msra.mxu0 %vm808_vm0, %v2220_v58  ;;  %6819 = vmatprep.mubr.msk.f32.mxu0 %vm801_vm2, %v9623_v2  ;;  %v6203_v2 = vld [vmem:[#allocation64] ss:$0 sm:$0xff] }
 0xf3a   :  { %6822 = vmatprep.subr.msk.mxu0 %vm894_vm1, %v2219_v36 }
 0xf3c   :  { %6820 = vmatmul.mubr.msk.f32.vlgmr.msra.gmra.mrb[24].mxu0 %vm801_vm2, %v9631_v4 }
 0xf3d   :  { %6823 = vmatpush3.msk.msra.mxu0 %vm894_vm1, %v2219_v36  ;;  %6824 = vmatprep.mubr.msk.f32.mxu0 %vm887_vm3, %v9628_v3 }
 0xf44   :  { %6825 = vmatmul.mubr.msk.f32.vlgmr.msra.gmra.mrb[24].mxu0 %vm887_vm3, %v9634_v5 }
 0xf45   :  { %6842 = vmatprep.mubr.msk.f32.mxu0 %vm1137_vm5, %v9659_v49 }
0x100b   :  { %v2120_v16 = vpop.f32.mrb[22].mxu0 }
0x100c   :  { %v2121_v32 = vadd.f32 %v6203_v2, %v2120_v16  ;;  %v6805_v33 = vpop.f32.mrb[23].mxu0  ;;  %v6215_v16 = vld [vmem:[#allocation34] ss:$0 sm:$0xff] }
0x100e   :  { %v2124_v4 = vmax.f32 %v2121_v32, 0.0 }
0x1010   :  { %6815 = vmatmul.mubr.msk.f32.vlgmr.msra.gmra.mrb[14].mxu1 %vm982_vm4, %v2124_v4 }
0x1011   :  { %7312 = vmatpush3.bf16.msra.mxu1 %v7309_v41 }
0x1012   :  { %7314 = vmatprep.subr.bf16.mxu1 %v7313_v50 }
0x1015   :  { %7316 = vmatpush3.bf16.msra.mxu1 %v7313_v50 }
0x1017   :  { %v6826_v47 = vpop.f32.mrb[24].mxu0 }
0x1018   :  { %v2385_v3 = vadd.f32 %v6826_v47, %v6213_v38  ;;  %v2368_v30 = vpop.f32.mrb[25].mxu0 }
0x1019   :  { %v2384_v27 = vadd.f32 %v6213_v38, %v2368_v30 }
0x101a   :  { %v2389_v5 = vsel %vm982_vm4, %v2385_v3, 0.0 }
0x101b   :  { %2390 = vadd.xlane.f32.xlu1 %v2389_v5  ;;  %v2386_v49 = vsel %vm982_vm4, %v2384_v27, 0.0 }
0x101c   :  { %2387 = vadd.xlane.f32.xlu0 %v2386_v49 }
0x10a8   :  { %v2391_v40 = vpop.xlane.xlu1 %2390 }
0x10a9   :  { %v2393_v34 = vmul.f32 0.03125, %v2391_v40  ;;  %v2388_v43 = vpop.xlane.xlu0 %2387 }
0x10aa   :  { %v2392_v44 = vmul.f32 0.03125, %v2388_v43 }
0x10ab   :  { %v2395_v45 = vsub.f32 %v2385_v3, %v2393_v34 }
0x10ac   :  { %v2394_v26 = vsub.f32 %v2384_v27, %v2392_v44 }
0x10ad   :  { %v2397_v37 = vmul.f32 %v2395_v45, %v2395_v45 }
0x10ae   :  { %v2396_v54 = vmul.f32 %v2394_v26, %v2394_v26 }
0x10af   :  { %v2401_v55 = vsel %vm982_vm4, %v2397_v37, 0.0 }
0x10b0   :  { %v2398_v39 = vsel %vm982_vm4, %v2396_v54, 0.0 }
0x10b1   :  { %2399 = vadd.xlane.f32.xlu0 %v2398_v39 }
0x10b5   :  { %2402 = vadd.xlane.f32.xlu0 %v2401_v55 }
0x10e3   :  { %v9881_v58 = vpop.f32.mrb[14].mxu1 }
0x10e4   :  { %v6816_v53 = vpop.f32.mrb[15].mxu1 }
0x113e   :  { %v2400_v17 = vpop.xlane.xlu0 %2399 }
0x113f   :  { %v2404_v21 = vmul.f32 0.03125, %v2400_v17 }
0x1141   :  { %v2406_v23 = vadd.f32 1e-05, %v2404_v21 }
0x1142   :  { %v2403_v36 = vpop.xlane.xlu0 %2402 }
0x1143   :  { %7744 = vrsqrt.f32 %v2406_v23  ;;  %v2405_v46 = vmul.f32 0.03125, %v2403_v36 }
0x1145   :  { %v2407_v28 = vadd.f32 1e-05, %v2405_v46 }
0x1147   :  { %7746 = vrsqrt.f32 %v2407_v28 }
0x114d   :  { %v7745_v48 = vpop.eup %7744 }
0x114e   :  { %v2410_v2 = vmul.f32 %v7745_v48, %v2394_v26 }
0x1150   :  { %v2419_v32 = vmul.f32 %v6214_v29, %v2410_v2 }
0x1151   :  { %v7747_v33 = vpop.eup %7746 }
0x1152   :  { %v2411_v4 = vmul.f32 %v7747_v33, %v2395_v45  ;;  %v9883_v38 = vadd.f32 %v6215_v16, %v2419_v32 }
0x1154   :  { %v2420_v47 = vmul.f32 %v6214_v29, %v2411_v4  ;;  %6835 = vmatprep.mubr.msk.f32.mxu1 %vm982_vm4, %v9883_v38 }
0x1156   :  { %v9887_v3 = vadd.f32 %v6215_v16, %v2420_v47 }
0x1158   :  { %6836 = vmatmul.mubr.msk.f32.vlgmr.msra.gmra.mrb[16].mxu1 %vm982_vm4, %v9887_v3 }
0x122b   :  { %v6837_v30 = vpop.f32.mrb[16].mxu1 }
0x122c   :  { %v2506_v27 = vpop.f32.mrb[17].mxu1 }
0x122d   :  { %v9891_v5 = vpack.i.bf16 %v6837_v30, %v2506_v27  ;;  %v7321_v49 = vpack.c.bf16 %v6837_v30, %v2506_v27 }
0x122f   :  { %7685 = vrot.lane.b32.xlu0 %v9891_v5, %s9026_s19  ;;  %7323 = vmatprep.subr.msk.bf16.mxu1 %vm9665_vm6, %v7321_v49 }
0x1230   :  { %7326 = vmatpush3.bf16.xpose.msk.msra.mxu1 %vm9665_vm6, %v7321_v49 }
0x12a1   :  { %v7686_v40 = vpop.permute.xlu0 %7685 }
0x12a2   :  { %v7688_v34 = vunpack.i.h.bf16 %v7686_v40  ;;  %v7687_v43 = vunpack.i.l.bf16 %v7686_v40 }
0x12a4   :  { %v7317_v44 = vpack.c.bf16 %v7688_v34, %v7687_v43 }
0x12a6   :  { %7318 = vmatprep.subr.bf16.mxu0 %v7317_v44 }
0x12a7   :  { %7320 = vmatpush3.bf16.msra.mxu0 %v7317_v44 }
0x12aa   :  { %6843 = vmatmul.mubr.msk.f32.vlgmr.msra.gmra.mrb[26].mxu0 %vm1137_vm5, %v9678_v59 }
0x12ab   :  { %6845 = vmatprep.mubr.msk.f32.mxu0 %vm1137_vm5, %v9681_v60 }
0x12ae   :  { %6846 = vmatmul.mubr.msk.f32.gmra.mrb[28].mxu0 %vm1137_vm5, %v9688_v61 }
0x12af   :  { %6848 = vmatprep.mubr.msk.f32.mxu0 %vm1137_vm5, %v9691_v62 }
0x12b2   :  { %6849 = vmatmul.mubr.msk.f32.gmra.mrb[30].mxu0 %vm1137_vm5, %v9698_v63 }
0x12b3   :  { %6851 = vmatprep.mubr.msk.f32.mxu0 %vm1137_vm5, %v9701_v0 }
0x12b6   :  { %6852 = vmatmul.mubr.msk.f32.gmra.mrb[32].mxu0 %vm1137_vm5, %v9708_v1 }
0x137d   :  { %v6844_v45 = vpop.f32.mrb[26].mxu0 }
0x137e   :  { %v2589_v59 = vpop.f32.mrb[27].mxu0  ;;  %v2629_v60 = vmul.f32 %v6844_v45, %v9716_v7 }
0x137f   :  { %v2628_v26 = vmul.f32 %v2589_v59, %v9713_v6 }
0x1381   :  { %v6847_v54 = vpop.f32.mrb[28].mxu0  ;;  %6858 = vmatprep.mubr.msk.f32.mxu1 %vm982_vm4, %v2628_v26 }
0x1382   :  { %v2599_v61 = vpop.f32.mrb[29].mxu0  ;;  %6859 = vmatmul.mubr.msk.f32.vlgmr.msra.gmra.mrb[18].mxu1 %vm982_vm4, %v2629_v60  ;;  %v2631_v63 = vmul.f32 %v6847_v54, %v9720_v11 }
0x1383   :  { %v2630_v62 = vmul.f32 %v2599_v61, %v9724_v13 }
0x1385   :  { %6861 = vmatprep.mubr.msk.f32.mxu1 %vm982_vm4, %v2630_v62  ;;  %v6850_v0 = vpop.f32.mrb[30].mxu0 }
0x1386   :  { %v2633_v1 = vmul.f32 %v6850_v0, %v9731_v18  ;;  %6862 = vmatmul.mubr.msk.f32.gmra.mrb[20].mxu1 %vm982_vm4, %v2631_v63  ;;  %v2609_v6 = vpop.f32.mrb[31].mxu0 }
0x1387   :  { %v2632_v7 = vmul.f32 %v2609_v6, %v9734_v19 }
0x1389   :  { %6864 = vmatprep.mubr.msk.f32.mxu1 %vm982_vm4, %v2632_v7  ;;  %v6853_v39 = vpop.f32.mrb[32].mxu0 }
0x138a   :  { %6865 = vmatmul.mubr.msk.f32.gmra.mrb[22].mxu1 %vm982_vm4, %v2633_v1  ;;  %v2635_v37 = vmul.f32 %v6853_v39, %v9741_v24  ;;  %v2619_v13 = vpop.f32.mrb[33].mxu0 }
0x138b   :  { %v2634_v11 = vmul.f32 %v2619_v13, %v9744_v25 }
0x138d   :  { %6867 = vmatprep.mubr.msk.f32.mxu1 %vm982_vm4, %v2634_v11 }
0x138e   :  { %6868 = vmatmul.mubr.msk.f32.gmra.mrb[24].mxu1 %vm982_vm4, %v2635_v37 }
0x138f   :  { %6902 = vmatprep.mubr.msk.f32.mxu1 %vm1665_vm7, %v9819_v15 }
0x1455   :  { %v6860_v18 = vpop.f32.mrb[18].mxu1 }
0x1456   :  { %v2770_v55 = vmul.f32 0.35355338, %v6860_v18  ;;  %v2730_v19 = vpop.f32.mrb[19].mxu1 }
0x1457   :  { %v2769_v56 = vmul.f32 0.35355338, %v2730_v19 }
0x1458   :  { %v2778_v57 = vadd.f32 %v2770_v55, %v9753_v31 }
0x1459   :  { %v6863_v41 = vpop.f32.mrb[20].mxu1  ;;  %v2777_v9 = vadd.f32 %v2769_v56, %v9756_v35 }
0x145a   :  { %v2772_v24 = vmul.f32 0.35355338, %v6863_v41  ;;  %v2740_v14 = vpop.f32.mrb[21].mxu1  ;;  %v2788_v25 = vsel %vm1137_vm5, %v2778_v57, -inf }
0x145b   :  { %v2771_v50 = vmul.f32 0.35355338, %v2740_v14  ;;  %2789 = vmax.xlane.f32.xlu1 %v2788_v25  ;;  %v2785_v53 = vsel %vm1137_vm5, %v2777_v9, -inf }
0x145c   :  { %2786 = vmax.xlane.f32.xlu0 %v2785_v53  ;;  %v2780_v15 = vadd.f32 %v2772_v24, %v9762_v42 }
0x145d   :  { %v6866_v17 = vpop.f32.mrb[22].mxu1  ;;  %v2779_v31 = vadd.f32 %v2771_v50, %v9767_v51 }
0x145e   :  { %v2774_v21 = vmul.f32 0.35355338, %v6866_v17  ;;  %v2794_v23 = vsel %vm1137_vm5, %v2780_v15, -inf  ;;  %v2750_v36 = vpop.f32.mrb[23].mxu1 }
0x145f   :  { %2795 = vmax.xlane.f32.xlu1 %v2794_v23  ;;  %v2773_v46 = vmul.f32 0.35355338, %v2750_v36  ;;  %v2791_v28 = vsel %vm1137_vm5, %v2779_v31, -inf }
0x1460   :  { %v2782_v29 = vadd.f32 %v2774_v21, %v9782_v20 }
0x1461   :  { %v6869_v35 = vpop.f32.mrb[24].mxu1  ;;  %v2781_v42 = vadd.f32 %v2773_v46, %v9775_v10 }
0x1462   :  { %v2760_v48 = vpop.f32.mrb[25].mxu1  ;;  %v2800_v16 = vsel %vm1137_vm5, %v2782_v29, -inf  ;;  %v2776_v32 = vmul.f32 0.35355338, %v6869_v35 }
0x1463   :  { %2792 = vmax.xlane.f32.xlu1 %v2791_v28  ;;  %v2775_v2 = vmul.f32 0.35355338, %v2760_v48  ;;  %v2797_v33 = vsel %vm1137_vm5, %v2781_v42, -inf }
0x1464   :  { %v2784_v47 = vadd.f32 %v2776_v32, %v9785_v22 }
0x1465   :  { %v2783_v51 = vadd.f32 %v2775_v2, %v9772_v8 }
0x1466   :  { %v2806_v20 = vsel %vm1137_vm5, %v2784_v47, -inf }
0x1467   :  { %2801 = vmax.xlane.f32.xlu1 %v2800_v16  ;;  %v2803_v4 = vsel %vm1137_vm5, %v2783_v51, -inf }
0x146b   :  { %2798 = vmax.xlane.f32.xlu1 %v2797_v33 }
0x146f   :  { %2804 = vmax.xlane.f32.xlu1 %v2803_v4 }
0x1473   :  { %2807 = vmax.xlane.f32.xlu1 %v2806_v20 }
0x14e8   :  { %v2790_v30 = vpop.xlane.xlu1 %2789 }
0x14e9   :  { %v2810_v27 = vsub.f32 %v2778_v57, %v2790_v30  ;;  %v2787_v49 = vpop.xlane.xlu0 %2786 }
0x14ea   :  { %v2809_v40 = vsub.f32 %v2777_v9, %v2787_v49 }
0x14eb   :  { %v2819_v10 = vmul.f32 1.442695, %v2810_v27 }
0x14ec   :  { %v2817_v34 = vmul.f32 1.442695, %v2809_v40  ;;  %v2796_v43 = vpop.xlane.xlu1 %2795 }
0x14ed   :  { %7748 = vpow2.f32 %v2819_v10  ;;  %v2812_v44 = vsub.f32 %v2780_v15, %v2796_v43 }
0x14ee   :  { %7750 = vpow2.f32 %v2817_v34 }
0x14ef   :  { %v2823_v8 = vmul.f32 1.442695, %v2812_v44 }
0x14f0   :  { %v2793_v45 = vpop.xlane.xlu1 %2792 }
0x14f1   :  { %7752 = vpow2.f32 %v2823_v8  ;;  %v2811_v59 = vsub.f32 %v2779_v31, %v2793_v45  ;;  %v3095_v45 = vld [vmem:[%s10529_s9] sm:$0xff] }
0x14f3   :  { %v2821_v26 = vmul.f32 1.442695, %v2811_v59  ;;  %v3096_v59 = vld [vmem:[%s10529_s9 + $0x8] sm:$0xff] }
0x14f4   :  { %v2802_v22 = vpop.xlane.xlu1 %2801 }
0x14f5   :  { %7754 = vpow2.f32 %v2821_v26  ;;  %v2814_v60 = vsub.f32 %v2782_v29, %v2802_v22  ;;  %v3097_v26 = vld [vmem:[%s10529_s9 + $0x10] sm:$0xff]  ;;  %v7347_v22 = vpack.c.bf16 %v3096_v59, %v3095_v45 }
0x14f7   :  { %v9947_v54 = vpop.eup %7748  ;;  %v2827_v61 = vmul.f32 1.442695, %v2814_v60  ;;  %v3098_v60 = vld [vmem:[%s10529_s9 + $0x18] sm:$0xff] }
0x14f8   :  { %v7751_v62 = vpop.eup %7750  ;;  %v2799_v63 = vpop.xlane.xlu1 %2798  ;;  %v2836_v0 = vsel %vm1137_vm5, %v9947_v54, 0.0 }
0x14f9   :  { %7756 = vpow2.f32 %v2827_v61  ;;  %v2813_v1 = vsub.f32 %v2781_v42, %v2799_v63  ;;  %2837 = vadd.xlane.f32.xlu0 %v2836_v0  ;;  %v2833_v6 = vsel %vm1137_vm5, %v7751_v62, 0.0 }
0x14fa   :  { %2834 = vadd.xlane.f32.xlu1 %v2833_v6 }
0x14fb   :  { %v7753_v7 = vpop.eup %7752  ;;  %v2825_v39 = vmul.f32 1.442695, %v2813_v1  ;;  %v9978_v1 = vld [vmem:[%s10524_s3] sm:$0xff] }
0x14fc   :  { %v2805_v37 = vpop.xlane.xlu1 %2804  ;;  %v2842_v13 = vsel %vm1137_vm5, %v7753_v7, 0.0 }
0x14fd   :  { %7758 = vpow2.f32 %v2825_v39  ;;  %v2815_v11 = vsub.f32 %v2783_v51, %v2805_v37  ;;  %2843 = vadd.xlane.f32.xlu0 %v2842_v13  ;;  %v9982_v37 = vld [vmem:[%s10524_s3 + $0x18] sm:$0xff] }
0x14ff   :  { %v7755_v18 = vpop.eup %7754  ;;  %v2829_v55 = vmul.f32 1.442695, %v2815_v11 }
0x1500   :  { %v2808_v19 = vpop.xlane.xlu1 %2807  ;;  %v2839_v56 = vsel %vm1137_vm5, %v7755_v18, 0.0 }
0x1501   :  { %7760 = vpow2.f32 %v2829_v55  ;;  %v2816_v57 = vsub.f32 %v2784_v47, %v2808_v19  ;;  %2840 = vadd.xlane.f32.xlu1 %v2839_v56 }
0x1503   :  { %v7757_v41 = vpop.eup %7756  ;;  %v2831_v9 = vmul.f32 1.442695, %v2816_v57  ;;  %v9990_v57 = vld [vmem:[%s10524_s3 + $0x28] sm:$0xff] }
0x1504   :  { %v2848_v24 = vsel %vm1137_vm5, %v7757_v41, 0.0 }
0x1505   :  { %7762 = vpow2.f32 %v2831_v9  ;;  %2849 = vadd.xlane.f32.xlu0 %v2848_v24  ;;  %v9994_v24 = vld [vmem:[%s10524_s3 + $0x20] sm:$0xff] }
0x1507   :  { %v7759_v14 = vpop.eup %7758 }
0x1508   :  { %v2845_v25 = vsel %vm1137_vm5, %v7759_v14, 0.0 }
0x1509   :  { %2846 = vadd.xlane.f32.xlu1 %v2845_v25 }
0x150b   :  { %v7761_v50 = vpop.eup %7760 }
0x150c   :  { %v2851_v53 = vsel %vm1137_vm5, %v7761_v50, 0.0 }
0x150d   :  { %2852 = vadd.xlane.f32.xlu1 %v2851_v53  ;;  %v9998_v53 = vld [vmem:[%s10524_s3 + $0x38] sm:$0xff] }
0x150f   :  { %v7763_v15 = vpop.eup %7762 }
0x1510   :  { %v2854_v17 = vsel %vm1137_vm5, %v7763_v15, 0.0 }
0x1511   :  { %2855 = vadd.xlane.f32.xlu0 %v2854_v17 }
0x151e   :  { %7690 = vrot.lane.b32.xlu1 %v9891_v5, %s9027_s14 }
0x1586   :  { %v2838_v31 = vpop.xlane.xlu0 %2837 }
0x1587   :  { %v2835_v21 = vpop.xlane.xlu1 %2834 }
0x1588   :  { %7764 = vrcp.f32 %v2835_v21  ;;  %v10002_v21 = vld [vmem:[%s10524_s3 + $0x30] sm:$0xff] }
0x1589   :  { %7766 = vrcp.f32 %v2838_v31  ;;  %v7874_v31 = vld [vmem:[%s10521_s25] sm:$0xff] }
0x158a   :  { %v2844_v28 = vpop.xlane.xlu0 %2843 }
0x158e   :  { %v2841_v36 = vpop.xlane.xlu1 %2840 }
0x158f   :  { %7768 = vrcp.f32 %v2841_v36 }
0x1590   :  { %7770 = vrcp.f32 %v2844_v28 }
0x1592   :  { %v7765_v23 = vpop.eup %7764  ;;  %v2850_v29 = vpop.xlane.xlu0 %2849 }
0x1593   :  { %v2865_v35 = vmul.f32 %v7765_v23, %v7751_v62  ;;  %v7767_v33 = vpop.eup %7766  ;;  %v9974_v62 = vld [vmem:[%s10524_s3 + $0x8] sm:$0xff] }
0x1594   :  { %v2866_v4 = vmul.f32 %v7767_v33, %v9947_v54  ;;  %v7351_v54 = vpack.c.bf16 %v3098_v60, %v3097_v26  ;;  %v3660_v60 = vld [vmem:[%s10531_s16 + $0x10] sm:$0xff] }
0x1595   :  { %6874 = vmatprep.mubr.msk.f32.mxu0 %vm1137_vm5, %v2865_v35  ;;  %v3091_v35 = vld [vmem:[#allocation43] sm:$0xff] }
0x1596   :  { %v2847_v46 = vpop.xlane.xlu1 %2846 }
0x1597   :  { %7772 = vrcp.f32 %v2847_v46  ;;  %v3092_v46 = vld [vmem:[#allocation43 + $0x8] sm:$0xff] }
0x1598   :  { %7774 = vrcp.f32 %v2850_v29  ;;  %v7355_v28 = vpack.c.bf16 %v3092_v46, %v3091_v35  ;;  %v3396_v29 = vld [vmem:[#allocation48] sm:$0x7] }
0x1599   :  { %v7769_v51 = vpop.eup %7768 }
0x159a   :  { %v2853_v48 = vpop.xlane.xlu1 %2852  ;;  %v7771_v47 = vpop.eup %7770  ;;  %v2867_v20 = vmul.f32 %v7769_v51, %v7755_v18  ;;  %v9986_v18 = vld [vmem:[%s10524_s3 + $0x10] sm:$0xff] }
0x159b   :  { %7776 = vrcp.f32 %v2853_v48  ;;  %v2868_v27 = vmul.f32 %v7771_v47, %v7753_v7  ;;  %v3310_v48 = vld [vmem:[#allocation31] sm:$0x7]  ;;  %v3489_v47 = vld [vmem:[#allocation27 + $0x8] sm:$0xff] }
0x159e   :  { %v7691_v2 = vpop.permute.xlu1 %7690  ;;  %v2856_v5 = vpop.xlane.xlu0 %2855 }
0x159f   :  { %v7693_v16 = vunpack.i.h.bf16 %v7691_v2  ;;  %v7692_v42 = vunpack.i.l.bf16 %v7691_v2  ;;  %7778 = vrcp.f32 %v2856_v5  ;;  %v10011_v2 = vld [vmem:[%s10530_s4] sm:$0xff] }
0x15a0   :  { %v3094_v5 = vld [vmem:[#allocation43 + $0x18] sm:$0xff] }
0x15a1   :  { %v7327_v32 = vpack.c.bf16 %v7693_v16, %v7692_v42  ;;  %v7773_v30 = vpop.eup %7772  ;;  %v7875_v16 = vld [vmem:[%s10521_s25 + $0x8] sm:$0xff]  ;;  %v3093_v42 = vld [vmem:[#allocation43 + $0x10] sm:$0xff] }
0x15a2   :  { %v7775_v49 = vpop.eup %7774  ;;  %v2869_v40 = vmul.f32 %v7773_v30, %v7759_v14  ;;  %v7359_v51 = vpack.c.bf16 %v3094_v5, %v3093_v42  ;;  %v6253_v30 = vld [vmem:[#allocation30] ss:$0 sm:$0xff]  ;;  %v3575_v42 = vld [vmem:[#allocation28 + $0x10] sm:$0xff]  ;;  %v3576_v5 = vld [vmem:[#allocation28 + $0x18] sm:$0xff] }
0x15a3   :  { %7328 = vmatprep.subr.bf16.mxu0 %v7327_v32  ;;  %v2870_v34 = vmul.f32 %v7775_v49, %v7757_v41 }
0x15a4   :  { %7330 = vmatpush3.bf16.msra.mxu0 %v7327_v32 }
0x15a5   :  { %v7777_v10 = vpop.eup %7776  ;;  %7348 = vmatprep.subr.bf16.mxu0 %v7347_v22 }
0x15a6   :  { %v2871_v44 = vmul.f32 %v7777_v10, %v7761_v50  ;;  %v3491_v10 = vld [vmem:[#allocation27 + $0x18] sm:$0xff] }
0x15a7   :  { %6875 = vmatmul.mubr.msk.f32.vlgmr.msra.gmra.mrb[34].mxu0 %vm1137_vm5, %v2866_v4  ;;  %v3488_v4 = vld [vmem:[#allocation27] sm:$0xff] }
0x15a8   :  { %6877 = vmatprep.mubr.msk.f32.mxu0 %vm1137_vm5, %v2867_v20  ;;  %7350 = vmatpush3.bf16.msra.mxu0 %v7347_v22  ;;  %v6257_v22 = vld [vmem:[#allocation46] ss:$0 sm:$0xff] }
0x15a9   :  { %v7779_v43 = vpop.eup %7778  ;;  %7352 = vmatprep.subr.bf16.mxu0 %v7351_v54 }
0x15aa   :  { %v2872_v8 = vmul.f32 %v7779_v43, %v7763_v15 }
0x15ab   :  { %6878 = vmatmul.mubr.msk.f32.gmra.mrb[36].mxu0 %vm1137_vm5, %v2868_v27  ;;  %v7363_v27 = vpack.c.bf16 %v3489_v47, %v3488_v4 }
0x15ac   :  { %6880 = vmatprep.mubr.msk.f32.mxu0 %vm1137_vm5, %v2869_v40  ;;  %7354 = vmatpush3.bf16.msra.mxu0 %v7351_v54  ;;  %v3490_v40 = vld [vmem:[#allocation27 + $0x10] sm:$0xff]  ;;  %v3661_v54 = vld [vmem:[%s10531_s16 + $0x18] sm:$0xff] }
0x15ad   :  { %7356 = vmatprep.subr.bf16.mxu0 %v7355_v28  ;;  %v7367_v43 = vpack.c.bf16 %v3491_v10, %v3490_v40 }
0x15af   :  { %6881 = vmatmul.mubr.msk.f32.gmra.mrb[38].mxu0 %vm1137_vm5, %v2870_v34 }
0x15b0   :  { %6883 = vmatprep.mubr.msk.f32.mxu0 %vm1137_vm5, %v2871_v44  ;;  %v3658_v44 = vld [vmem:[%s10531_s16] sm:$0xff] }
0x15b3   :  { %6884 = vmatmul.mubr.msk.f32.gmra.mrb[40].mxu0 %vm1137_vm5, %v2872_v8  ;;  %v3659_v8 = vld [vmem:[%s10531_s16 + $0x8] sm:$0xff] }
0x15b4   :  { %v7379_v26 = vpack.c.bf16 %v3659_v8, %v3658_v44  ;;  %v6252_v44 = vld [vmem:[#allocation40] ss:$0 sm:$0xff] }
0x167a   :  { %v6876_v61 = vpop.f32.mrb[34].mxu0 }
0x167b   :  { %v3009_v63 = vmul.f32 %v9974_v62, %v6876_v61  ;;  %v2969_v0 = vpop.f32.mrb[35].mxu0 }
0x167c   :  { %v3008_v6 = vmul.f32 %v9978_v1, %v2969_v0  ;;  %v7383_v0 = vpack.c.bf16 %v3661_v54, %v3660_v60  ;;  %v10059_v54 = vld [vmem:[%s9344_s24] sm:$0xff] }
0x167e   :  { %v7331_v7 = vpack.c.bf16 %v3009_v63, %v3008_v6  ;;  %v6879_v39 = vpop.f32.mrb[36].mxu0 }
0x167f   :  { %v3011_v13 = vmul.f32 %v9982_v37, %v6879_v39  ;;  %v2979_v11 = vpop.f32.mrb[37].mxu0 }
0x1680   :  { %v3010_v55 = vmul.f32 %v9986_v18, %v2979_v11  ;;  %7332 = vmatprep.subr.bf16.mxu1 %v7331_v7 }
0x1681   :  { %7334 = vmatpush3.bf16.msra.mxu1 %v7331_v7  ;;  %v6250_v7 = vld [vmem:[%s10532_s22] ss:$0 sm:$0xff] }
0x1682   :  { %v7335_v19 = vpack.c.bf16 %v3011_v13, %v3010_v55  ;;  %v6882_v56 = vpop.f32.mrb[38].mxu0 }
0x1683   :  { %v3013_v41 = vmul.f32 %v9990_v57, %v6882_v56  ;;  %v2989_v9 = vpop.f32.mrb[39].mxu0 }
0x1684   :  { %v3012_v14 = vmul.f32 %v9994_v24, %v2989_v9  ;;  %7336 = vmatprep.subr.bf16.mxu1 %v7335_v19 }
0x1685   :  { %7338 = vmatpush3.bf16.msra.mxu1 %v7335_v19 }
0x1686   :  { %v7339_v25 = vpack.c.bf16 %v3013_v41, %v3012_v14  ;;  %v6885_v50 = vpop.f32.mrb[40].mxu0 }
0x1687   :  { %v3015_v15 = vmul.f32 %v9998_v53, %v6885_v50  ;;  %v2999_v17 = vpop.f32.mrb[41].mxu0 }
0x1688   :  { %v3014_v23 = vmul.f32 %v10002_v21, %v2999_v17  ;;  %7340 = vmatprep.subr.bf16.mxu1 %v7339_v25 }
0x1689   :  { %7342 = vmatpush3.bf16.msra.mxu1 %v7339_v25 }
0x168a   :  { %v7343_v36 = vpack.c.bf16 %v3015_v15, %v3014_v23 }
0x168c   :  { %7344 = vmatprep.subr.bf16.mxu1 %v7343_v36 }
0x168d   :  { %7346 = vmatpush3.bf16.msra.mxu1 %v7343_v36 }
0x168e   :  { %6927 = vmatprep.subr.msk.mxu1 %vm894_vm1, %v3310_v48 }
0x1690   :  { %6903 = vmatmul.mubr.msk.f32.vlgmr.msra.gmra.mrb[26].mxu1 %vm1665_vm7, %v9836_v12  ;;  %v10021_v12 = vld [vmem:[%s10530_s4 + $0x8] sm:$0xff] }
0x1691   :  { %6929 = vmatprep.mubr.msk.f32.mxu1 %vm887_vm3, %v7874_v31  ;;  %6928 = vmatpush3.msk.msra.mxu1 %vm894_vm1, %v3310_v48  ;;  %v3573_v48 = vld [vmem:[#allocation28] sm:$0xff] }
0x1692   :  { %6932 = vmatprep.subr.msk.mxu1 %vm894_vm1, %v3396_v29 }
0x1694   :  { %6930 = vmatmul.mubr.msk.f32.vlgmr.msra.gmra.mrb[28].mxu1 %vm887_vm3, %v7875_v16 }
0x1695   :  { %6933 = vmatpush3.msk.msra.mxu1 %vm894_vm1, %v3396_v29  ;;  %6934 = vmatprep.mubr.msk.f32.mxu1 %vm887_vm3, %v10011_v2  ;;  %v3574_v29 = vld [vmem:[#allocation28 + $0x8] sm:$0xff] }
0x1696   :  { %7364 = vmatprep.subr.bf16.mxu1 %v7363_v27  ;;  %v7371_v16 = vpack.c.bf16 %v3574_v29, %v3573_v48 }
0x1698   :  { %6935 = vmatmul.mubr.msk.f32.vlgmr.msra.gmra.mrb[30].mxu1 %vm887_vm3, %v10021_v12 }
0x1699   :  { %7366 = vmatpush3.bf16.msra.mxu1 %v7363_v27 }
0x169a   :  { %7368 = vmatprep.subr.bf16.mxu1 %v7367_v43 }
0x169d   :  { %7370 = vmatpush3.bf16.msra.mxu1 %v7367_v43 }
0x169e   :  { %7380 = vmatprep.subr.bf16.mxu1 %v7379_v26 }
0x1763   :  { %v6904_v32 = vpop.f32.mrb[26].mxu1 }
0x1764   :  { %v3082_v33 = vpop.f32.mrb[27].mxu1 }
0x1765   :  { %6913 = vmatprep.mubr.msk.f32.mxu0 %vm982_vm4, %v3082_v33  ;;  %v7375_v33 = vpack.c.bf16 %v3576_v5, %v3575_v42 }
0x1766   :  { %6914 = vmatmul.mubr.msk.f32.vlgmr.msra.gmra.mrb[42].mxu0 %vm982_vm4, %v6904_v32 }
0x1767   :  { %7358 = vmatpush3.bf16.msra.mxu0 %v7355_v28  ;;  %6924 = vmatprep.mubr.msk.f32.mxu0 %vm982_vm4, %v9883_v38  ;;  %v6931_v20 = vpop.f32.mrb[28].mxu1 }
0x1768   :  { %7360 = vmatprep.subr.bf16.mxu0 %v7359_v51  ;;  %v3387_v49 = vpop.f32.mrb[29].mxu1  ;;  %v3393_v61 = vadd.f32 %v6931_v20, %v6253_v30 }
0x1769   :  { %v3388_v34 = vadd.f32 %v6253_v30, %v3387_v49 }
0x176b   :  { %7362 = vmatpush3.bf16.msra.mxu0 %v7359_v51  ;;  %v6936_v45 = vpop.f32.mrb[30].mxu1  ;;  %6945 = vmatprep.mubr.msk.f32.mxu1 %vm982_vm4, %v3388_v34  ;;  %v6251_v34 = vld [vmem:[#allocation42] ss:$0 sm:$0xff] }
0x176c   :  { %v3479_v59 = vpop.f32.mrb[31].mxu1  ;;  %6946 = vmatmul.mubr.msk.f32.vlgmr.msra.gmra.mrb[32].mxu1 %vm982_vm4, %v3393_v61  ;;  %v10041_v6 = vadd.f32 %v6936_v45, %v6257_v22  ;;  %7372 = vmatprep.subr.bf16.mxu0 %v7371_v16  ;;  %v10064_v61 = vld [vmem:[%s9344_s24 + $0x8] sm:$0xff] }
0x176d   :  { %v10036_v63 = vadd.f32 %v6257_v22, %v3479_v59  ;;  %7382 = vmatpush3.bf16.msra.mxu1 %v7379_v26 }
0x176e   :  { %6925 = vmatmul.mubr.msk.f32.vlgmr.msra.gmra.mrb[42].mxu0 %vm982_vm4, %v9887_v3  ;;  %7384 = vmatprep.subr.bf16.mxu1 %v7383_v0 }
0x176f   :  { %6967 = vmatprep.mubr.msk.f32.mxu1 %vm982_vm4, %v10036_v63  ;;  %7374 = vmatpush3.bf16.msra.mxu0 %v7371_v16  ;;  %v10115_v16 = vld [vmem:[%s10526_s30] sm:$0xff] }
0x1770   :  { %7376 = vmatprep.subr.bf16.mxu0 %v7375_v33 }
0x1771   :  { %7386 = vmatpush3.bf16.msra.mxu1 %v7383_v0  ;;  %v10069_v0 = vld [vmem:[%s9344_s24 + $0x10] sm:$0xff] }
0x1773   :  { %7378 = vmatpush3.bf16.msra.mxu0 %v7375_v33 }
0x1774   :  { %6968 = vmatmul.mubr.msk.f32.vlgmr.msra.gmra.mrb[34].mxu1 %vm982_vm4, %v10041_v6 }
0x183f   :  { %v6947_v46 = vpop.f32.mrb[32].mxu1 }
0x1841   :  { %v6926_v39 = vpop.f32.mrb[42].mxu0 }
0x1842   :  { %v3246_v13 = vpop.f32.mrb[43].mxu0  ;;  %v3263_v11 = vadd.f32 %v6926_v39, %v6250_v7  ;;  %v10079_v39 = vld [vmem:[%s9344_s24 + $0x20] sm:$0xff] }
0x1843   :  { %v3262_v55 = vadd.f32 %v6250_v7, %v3246_v13  ;;  %v10074_v7 = vld [vmem:[%s9344_s24 + $0x18] sm:$0xff]  ;;  %v10084_v13 = vld [vmem:[%s9344_s24 + $0x28] sm:$0xff] }
0x1844   :  { %v3265_v41 = vadd.f32 %v3263_v11, %v9887_v3  ;;  %v3564_v3 = vpop.f32.mrb[33].mxu1  ;;  %v10089_v11 = vld [vmem:[%s9344_s24 + $0x30] sm:$0xff] }
0x1845   :  { %v3264_v19 = vadd.f32 %v3262_v55, %v9883_v38  ;;  %v7391_v28 = vpack.c.bf16 %v6947_v46, %v3564_v3  ;;  %v10094_v55 = vld [vmem:[%s9344_s24 + $0x38] sm:$0xff]  ;;  %s10533_s24 = sld [smem:[#allocation95_spill]] }
0x1846   :  { %v3269_v9 = vsel %vm982_vm4, %v3265_v41, 0.0 }
0x1847   :  { %v3266_v56 = vsel %vm982_vm4, %v3264_v19, 0.0  ;;  %7393 = vmatprep.subr.msk.bf16.mxu1 %vm9665_vm6, %v7391_v28  ;;  %v6969_v32 = vpop.f32.mrb[34].mxu1 }
0x1848   :  { %3267 = vadd.xlane.f32.xlu0 %v3266_v56  ;;  %7396 = vmatpush3.bf16.xpose.msk.msra.mxu1 %vm9665_vm6, %v7391_v28  ;;  %v3734_v51 = vpop.f32.mrb[35].mxu1 }
0x1849   :  { %v7387_v4 = vpack.c.bf16 %v6969_v32, %v3734_v51  ;;  %v10120_v51 = vld [vmem:[%s10525_s11 + $0x8] sm:$0xff] }
0x184b   :  { %7388 = vmatprep.subr.bf16.mxu0 %v7387_v4 }
0x184c   :  { %3270 = vadd.xlane.f32.xlu0 %v3269_v9 }
0x18d5   :  { %v3268_v14 = vpop.xlane.xlu0 %3267 }
0x18d6   :  { %v3272_v25 = vmul.f32 0.03125, %v3268_v14 }
0x18d8   :  { %v3274_v50 = vsub.f32 %v3264_v19, %v3272_v25 }
0x18d9   :  { %v3271_v15 = vpop.xlane.xlu0 %3270 }
0x18da   :  { %v3273_v17 = vmul.f32 0.03125, %v3271_v15  ;;  %v3276_v23 = vmul.f32 %v3274_v50, %v3274_v50 }
0x18dc   :  { %v3275_v36 = vsub.f32 %v3265_v41, %v3273_v17  ;;  %v3278_v31 = vsel %vm982_vm4, %v3276_v23, 0.0 }
0x18dd   :  { %3279 = vadd.xlane.f32.xlu0 %v3278_v31 }
0x18de   :  { %v3277_v35 = vmul.f32 %v3275_v36, %v3275_v36 }
0x18e0   :  { %v3281_v38 = vsel %vm982_vm4, %v3277_v35, 0.0 }
0x18e1   :  { %3282 = vadd.xlane.f32.xlu0 %v3281_v38 }
0x196a   :  { %v3280_v47 = vpop.xlane.xlu0 %3279 }
0x196b   :  { %v3284_v20 = vmul.f32 0.03125, %v3280_v47 }
0x196d   :  { %v3286_v30 = vadd.f32 1e-05, %v3284_v20  ;;  %v10124_v20 = vld [vmem:[%s10525_s11] sm:$0xff] }
0x196e   :  { %v3283_v27 = vpop.xlane.xlu0 %3282 }
0x196f   :  { %7780 = vrsqrt.f32 %v3286_v30  ;;  %v3285_v49 = vmul.f32 0.03125, %v3283_v27 }
0x1971   :  { %v3287_v40 = vadd.f32 1e-05, %v3285_v49 }
0x1973   :  { %7782 = vrsqrt.f32 %v3287_v40 }
0x1979   :  { %v7781_v10 = vpop.eup %7780 }
0x197a   :  { %v3290_v43 = vmul.f32 %v7781_v10, %v3274_v50 }
0x197c   :  { %v3299_v8 = vmul.f32 %v6251_v34, %v3290_v43  ;;  %v10130_v43 = vld [vmem:[%s10525_s11 + $0x18] sm:$0xff] }
0x197d   :  { %v7783_v45 = vpop.eup %7782 }
0x197e   :  { %v3291_v59 = vmul.f32 %v7783_v45, %v3275_v36  ;;  %v3308_v26 = vadd.f32 %v6252_v44, %v3299_v8 }
0x1980   :  { %v3300_v22 = vmul.f32 %v6251_v34, %v3291_v59  ;;  %6956 = vmatprep.mubr.msk.f32.mxu0 %vm982_vm4, %v3308_v26 }
0x1982   :  { %v3309_v60 = vadd.f32 %v6252_v44, %v3300_v22  ;;  %v10135_v22 = vld [vmem:[%s10525_s11 + $0x10] sm:$0xff] }
0x1984   :  { %6957 = vmatmul.mubr.msk.f32.vlgmr.msra.gmra.mrb[44].mxu0 %vm982_vm4, %v3309_v60 }
0x1985   :  { %7390 = vmatpush3.bf16.msra.mxu0 %v7387_v4  ;;  %6974 = vmatprep.mubr.msk.f32.mxu0 %vm1137_vm5, %v10059_v54 }
0x1988   :  { %6975 = vmatmul.mubr.msk.f32.vlgmr.msra.gmra.mrb[46].mxu0 %vm1137_vm5, %v10064_v61 }
0x1989   :  { %6977 = vmatprep.mubr.msk.f32.mxu0 %vm1137_vm5, %v10069_v0 }
0x198c   :  { %6978 = vmatmul.mubr.msk.f32.gmra.mrb[48].mxu0 %vm1137_vm5, %v10074_v7 }
0x198d   :  { %6980 = vmatprep.mubr.msk.f32.mxu0 %vm1137_vm5, %v10079_v39 }
0x1990   :  { %6981 = vmatmul.mubr.msk.f32.gmra.mrb[50].mxu0 %vm1137_vm5, %v10084_v13 }
0x1991   :  { %6983 = vmatprep.mubr.msk.f32.mxu0 %vm1137_vm5, %v10089_v11 }
0x1994   :  { %6984 = vmatmul.mubr.msk.f32.gmra.mrb[52].mxu0 %vm1137_vm5, %v10094_v55 }
0x1a57   :  { %v6958_v19 = vpop.f32.mrb[44].mxu0 }
0x1a58   :  { %v3649_v56 = vpop.f32.mrb[45].mxu0 }
0x1a59   :  { %v7397_v41 = vpack.c.bf16 %v6958_v19, %v3649_v56 }
0x1a5b   :  { %v6976_v9 = vpop.f32.mrb[46].mxu0  ;;  %7398 = vmatprep.subr.bf16.mxu0 %v7397_v41 }
0x1a5c   :  { %v3809_v14 = vpop.f32.mrb[47].mxu0  ;;  %7400 = vmatpush3.bf16.msra.mxu0 %v7397_v41  ;;  %v3849_v50 = vmul.f32 %v9974_v62, %v6976_v9 }
0x1a5d   :  { %v3848_v25 = vmul.f32 %v9978_v1, %v3809_v14  ;;  %v10140_v14 = vld [vmem:[%s10525_s11 + $0x28] sm:$0xff] }
0x1a5f   :  { %v6979_v15 = vpop.f32.mrb[48].mxu0  ;;  %6990 = vmatprep.mubr.msk.f32.mxu1 %vm982_vm4, %v3848_v25 }
0x1a60   :  { %v3851_v17 = vmul.f32 %v9982_v37, %v6979_v15  ;;  %v3819_v23 = vpop.f32.mrb[49].mxu0  ;;  %6991 = vmatmul.mubr.msk.f32.vlgmr.msra.gmra.mrb[36].mxu1 %vm982_vm4, %v3849_v50 }
0x1a61   :  { %v3850_v36 = vmul.f32 %v9986_v18, %v3819_v23 }
0x1a63   :  { %6993 = vmatprep.mubr.msk.f32.mxu1 %vm982_vm4, %v3850_v36  ;;  %v6982_v31 = vpop.f32.mrb[50].mxu0 }
0x1a64   :  { %6994 = vmatmul.mubr.msk.f32.gmra.mrb[38].mxu1 %vm982_vm4, %v3851_v17  ;;  %v3853_v35 = vmul.f32 %v9990_v57, %v6982_v31  ;;  %v3829_v38 = vpop.f32.mrb[51].mxu0  ;;  %v10145_v17 = vld [vmem:[%s10525_s11 + $0x20] sm:$0xff] }
0x1a65   :  { %v3852_v46 = vmul.f32 %v9994_v24, %v3829_v38 }
0x1a67   :  { %6996 = vmatprep.mubr.msk.f32.mxu1 %vm982_vm4, %v3852_v46  ;;  %v6985_v3 = vpop.f32.mrb[52].mxu0 }
0x1a68   :  { %6997 = vmatmul.mubr.msk.f32.gmra.mrb[40].mxu1 %vm982_vm4, %v3853_v35  ;;  %v3855_v28 = vmul.f32 %v9998_v53, %v6985_v3  ;;  %v3839_v48 = vpop.f32.mrb[53].mxu0  ;;  %v10150_v35 = vld [vmem:[%s10525_s11 + $0x30] sm:$0xff]  ;;  %v10155_v3 = vld [vmem:[%s10525_s11 + $0x38] sm:$0xff] }
0x1a69   :  { %v3854_v29 = vmul.f32 %v10002_v21, %v3839_v48 }
0x1a6b   :  { %6999 = vmatprep.mubr.msk.f32.mxu1 %vm982_vm4, %v3854_v29 }
0x1a6c   :  { %7000 = vmatmul.mubr.msk.f32.gmra.mrb[42].mxu1 %vm982_vm4, %v3855_v28 }
0x1a6d   :  { %7034 = vmatprep.mubr.msk.f32.mxu1 %vm1665_vm7, %v10115_v16 }
0x1b33   :  { %v6992_v42 = vpop.f32.mrb[36].mxu1 }
0x1b34   :  { %v3992_v5 = vmul.f32 0.35355338, %v6992_v42  ;;  %v3952_v32 = vpop.f32.mrb[37].mxu1 }
0x1b35   :  { %v3991_v33 = vmul.f32 0.35355338, %v3952_v32 }
0x1b36   :  { %v4000_v4 = vadd.f32 %v10120_v51, %v3992_v5 }
0x1b37   :  { %v6995_v47 = vpop.f32.mrb[38].mxu1  ;;  %v3999_v30 = vadd.f32 %v10124_v20, %v3991_v33 }
0x1b38   :  { %v3994_v27 = vmul.f32 0.35355338, %v6995_v47  ;;  %v3962_v49 = vpop.f32.mrb[39].mxu1  ;;  %v4010_v40 = vsel %vm1137_vm5, %v4000_v4, -inf }
0x1b39   :  { %v3993_v10 = vmul.f32 0.35355338, %v3962_v49  ;;  %4011 = vmax.xlane.f32.xlu1 %v4010_v40  ;;  %v4007_v34 = vsel %vm1137_vm5, %v3999_v30, -inf }
0x1b3a   :  { %4008 = vmax.xlane.f32.xlu0 %v4007_v34  ;;  %v4002_v44 = vadd.f32 %v10130_v43, %v3994_v27 }
0x1b3b   :  { %v6998_v8 = vpop.f32.mrb[40].mxu1  ;;  %v4001_v60 = vadd.f32 %v10135_v22, %v3993_v10 }
0x1b3c   :  { %v4016_v45 = vsel %vm1137_vm5, %v4002_v44, -inf  ;;  %v3972_v59 = vpop.f32.mrb[41].mxu1  ;;  %v3996_v26 = vmul.f32 0.35355338, %v6998_v8 }
0x1b3d   :  { %v3995_v41 = vmul.f32 0.35355338, %v3972_v59  ;;  %v4013_v9 = vsel %vm1137_vm5, %v4001_v60, -inf }
0x1b3e   :  { %4017 = vmax.xlane.f32.xlu0 %v4016_v45  ;;  %v4004_v25 = vadd.f32 %v10140_v14, %v3996_v26 }
0x1b3f   :  { %v7001_v19 = vpop.f32.mrb[42].mxu1  ;;  %v4003_v23 = vadd.f32 %v10145_v17, %v3995_v41 }
0x1b40   :  { %v3982_v56 = vpop.f32.mrb[43].mxu1  ;;  %v4022_v15 = vsel %vm1137_vm5, %v4004_v25, -inf  ;;  %v3998_v36 = vmul.f32 0.35355338, %v7001_v19 }
0x1b41   :  { %v3997_v50 = vmul.f32 0.35355338, %v3982_v56  ;;  %v4019_v31 = vsel %vm1137_vm5, %v4003_v23, -inf }
0x1b42   :  { %4014 = vmax.xlane.f32.xlu0 %v4013_v9  ;;  %v4006_v28 = vadd.f32 %v10155_v3, %v3998_v36 }
0x1b43   :  { %v4005_v38 = vadd.f32 %v10150_v35, %v3997_v50 }
0x1b44   :  { %v4028_v48 = vsel %vm1137_vm5, %v4006_v28, -inf }
0x1b45   :  { %v4025_v46 = vsel %vm1137_vm5, %v4005_v38, -inf }
0x1b46   :  { %4023 = vmax.xlane.f32.xlu0 %v4022_v15 }
0x1b4a   :  { %4020 = vmax.xlane.f32.xlu0 %v4019_v31 }
0x1b4e   :  { %4026 = vmax.xlane.f32.xlu0 %v4025_v46 }
0x1b52   :  { %4029 = vmax.xlane.f32.xlu0 %v4028_v48 }
0x1bc6   :  { %v4012_v29 = vpop.xlane.xlu1 %4011 }
0x1bc7   :  { %v4032_v42 = vsub.f32 %v4000_v4, %v4012_v29  ;;  %v4009_v5 = vpop.xlane.xlu0 %4008 }
0x1bc8   :  { %v4031_v32 = vsub.f32 %v3999_v30, %v4009_v5 }
0x1bc9   :  { %v4041_v33 = vmul.f32 1.442695, %v4032_v42 }
0x1bca   :  { %v4039_v47 = vmul.f32 1.442695, %v4031_v32 }
0x1bcb   :  { %7784 = vpow2.f32 %v4041_v33  ;;  %v4018_v27 = vpop.xlane.xlu0 %4017 }
0x1bcc   :  { %v4034_v49 = vsub.f32 %v4002_v44, %v4018_v27  ;;  %7786 = vpow2.f32 %v4039_v47  ;;  %v6205_v47 = vld [vmem:[#allocation63] ss:$0 sm:$0xff] }
0x1bcd   :  { %v2206_v27 = vadd.f32 %v6205_v47, %v9881_v58 }
0x1bce   :  { %v4045_v40 = vmul.f32 1.442695, %v4034_v49 }
0x1bcf   :  { %v4015_v10 = vpop.xlane.xlu0 %4014 }
0x1bd0   :  { %7788 = vpow2.f32 %v4045_v40  ;;  %v4033_v34 = vsub.f32 %v4001_v60, %v4015_v10 }
0x1bd2   :  { %v4043_v8 = vmul.f32 1.442695, %v4033_v34 }
0x1bd3   :  { %v4024_v45 = vpop.xlane.xlu0 %4023 }
0x1bd4   :  { %7790 = vpow2.f32 %v4043_v8  ;;  %v4036_v59 = vsub.f32 %v4004_v25, %v4024_v45 }
0x1bd5   :  { %v7785_v26 = vpop.eup %7784 }
0x1bd6   :  { %v4049_v19 = vmul.f32 1.442695, %v4036_v59  ;;  %v4058_v4 = vsel %vm1137_vm5, %v7785_v26, 0.0  ;;  %v7787_v56 = vpop.eup %7786 }
0x1bd7   :  { %v4021_v30 = vpop.xlane.xlu0 %4020  ;;  %4059 = vadd.xlane.f32.xlu0 %v4058_v4  ;;  %v4055_v50 = vsel %vm1137_vm5, %v7787_v56, 0.0 }
0x1bd8   :  { %7792 = vpow2.f32 %v4049_v19  ;;  %v4035_v41 = vsub.f32 %v4003_v23, %v4021_v30 }
0x1bda   :  { %v7789_v9 = vpop.eup %7788  ;;  %v4047_v44 = vmul.f32 1.442695, %v4035_v41 }
0x1bdb   :  { %4056 = vadd.xlane.f32.xlu0 %v4055_v50  ;;  %v4027_v15 = vpop.xlane.xlu0 %4026  ;;  %v4064_v60 = vsel %vm1137_vm5, %v7789_v9, 0.0 }
0x1bdc   :  { %7794 = vpow2.f32 %v4047_v44  ;;  %v4037_v36 = vsub.f32 %v4005_v38, %v4027_v15  ;;  %4065 = vadd.xlane.f32.xlu1 %v4064_v60 }
0x1bde   :  { %v7791_v25 = vpop.eup %7790  ;;  %v4051_v31 = vmul.f32 1.442695, %v4037_v36 }
0x1bdf   :  { %v4030_v46 = vpop.xlane.xlu0 %4029  ;;  %v4061_v48 = vsel %vm1137_vm5, %v7791_v25, 0.0 }
0x1be0   :  { %7796 = vpow2.f32 %v4051_v31  ;;  %v4038_v29 = vsub.f32 %v4006_v28, %v4030_v46  ;;  %4062 = vadd.xlane.f32.xlu0 %v4061_v48  ;;  %v2210_v28 = vmul.f32 0.5, %v2206_v27 }
0x1be2   :  { %v7793_v23 = vpop.eup %7792  ;;  %v4053_v42 = vmul.f32 1.442695, %v4038_v29  ;;  %v2211_v34 = vmul.f32 1.442695, %v2210_v28  ;;  %v2209_v29 = vld [vmem:[%s10533_s24] sm:$0x3] }
0x1be3   :  { %v4070_v5 = vsel %vm1137_vm5, %v7793_v23, 0.0 }
0x1be4   :  { %7798 = vpow2.f32 %v4053_v42  ;;  %4071 = vadd.xlane.f32.xlu1 %v4070_v5 }
0x1be5   :  { %7800 = vpow2.f32 %v2211_v34 }
0x1be6   :  { %v7795_v32 = vpop.eup %7794 }
0x1be7   :  { %v4067_v33 = vsel %vm1137_vm5, %v7795_v32, 0.0 }
0x1be8   :  { %4068 = vadd.xlane.f32.xlu0 %v4067_v33 }
0x1bea   :  { %v7797_v38 = vpop.eup %7796 }
0x1beb   :  { %v4073_v49 = vsel %vm1137_vm5, %v7797_v38, 0.0 }
0x1bec   :  { %4074 = vadd.xlane.f32.xlu0 %v4073_v49 }
0x1bee   :  { %v7799_v40 = vpop.eup %7798 }
0x1bef   :  { %v4076_v10 = vsel %vm1137_vm5, %v7799_v40, 0.0  ;;  %v7801_v8 = vpop.eup %7800 }
0x1bf0   :  { %4077 = vadd.xlane.f32.xlu1 %v4076_v10 }
0x1c02   :  { %2214 = vrot.lane.b32.xlu0 %v7801_v8, %s9027_s14 }
0x1c64   :  { %v4060_v45 = vpop.xlane.xlu0 %4059 }
0x1c65   :  { %7802 = vrcp.f32 %v4060_v45 }
0x1c68   :  { %v4057_v59 = vpop.xlane.xlu0 %4056 }
0x1c69   :  { %7804 = vrcp.f32 %v4057_v59  ;;  %v4066_v19 = vpop.xlane.xlu1 %4065 }
0x1c6a   :  { %7806 = vrcp.f32 %v4066_v19 }
0x1c6d   :  { %v4063_v58 = vpop.xlane.xlu0 %4062 }
0x1c6e   :  { %7808 = vrcp.f32 %v4063_v58 }
0x1c6f   :  { %v7803_v4 = vpop.eup %7802 }
0x1c70   :  { %v4088_v50 = vmul.f32 %v7803_v4, %v7785_v26 }
0x1c71   :  { %v4072_v30 = vpop.xlane.xlu1 %4071 }
0x1c72   :  { %7810 = vrcp.f32 %v4072_v30 }
0x1c73   :  { %v7805_v41 = vpop.eup %7804 }
0x1c74   :  { %v4087_v44 = vmul.f32 %v7805_v41, %v7787_v56  ;;  %v7807_v60 = vpop.eup %7806 }
0x1c75   :  { %v4069_v15 = vpop.xlane.xlu0 %4068  ;;  %v4090_v48 = vmul.f32 %v7807_v60, %v7789_v9 }
0x1c76   :  { %7812 = vrcp.f32 %v4069_v15  ;;  %7006 = vmatprep.mubr.msk.f32.mxu0 %vm1137_vm5, %v4087_v44  ;;  %v4311_v15 = vld [vmem:[#allocation24] sm:$0xff] }
0x1c77   :  { %7007 = vmatmul.mubr.msk.f32.vlgmr.msra.gmra.mrb[54].mxu0 %vm1137_vm5, %v4088_v50 }
0x1c78   :  { %v7809_v36 = vpop.eup %7808 }
0x1c79   :  { %v4075_v31 = vpop.xlane.xlu0 %4074  ;;  %v4089_v46 = vmul.f32 %v7809_v36, %v7791_v25 }
0x1c7a   :  { %7814 = vrcp.f32 %v4075_v31 }
0x1c7b   :  { %7009 = vmatprep.mubr.msk.f32.mxu0 %vm1137_vm5, %v4089_v46  ;;  %v4313_v46 = vld [vmem:[#allocation24 + $0x10] sm:$0xff] }
0x1c7c   :  { %7010 = vmatmul.mubr.msk.f32.gmra.mrb[56].mxu0 %vm1137_vm5, %v4090_v48  ;;  %v7811_v5 = vpop.eup %7810  ;;  %v4314_v48 = vld [vmem:[#allocation24 + $0x18] sm:$0xff] }
0x1c7d   :  { %v4078_v56 = vpop.xlane.xlu1 %4077  ;;  %v2215_v26 = vpop.permute.xlu0 %2214  ;;  %v4092_v28 = vmul.f32 %v7811_v5, %v7793_v23 }
0x1c7e   :  { %7816 = vrcp.f32 %v4078_v56  ;;  %v2217_v42 = vmul.f32 %v2215_v26, %v2209_v29  ;;  %v4308_v29 = vld [vmem:[#allocation25 + $0x8] sm:$0xff]  ;;  %v4309_v56 = vld [vmem:[#allocation25 + $0x10] sm:$0xff]  ;;  %v4310_v26 = vld [vmem:[#allocation25 + $0x18] sm:$0xff] }
0x1c80   :  { %v7813_v33 = vpop.eup %7812  ;;  %v2218_v47 = vadd.f32 %v2217_v42, %v2206_v27 }
0x1c81   :  { %v4091_v49 = vmul.f32 %v7813_v33, %v7795_v32  ;;  %v7429_v33 = vpack.c.bf16 %v4310_v26, %v4309_v56  ;;  %v4966_v26 = vld [vmem:[%s10536_s13] sm:$0xff] }
0x1c82   :  { %7059 = vmatprep.subr.msk.mxu0 %vm808_vm0, %v2218_v47 }
0x1c83   :  { %7012 = vmatprep.mubr.msk.f32.mxu0 %vm1137_vm5, %v4091_v49  ;;  %7060 = vmatpush3.msk.msra.mxu0 %vm808_vm0, %v2218_v47  ;;  %v4526_v47 = vld [vmem:[%s9354_s21] sm:$0xff]  ;;  %v4527_v49 = vld [vmem:[%s9354_s21 + $0x8] sm:$0xff]  ;;  %s10534_s21 = sld [smem:[#allocation99_spill]] }
0x1c84   :  { %v7815_v9 = vpop.eup %7814  ;;  %7013 = vmatmul.mubr.msk.f32.gmra.mrb[58].mxu0 %vm1137_vm5, %v4092_v28  ;;  %v4612_v28 = vld [vmem:[#allocation9] sm:$0x7] }
0x1c85   :  { %v4093_v25 = vmul.f32 %v7815_v9, %v7797_v38  ;;  %7064 = vmatprep.subr.msk.mxu0 %vm894_vm1, %v4612_v28  ;;  %v6299_v9 = vld [vmem:[#allocation19] ss:$0 sm:$0xff] }
0x1c87   :  { %7015 = vmatprep.mubr.msk.f32.mxu0 %vm1137_vm5, %v4093_v25 }
0x1c88   :  { %v7817_v10 = vpop.eup %7816 }
0x1c89   :  { %v4094_v34 = vmul.f32 %v7817_v10, %v7799_v40 }
0x1c8b   :  { %7016 = vmatmul.mubr.msk.f32.gmra.mrb[60].mxu0 %vm1137_vm5, %v4094_v34 }
0x1c8c   :  { %7061 = vmatprep.mubr.msk.f32.mxu0 %vm801_vm2, %v4526_v47  ;;  %v4969_v47 = vld [vmem:[%s10536_s13 + $0x18] sm:$0xff] }
0x1c8f   :  { %7062 = vmatmul.mubr.msk.f32.vlgmr.msra.gmra.mrb[62].mxu0 %vm801_vm2, %v4527_v49 }
0x1c90   :  { %7065 = vmatpush3.msk.msra.mxu0 %vm894_vm1, %v4612_v28  ;;  %7066 = vmatprep.mubr.msk.f32.mxu0 %vm887_vm3, %v10011_v2  ;;  %v4970_v28 = vld [vmem:[%s10536_s13 + $0x20] sm:$0xff] }
0x1c93   :  { %7067 = vmatmul.mubr.msk.f32.vlgmr.msra.gmra.mrb[64].mxu0 %vm887_vm3, %v10021_v12 }
0x1d4a   :  { %v7008_v8 = vpop.f32.mrb[54].mxu0 }
0x1d4b   :  { %v4225_v32 = vmul.f32 %v9974_v62, %v7008_v8  ;;  %v4185_v27 = vpop.f32.mrb[55].mxu0 }
0x1d4c   :  { %v4224_v23 = vmul.f32 %v9978_v1, %v4185_v27 }
0x1d4e   :  { %v7401_v45 = vpack.c.bf16 %v4225_v32, %v4224_v23 }
0x1d4f   :  { %v7011_v59 = vpop.f32.mrb[56].mxu0 }
0x1d50   :  { %v4227_v19 = vmul.f32 %v9982_v37, %v7011_v59  ;;  %v4195_v58 = vpop.f32.mrb[57].mxu0  ;;  %7402 = vmatprep.subr.bf16.mxu1 %v7401_v45 }
0x1d51   :  { %v4226_v38 = vmul.f32 %v9986_v18, %v4195_v58  ;;  %7404 = vmatpush3.bf16.msra.mxu1 %v7401_v45  ;;  %v4312_v18 = vld [vmem:[#allocation24 + $0x8] sm:$0xff] }
0x1d52   :  { %v7417_v31 = vpack.c.bf16 %v4312_v18, %v4311_v15  ;;  %v4698_v18 = vld [vmem:[%s10535_s23] sm:$0xff] }
0x1d53   :  { %v7405_v4 = vpack.c.bf16 %v4227_v19, %v4226_v38 }
0x1d55   :  { %7406 = vmatprep.subr.bf16.mxu1 %v7405_v4 }
0x1d56   :  { %7408 = vmatpush3.bf16.msra.mxu1 %v7405_v4 }
0x1d57   :  { %v7014_v40 = vpop.f32.mrb[58].mxu0 }
0x1d58   :  { %v4229_v30 = vmul.f32 %v9990_v57, %v7014_v40  ;;  %v4205_v41 = vpop.f32.mrb[59].mxu0  ;;  %v7421_v57 = vpack.c.bf16 %v4314_v48, %v4313_v46  ;;  %v4701_v46 = vld [vmem:[%s10535_s23 + $0x18] sm:$0xff] }
0x1d59   :  { %v4228_v62 = vmul.f32 %v9994_v24, %v4205_v41  ;;  %v10189_v24 = vld [vmem:[%s10526_s30 + $0x8] sm:$0xff] }
0x1d5a   :  { %v4703_v41 = vld [vmem:[%s10534_s21 + $0x8] sm:$0xff] }
0x1d5b   :  { %v7409_v44 = vpack.c.bf16 %v4229_v30, %v4228_v62  ;;  %v4702_v30 = vld [vmem:[%s10534_s21] sm:$0xff] }
0x1d5c   :  { %v7433_v62 = vpack.c.bf16 %v4703_v41, %v4702_v30  ;;  %v6301_v30 = vld [vmem:[#allocation21] ss:$0 sm:$0xff] }
0x1d5d   :  { %7410 = vmatprep.subr.bf16.mxu1 %v7409_v44 }
0x1d5e   :  { %v7017_v1 = vpop.f32.mrb[60].mxu0  ;;  %7412 = vmatpush3.bf16.msra.mxu1 %v7409_v44  ;;  %7434 = vmatprep.subr.bf16.mxu0 %v7433_v62  ;;  %v4704_v44 = vld [vmem:[%s10534_s21 + $0x10] sm:$0xff] }
0x1d5f   :  { %v4231_v37 = vmul.f32 %v9998_v53, %v7017_v1  ;;  %v4215_v50 = vpop.f32.mrb[61].mxu0  ;;  %v4307_v53 = vld [vmem:[#allocation25] sm:$0xff]  ;;  %7436 = vmatpush3.bf16.msra.mxu0 %v7433_v62 }
0x1d60   :  { %v4230_v60 = vmul.f32 %v10002_v21, %v4215_v50  ;;  %v7425_v21 = vpack.c.bf16 %v4308_v29, %v4307_v53  ;;  %v4705_v1 = vld [vmem:[%s10534_s21 + $0x18] sm:$0xff]  ;;  %v4869_v53 = vld [vmem:[#allocation7 + $0x8] sm:$0xff] }
0x1d62   :  { %v7413_v36 = vpack.c.bf16 %v4231_v37, %v4230_v60  ;;  %v7437_v37 = vpack.c.bf16 %v4705_v1, %v4704_v44  ;;  %v7063_v50 = vpop.f32.mrb[62].mxu0  ;;  %v4699_v60 = vld [vmem:[%s10535_s23 + $0x8] sm:$0xff] }
0x1d63   :  { %v4603_v15 = vpop.f32.mrb[63].mxu0 }
0x1d64   :  { %7414 = vmatprep.subr.bf16.mxu1 %v7413_v36  ;;  %7438 = vmatprep.subr.bf16.mxu0 %v7437_v37 }
0x1d65   :  { %7416 = vmatpush3.bf16.msra.mxu1 %v7413_v36  ;;  %7440 = vmatpush3.bf16.msra.mxu0 %v7437_v37  ;;  %v7441_v36 = vpack.c.bf16 %v4699_v60, %v4698_v18  ;;  %v6305_v37 = vld [vmem:[#allocation6] ss:$0 sm:$0xff] }
0x1d66   :  { %7418 = vmatprep.subr.bf16.mxu1 %v7417_v31  ;;  %7077 = vmatprep.mubr.msk.f32.mxu0 %vm982_vm4, %v4603_v15  ;;  %v4871_v15 = vld [vmem:[#allocation7 + $0x18] sm:$0xff] }
0x1d67   :  { %7442 = vmatprep.subr.bf16.mxu0 %v7441_v36 }
0x1d68   :  { %7035 = vmatmul.mubr.msk.f32.vlgmr.msra.gmra.mrb[44].mxu1 %vm1665_vm7, %v10189_v24  ;;  %7078 = vmatmul.mubr.msk.f32.vlgmr.msra.gmra.mrb[66].mxu0 %vm982_vm4, %v7063_v50  ;;  %v4870_v50 = vld [vmem:[#allocation7 + $0x10] sm:$0xff] }
0x1d69   :  { %7420 = vmatpush3.bf16.msra.mxu1 %v7417_v31  ;;  %7444 = vmatpush3.bf16.msra.mxu0 %v7441_v36  ;;  %v4700_v31 = vld [vmem:[%s10535_s23 + $0x10] sm:$0xff] }
0x1d6a   :  { %7422 = vmatprep.subr.bf16.mxu1 %v7421_v57  ;;  %v7445_v48 = vpack.c.bf16 %v4701_v46, %v4700_v31  ;;  %v7453_v31 = vpack.c.bf16 %v4871_v15, %v4870_v50  ;;  %v4977_v46 = vld [vmem:[%s10536_s13 + $0x58] sm:$0xff] }
0x1d6b   :  { %v10313_v15 = vld [vmem:[%s10524_s3 + $0x38] sm:$0xff] }
0x1d6c   :  { %7446 = vmatprep.subr.bf16.mxu0 %v7445_v48 }
0x1d6d   :  { %7424 = vmatpush3.bf16.msra.mxu1 %v7421_v57  ;;  %7448 = vmatpush3.bf16.msra.mxu0 %v7445_v48  ;;  %v4868_v57 = vld [vmem:[#allocation7] sm:$0xff] }
0x1d6e   :  { %7426 = vmatprep.subr.bf16.mxu1 %v7425_v21  ;;  %v7449_v29 = vpack.c.bf16 %v4869_v53, %v4868_v57  ;;  %v5067_v57 = vld [vmem:[#allocation18] sm:$0xff]  ;;  %v5068_v53 = vld [vmem:[#allocation18 + $0x8] sm:$0xff] }
0x1d70   :  { %7450 = vmatprep.subr.bf16.mxu0 %v7449_v29 }
0x1e3b   :  { %v7036_v42 = vpop.f32.mrb[44].mxu1 }
0x1e3c   :  { %v4298_v5 = vpop.f32.mrb[45].mxu1 }
0x1e3d   :  { %7045 = vmatprep.mubr.msk.f32.mxu1 %vm982_vm4, %v4298_v5  ;;  %v4968_v5 = vld [vmem:[%s10536_s13 + $0x10] sm:$0xff] }
0x1e3e   :  { %7046 = vmatmul.mubr.msk.f32.vlgmr.msra.gmra.mrb[46].mxu1 %vm982_vm4, %v7036_v42  ;;  %v4967_v42 = vld [vmem:[%s10536_s13 + $0x8] sm:$0xff]  ;;  %v7461_v49 = vpack.c.bf16 %v4969_v47, %v4968_v5 }
0x1e3f   :  { %7428 = vmatpush3.bf16.msra.mxu1 %v7425_v21  ;;  %7056 = vmatprep.mubr.msk.f32.mxu1 %vm982_vm4, %v10036_v63  ;;  %v7068_v21 = vpop.f32.mrb[64].mxu0 }
0x1e40   :  { %7430 = vmatprep.subr.bf16.mxu1 %v7429_v33  ;;  %v4689_v56 = vpop.f32.mrb[65].mxu0 }
0x1e41   :  { %v4690_v60 = vadd.f32 %v6305_v37, %v4689_v56  ;;  %v7481_v56 = vpack.c.bf16 %v5068_v53, %v5067_v57 }
0x1e43   :  { %7432 = vmatpush3.bf16.msra.mxu1 %v7429_v33  ;;  %v7457_v33 = vpack.c.bf16 %v4967_v42, %v4966_v26  ;;  %v6315_v26 = vld [vmem:[#allocation2] ss:$0 sm:$0xff] }
0x1e45   :  { %7458 = vmatprep.subr.bf16.mxu1 %v7457_v33 }
0x1e46   :  { %7057 = vmatmul.mubr.msk.f32.vlgmr.msra.gmra.mrb[46].mxu1 %vm982_vm4, %v10041_v6 }
0x1e47   :  { %7460 = vmatpush3.bf16.msra.mxu1 %v7457_v33 }
0x1e48   :  { %7462 = vmatprep.subr.bf16.mxu1 %v7461_v49 }
0x1e4b   :  { %7464 = vmatpush3.bf16.msra.mxu1 %v7461_v49  ;;  %v5069_v49 = vld [vmem:[#allocation18 + $0x10] sm:$0xff] }
0x1f19   :  { %v7058_v25 = vpop.f32.mrb[46].mxu1 }
0x1f1a   :  { %v4462_v10 = vpop.f32.mrb[47].mxu1  ;;  %v4479_v34 = vadd.f32 %v7058_v25, %v6299_v9 }
0x1f1b   :  { %v4478_v8 = vadd.f32 %v6299_v9, %v4462_v10  ;;  %v4971_v9 = vld [vmem:[%s10536_s13 + $0x28] sm:$0xff]  ;;  %v4972_v10 = vld [vmem:[%s10536_s13 + $0x30] sm:$0xff] }
0x1f1c   :  { %v4481_v23 = vadd.f32 %v4479_v34, %v10041_v6  ;;  %v7465_v25 = vpack.c.bf16 %v4971_v9, %v4970_v28  ;;  %v4973_v34 = vld [vmem:[%s10536_s13 + $0x38] sm:$0xff]  ;;  %v5070_v28 = vld [vmem:[#allocation18 + $0x18] sm:$0xff] }
0x1f1d   :  { %v4480_v32 = vadd.f32 %v4478_v8, %v10036_v63  ;;  %v7469_v8 = vpack.c.bf16 %v4973_v34, %v4972_v10  ;;  %v7485_v9 = vpack.c.bf16 %v5070_v28, %v5069_v49 }
0x1f1e   :  { %v4485_v45 = vsel %vm982_vm4, %v4481_v23, 0.0  ;;  %7466 = vmatprep.subr.bf16.mxu1 %v7465_v25 }
0x1f1f   :  { %v4482_v27 = vsel %vm982_vm4, %v4480_v32, 0.0  ;;  %7468 = vmatpush3.bf16.msra.mxu1 %v7465_v25  ;;  %v6316_v25 = vld [vmem:[#allocation4] ss:$0 sm:$0xff] }
0x1f20   :  { %4483 = vadd.xlane.f32.xlu1 %v4482_v27  ;;  %v4975_v27 = vld [vmem:[%s10536_s13 + $0x48] sm:$0xff]  ;;  %7470 = vmatprep.subr.bf16.mxu1 %v7469_v8 }
0x1f23   :  { %7472 = vmatpush3.bf16.msra.mxu1 %v7469_v8 }
0x1f24   :  { %4486 = vadd.xlane.f32.xlu1 %v4485_v45 }
0x1fad   :  { %v4484_v2 = vpop.xlane.xlu1 %4483 }
0x1fae   :  { %v4488_v59 = vmul.f32 0.03125, %v4484_v2 }
0x1fb0   :  { %v10213_v12 = vsub.f32 %v4480_v32, %v4488_v59  ;;  %v4974_v32 = vld [vmem:[%s10536_s13 + $0x40] sm:$0xff] }
0x1fb1   :  { %v4487_v19 = vpop.xlane.xlu1 %4486 }
0x1fb2   :  { %v4489_v58 = vmul.f32 0.03125, %v4487_v19  ;;  %v4492_v63 = vmul.f32 %v10213_v12, %v10213_v12 }
0x1fb4   :  { %v10217_v38 = vsub.f32 %v4481_v23, %v4489_v58  ;;  %v4494_v6 = vsel %vm982_vm4, %v4492_v63, 0.0  ;;  %v7473_v23 = vpack.c.bf16 %v4975_v27, %v4974_v32 }
0x1fb5   :  { %4495 = vadd.xlane.f32.xlu1 %v4494_v6 }
0x1fb6   :  { %v4493_v4 = vmul.f32 %v10217_v38, %v10217_v38  ;;  %7474 = vmatprep.subr.bf16.mxu1 %v7473_v23 }
0x1fb7   :  { %7476 = vmatpush3.bf16.msra.mxu1 %v7473_v23 }
0x1fb8   :  { %v4497_v40 = vsel %vm982_vm4, %v4493_v4, 0.0  ;;  %v6300_v4 = vld [vmem:[#allocation22] ss:$0 sm:$0xff] }
0x1fb9   :  { %4498 = vadd.xlane.f32.xlu1 %v4497_v40 }
0x2042   :  { %v4496_v45 = vpop.xlane.xlu1 %4495 }
0x2043   :  { %v4500_v2 = vmul.f32 0.03125, %v4496_v45 }
0x2045   :  { %v4502_v59 = vadd.f32 1e-05, %v4500_v2 }
0x2046   :  { %v4499_v19 = vpop.xlane.xlu1 %4498 }
0x2047   :  { %7818 = vrsqrt.f32 %v4502_v59  ;;  %v4501_v58 = vmul.f32 0.03125, %v4499_v19 }
0x2049   :  { %v4503_v63 = vadd.f32 1e-05, %v4501_v58 }
0x204b   :  { %7820 = vrsqrt.f32 %v4503_v63  ;;  %v10288_v63 = vld [vmem:[%s10524_s3 + $0x8] sm:$0xff] }
0x2051   :  { %v7819_v6 = vpop.eup %7818 }
0x2052   :  { %v4506_v40 = vmul.f32 %v7819_v6, %v10213_v12  ;;  %v4695_v12 = vadd.f32 %v7068_v21, %v6305_v37 }
0x2054   :  { %v4515_v41 = vmul.f32 %v6300_v4, %v4506_v40 }
0x2055   :  { %v7821_v62 = vpop.eup %7820 }
0x2056   :  { %v4507_v44 = vmul.f32 %v7821_v62, %v10217_v38  ;;  %v4524_v1 = vadd.f32 %v6301_v30, %v4515_v41  ;;  %v4976_v38 = vld [vmem:[%s10536_s13 + $0x50] sm:$0xff]  ;;  %v10303_v41 = vld [vmem:[%s10524_s3 + $0x28] sm:$0xff] }
0x2057   :  { %v7477_v48 = vpack.c.bf16 %v4977_v46, %v4976_v38 }
0x2058   :  { %v4516_v18 = vmul.f32 %v6300_v4, %v4507_v44  ;;  %7088 = vmatprep.mubr.msk.f32.mxu0 %vm982_vm4, %v4524_v1  ;;  %v10298_v4 = vld [vmem:[%s10524_s3 + $0x10] sm:$0xff]  ;;  %v10308_v1 = vld [vmem:[%s10524_s3 + $0x20] sm:$0xff] }
0x2059   :  { %7478 = vmatprep.subr.bf16.mxu1 %v7477_v48 }
0x205a   :  { %v4525_v36 = vadd.f32 %v6301_v30, %v4516_v18  ;;  %7480 = vmatpush3.bf16.msra.mxu1 %v7477_v48 }
0x205c   :  { %7089 = vmatmul.mubr.msk.f32.vlgmr.msra.gmra.mrb[66].mxu0 %vm982_vm4, %v4525_v36  ;;  %v10318_v36 = vld [vmem:[%s10524_s3 + $0x30] sm:$0xff] }
0x205d   :  { %7452 = vmatpush3.bf16.msra.mxu0 %v7449_v29  ;;  %7099 = vmatprep.mubr.msk.f32.mxu0 %vm982_vm4, %v4690_v60 }
0x205e   :  { %7454 = vmatprep.subr.bf16.mxu0 %v7453_v31 }
0x2061   :  { %7456 = vmatpush3.bf16.msra.mxu0 %v7453_v31 }
0x2062   :  { %7482 = vmatprep.subr.bf16.mxu0 %v7481_v56 }
0x2064   :  { %7100 = vmatmul.mubr.msk.f32.vlgmr.msra.gmra.mrb[66].mxu0 %vm982_vm4, %v4695_v12 }
0x2065   :  { %7484 = vmatpush3.bf16.msra.mxu0 %v7481_v56 }
0x2066   :  { %7486 = vmatprep.subr.bf16.mxu0 %v7485_v9 }
0x2069   :  { %7488 = vmatpush3.bf16.msra.mxu0 %v7485_v9 }
0x2137   :  { %v7101_v42 = vpop.f32.mrb[66].mxu0 }
0x2138   :  { %v4963_v29 = vadd.f32 %v7101_v42, %v6315_v26  ;;  %v4944_v5 = vpop.f32.mrb[67].mxu0 }
0x2139   :  { %v4962_v33 = vadd.f32 %v6315_v26, %v4944_v5 }
0x213a   :  { %v4965_v21 = vmax.f32 %v4963_v29, 0.0 }
0x213b   :  { %v4964_v47 = vmax.f32 %v4962_v33, 0.0 }
0x213d   :  { %7126 = vmatprep.mubr.msk.f32.mxu1 %vm4985_vm9, %v4964_v47 }
0x213e   :  { %7127 = vmatmul.mubr.msk.f32.vlgmr.msra.gmra.mrb[48].mxu1 %vm4985_vm9, %v4965_v21 }
0x213f   :  { %7144 = vmatprep.mubr.msk.f32.mxu1 %vm1137_vm5, %v10059_v54 }
0x2211   :  { %v7128_v10 = vpop.f32.mrb[48].mxu1 }
0x2212   :  { %v5058_v34 = vpop.f32.mrb[49].mxu1  ;;  %v10255_v32 = vadd.f32 %v7128_v10, %v6316_v25 }
0x2213   :  { %v10253_v8 = vadd.f32 %v6316_v25, %v5058_v34 }
0x2215   :  { %7137 = vmatprep.mubr.msk.f32.mxu0 %vm982_vm4, %v10253_v8 }
0x2216   :  { %7138 = vmatmul.mubr.msk.f32.vlgmr.msra.gmra.mrb[68].mxu0 %vm982_vm4, %v10255_v32 }
0x22e9   :  { %v7139_v27 = vpop.f32.mrb[68].mxu0 }
0x22ea   :  { %v5143_v54 = vpop.f32.mrb[69].mxu0 }
0x22eb   :  { %v10261_v23 = vpack.i.bf16 %v7139_v27, %v5143_v54  ;;  %v7493_v45 = vpack.c.bf16 %v7139_v27, %v5143_v54 }
0x22ed   :  { %7695 = vrot.lane.b32.xlu1 %v10261_v23, %s9026_s19  ;;  %7495 = vmatprep.subr.msk.bf16.mxu0 %vm9665_vm6, %v7493_v45 }
0x22ee   :  { %7498 = vmatpush3.bf16.xpose.msk.msra.mxu0 %vm9665_vm6, %v7493_v45 }
0x235f   :  { %v7696_v2 = vpop.permute.xlu1 %7695 }
0x2360   :  { %v7698_v59 = vunpack.i.h.bf16 %v7696_v2  ;;  %v7697_v19 = vunpack.i.l.bf16 %v7696_v2 }
0x2362   :  { %v7489_v58 = vpack.c.bf16 %v7698_v59, %v7697_v19 }
0x2364   :  { %7490 = vmatprep.subr.bf16.mxu1 %v7489_v58 }
0x2365   :  { %7492 = vmatpush3.bf16.msra.mxu1 %v7489_v58 }
0x2368   :  { %7145 = vmatmul.mubr.msk.f32.vlgmr.msra.gmra.mrb[50].mxu1 %vm1137_vm5, %v10064_v61 }
0x2369   :  { %7147 = vmatprep.mubr.msk.f32.mxu1 %vm1137_vm5, %v10069_v0  ;;  %v10284_v0 = vld [vmem:[%s10524_s3] sm:$0xff] }
0x236c   :  { %7148 = vmatmul.mubr.msk.f32.gmra.mrb[52].mxu1 %vm1137_vm5, %v10074_v7 }
0x236d   :  { %7150 = vmatprep.mubr.msk.f32.mxu1 %vm1137_vm5, %v10079_v39 }
0x2370   :  { %7151 = vmatmul.mubr.msk.f32.gmra.mrb[54].mxu1 %vm1137_vm5, %v10084_v13  ;;  %v10293_v13 = vld [vmem:[%s10524_s3 + $0x18] sm:$0xff] }
0x2371   :  { %7153 = vmatprep.mubr.msk.f32.mxu1 %vm1137_vm5, %v10089_v11 }
0x2374   :  { %7154 = vmatmul.mubr.msk.f32.gmra.mrb[56].mxu1 %vm1137_vm5, %v10094_v55 }
0x243b   :  { %v7146_v52 = vpop.f32.mrb[50].mxu1 }
0x243c   :  { %v5226_v61 = vpop.f32.mrb[51].mxu1  ;;  %v5266_v39 = vmul.f32 %v10288_v63, %v7146_v52 }
0x243d   :  { %v5265_v7 = vmul.f32 %v10284_v0, %v5226_v61 }
0x243f   :  { %v7149_v6 = vpop.f32.mrb[52].mxu1  ;;  %7160 = vmatprep.mubr.msk.f32.mxu0 %vm982_vm4, %v5265_v7 }
0x2440   :  { %v5268_v11 = vmul.f32 %v10293_v13, %v7149_v6  ;;  %v5236_v55 = vpop.f32.mrb[53].mxu1  ;;  %7161 = vmatmul.mubr.msk.f32.vlgmr.msra.gmra.mrb[70].mxu0 %vm982_vm4, %v5266_v39 }
0x2441   :  { %v5267_v40 = vmul.f32 %v10298_v4, %v5236_v55 }
0x2443   :  { %v7152_v30 = vpop.f32.mrb[54].mxu1  ;;  %7163 = vmatprep.mubr.msk.f32.mxu0 %vm982_vm4, %v5267_v40 }
0x2444   :  { %v5270_v62 = vmul.f32 %v10303_v41, %v7152_v30  ;;  %v5246_v44 = vpop.f32.mrb[55].mxu1  ;;  %7164 = vmatmul.mubr.msk.f32.gmra.mrb[72].mxu0 %vm982_vm4, %v5268_v11 }
0x2445   :  { %v5269_v37 = vmul.f32 %v10308_v1, %v5246_v44 }
0x2447   :  { %v7155_v50 = vpop.f32.mrb[56].mxu1  ;;  %7166 = vmatprep.mubr.msk.f32.mxu0 %vm982_vm4, %v5269_v37 }
0x2448   :  { %v5272_v18 = vmul.f32 %v10313_v15, %v7155_v50  ;;  %v5256_v60 = vpop.f32.mrb[57].mxu1  ;;  %7167 = vmatmul.mubr.msk.f32.gmra.mrb[74].mxu0 %vm982_vm4, %v5270_v62 }
0x2449   :  { %v5271_v31 = vmul.f32 %v10318_v36, %v5256_v60 }
0x244b   :  { %7169 = vmatprep.mubr.msk.f32.mxu0 %vm982_vm4, %v5271_v31 }
0x244c   :  { %7170 = vmatmul.mubr.msk.f32.gmra.mrb[76].mxu0 %vm982_vm4, %v5272_v18 }
0x244d   :  { %7204 = vmatprep.mubr.msk.f32.mxu0 %vm1665_vm7, %v10115_v16 }
0x2513   :  { %v7162_v12 = vpop.f32.mrb[70].mxu0 }
0x2514   :  { %v5407_v38 = vmul.f32 0.35355338, %v7162_v12  ;;  %v5367_v46 = vpop.f32.mrb[71].mxu0 }
0x2515   :  { %v5406_v48 = vmul.f32 0.35355338, %v5367_v46 }
0x2516   :  { %v5415_v57 = vadd.f32 %v10120_v51, %v5407_v38 }
0x2517   :  { %v7165_v53 = vpop.f32.mrb[72].mxu0  ;;  %v5414_v56 = vadd.f32 %v10124_v20, %v5406_v48 }
0x2518   :  { %v5409_v26 = vmul.f32 0.35355338, %v7165_v53  ;;  %v5377_v42 = vpop.f32.mrb[73].mxu0  ;;  %v5425_v29 = vsel %vm1137_vm5, %v5415_v57, -inf }
0x2519   :  { %v5408_v5 = vmul.f32 0.35355338, %v5377_v42  ;;  %5426 = vmax.xlane.f32.xlu1 %v5425_v29  ;;  %v5422_v33 = vsel %vm1137_vm5, %v5414_v56, -inf }
0x251a   :  { %5423 = vmax.xlane.f32.xlu0 %v5422_v33  ;;  %v5417_v16 = vadd.f32 %v10130_v43, %v5409_v26 }
0x251b   :  { %v7168_v47 = vpop.f32.mrb[74].mxu0  ;;  %v5416_v51 = vadd.f32 %v10135_v22, %v5408_v5 }
0x251c   :  { %v5431_v21 = vsel %vm1137_vm5, %v5417_v16, -inf  ;;  %v5387_v49 = vpop.f32.mrb[75].mxu0  ;;  %v5411_v28 = vmul.f32 0.35355338, %v7168_v47 }
0x251d   :  { %v5410_v10 = vmul.f32 0.35355338, %v5387_v49  ;;  %v5428_v34 = vsel %vm1137_vm5, %v5416_v51, -inf }
0x251e   :  { %5432 = vmax.xlane.f32.xlu0 %v5431_v21  ;;  %v5419_v27 = vadd.f32 %v10140_v14, %v5411_v28 }
0x251f   :  { %v7171_v20 = vpop.f32.mrb[76].mxu0  ;;  %v5418_v22 = vadd.f32 %v10145_v17, %v5410_v10 }
0x2520   :  { %v5413_v9 = vmul.f32 0.35355338, %v7171_v20  ;;  %v5397_v25 = vpop.f32.mrb[77].mxu0  ;;  %v5437_v2 = vsel %vm1137_vm5, %v5419_v27, -inf }
0x2521   :  { %v5412_v45 = vmul.f32 0.35355338, %v5397_v25  ;;  %v5434_v59 = vsel %vm1137_vm5, %v5418_v22, -inf }
0x2522   :  { %5429 = vmax.xlane.f32.xlu0 %v5428_v34  ;;  %v5421_v54 = vadd.f32 %v10155_v3, %v5413_v9 }
0x2523   :  { %v5420_v19 = vadd.f32 %v10150_v35, %v5412_v45 }
0x2524   :  { %v5443_v43 = vsel %vm1137_vm5, %v5421_v54, -inf }
0x2525   :  { %5444 = vmax.xlane.f32.xlu1 %v5443_v43  ;;  %v5440_v58 = vsel %vm1137_vm5, %v5420_v19, -inf }
0x2526   :  { %5438 = vmax.xlane.f32.xlu0 %v5437_v2 }
0x252a   :  { %5435 = vmax.xlane.f32.xlu0 %v5434_v59 }
0x252e   :  { %5441 = vmax.xlane.f32.xlu0 %v5440_v58 }
0x25a6   :  { %v5427_v14 = vpop.xlane.xlu1 %5426 }
0x25a7   :  { %v5447_v52 = vsub.f32 %v5415_v57, %v5427_v14  ;;  %v5424_v3 = vpop.xlane.xlu0 %5423 }
0x25a8   :  { %v5446_v61 = vsub.f32 %v5414_v56, %v5424_v3 }
0x25a9   :  { %v5456_v7 = vmul.f32 1.442695, %v5447_v52 }
0x25aa   :  { %v5454_v39 = vmul.f32 1.442695, %v5446_v61 }
0x25ab   :  { %7822 = vpow2.f32 %v5456_v7  ;;  %v5433_v6 = vpop.xlane.xlu0 %5432 }
0x25ac   :  { %7824 = vpow2.f32 %v5454_v39  ;;  %v5449_v11 = vsub.f32 %v5417_v16, %v5433_v6 }
0x25ae   :  { %v5460_v17 = vmul.f32 1.442695, %v5449_v11 }
0x25af   :  { %v5430_v55 = vpop.xlane.xlu0 %5429 }
0x25b0   :  { %7826 = vpow2.f32 %v5460_v17  ;;  %v5448_v40 = vsub.f32 %v5416_v51, %v5430_v55 }
0x25b2   :  { %v5458_v30 = vmul.f32 1.442695, %v5448_v40  ;;  %v5445_v35 = vpop.xlane.xlu1 %5444 }
0x25b3   :  { %v5453_v62 = vsub.f32 %v5421_v54, %v5445_v35  ;;  %v5439_v44 = vpop.xlane.xlu0 %5438 }
0x25b4   :  { %7828 = vpow2.f32 %v5458_v30  ;;  %v5451_v37 = vsub.f32 %v5419_v27, %v5439_v44 }
0x25b5   :  { %v10341_v50 = vpop.eup %7822  ;;  %v5468_v60 = vmul.f32 1.442695, %v5453_v62 }
0x25b6   :  { %v7825_v18 = vpop.eup %7824  ;;  %v5464_v31 = vmul.f32 1.442695, %v5451_v37  ;;  %v5473_v12 = vsel %vm1137_vm5, %v10341_v50, 0.0  ;;  %v5732_v37 = vld [vmem:[%s10537_s20] sm:$0xff] }
0x25b7   :  { %v5436_v38 = vpop.xlane.xlu0 %5435  ;;  %5474 = vadd.xlane.f32.xlu1 %v5473_v12  ;;  %v5470_v46 = vsel %vm1137_vm5, %v7825_v18, 0.0 }
0x25b8   :  { %7830 = vpow2.f32 %v5464_v31  ;;  %v5450_v48 = vsub.f32 %v5418_v22, %v5436_v38  ;;  %5471 = vadd.xlane.f32.xlu0 %v5470_v46  ;;  %v5735_v31 = vld [vmem:[%s10537_s20 + $0x18] sm:$0xff] }
0x25b9   :  { %7832 = vpow2.f32 %v5468_v60 }
0x25ba   :  { %v7827_v57 = vpop.eup %7826  ;;  %v5462_v53 = vmul.f32 1.442695, %v5450_v48 }
0x25bb   :  { %v5442_v56 = vpop.xlane.xlu0 %5441  ;;  %v5479_v26 = vsel %vm1137_vm5, %v7827_v57, 0.0 }
0x25bc   :  { %7834 = vpow2.f32 %v5462_v53  ;;  %v5452_v42 = vsub.f32 %v5420_v19, %v5442_v56  ;;  %5480 = vadd.xlane.f32.xlu1 %v5479_v26 }
0x25be   :  { %v7829_v29 = vpop.eup %7828  ;;  %v5466_v5 = vmul.f32 1.442695, %v5452_v42 }
0x25bf   :  { %v5476_v33 = vsel %vm1137_vm5, %v7829_v29, 0.0 }
0x25c0   :  { %7836 = vpow2.f32 %v5466_v5  ;;  %5477 = vadd.xlane.f32.xlu0 %v5476_v33 }
0x25c2   :  { %v7831_v16 = vpop.eup %7830 }
0x25c3   :  { %v5485_v47 = vsel %vm1137_vm5, %v7831_v16, 0.0  ;;  %v7833_v21 = vpop.eup %7832 }
0x25c4   :  { %5486 = vadd.xlane.f32.xlu1 %v5485_v47  ;;  %v5491_v28 = vsel %vm1137_vm5, %v7833_v21, 0.0 }
0x25c6   :  { %v7835_v49 = vpop.eup %7834 }
0x25c7   :  { %v5482_v51 = vsel %vm1137_vm5, %v7835_v49, 0.0 }
0x25c8   :  { %5492 = vadd.xlane.f32.xlu1 %v5491_v28  ;;  %5483 = vadd.xlane.f32.xlu0 %v5482_v51  ;;  %v5729_v51 = vld [vmem:[#allocation16 + $0x8] sm:$0xff] }
0x25ca   :  { %v7837_v20 = vpop.eup %7836 }
0x25cb   :  { %v5488_v9 = vsel %vm1137_vm5, %v7837_v20, 0.0 }
0x25cc   :  { %5489 = vadd.xlane.f32.xlu0 %v5488_v9  ;;  %v5731_v9 = vld [vmem:[#allocation16 + $0x18] sm:$0xff] }
0x25e2   :  { %7700 = vrot.lane.b32.xlu0 %v10261_v23, %s9027_s14 }
0x2644   :  { %v5475_v34 = vpop.xlane.xlu1 %5474 }
0x2645   :  { %v5472_v25 = vpop.xlane.xlu0 %5471 }
0x2646   :  { %7838 = vrcp.f32 %v5472_v25 }
0x2647   :  { %7840 = vrcp.f32 %v5475_v34 }
0x2649   :  { %v5481_v45 = vpop.xlane.xlu1 %5480 }
0x264d   :  { %v5478_v27 = vpop.xlane.xlu0 %5477 }
0x264e   :  { %7842 = vrcp.f32 %v5478_v27 }
0x264f   :  { %7844 = vrcp.f32 %v5481_v45 }
0x2650   :  { %v7839_v10 = vpop.eup %7838 }
0x2651   :  { %v5502_v54 = vmul.f32 %v7839_v10, %v7825_v18  ;;  %v5487_v22 = vpop.xlane.xlu1 %5486  ;;  %v7841_v52 = vpop.eup %7840  ;;  %v5734_v18 = vld [vmem:[%s10537_s20 + $0x10] sm:$0xff] }
0x2652   :  { %v5503_v61 = vmul.f32 %v7841_v52, %v10341_v50  ;;  %v5733_v50 = vld [vmem:[%s10537_s20 + $0x8] sm:$0xff]  ;;  %v7523_v12 = vpack.c.bf16 %v5735_v31, %v5734_v18  ;;  %v6354_v18 = vld [vmem:[#allocation15] ss:$0 sm:$0xff] }
0x2653   :  { %7176 = vmatprep.mubr.msk.f32.mxu1 %vm1137_vm5, %v5502_v54  ;;  %v7519_v60 = vpack.c.bf16 %v5733_v50, %v5732_v37  ;;  %v6355_v31 = vld [vmem:[#allocation13] ss:$0 sm:$0xff] }
0x2655   :  { %v5484_v43 = vpop.xlane.xlu0 %5483  ;;  %v5493_v23 = vpop.xlane.xlu1 %5492 }
0x2656   :  { %7846 = vrcp.f32 %v5484_v43 }
0x2657   :  { %7848 = vrcp.f32 %v5487_v22 }
0x2658   :  { %v7843_v3 = vpop.eup %7842 }
0x2659   :  { %v5490_v2 = vpop.xlane.xlu0 %5489  ;;  %v7845_v7 = vpop.eup %7844  ;;  %v5504_v39 = vmul.f32 %v7843_v3, %v7829_v29 }
0x265a   :  { %7850 = vrcp.f32 %v5490_v2  ;;  %v5505_v11 = vmul.f32 %v7845_v7, %v7827_v57  ;;  %v5947_v7 = vld [vmem:[%s10538_s26] sm:$0xff] }
0x265b   :  { %7852 = vrcp.f32 %v5493_v23 }
0x265d   :  { %v7701_v59 = vpop.permute.xlu0 %7700 }
0x265e   :  { %v7703_v19 = vunpack.i.h.bf16 %v7701_v59  ;;  %v7702_v58 = vunpack.i.l.bf16 %v7701_v59 }
0x2660   :  { %v7499_v14 = vpack.c.bf16 %v7703_v19, %v7702_v58  ;;  %v7847_v6 = vpop.eup %7846 }
0x2661   :  { %v7849_v17 = vpop.eup %7848  ;;  %v5506_v55 = vmul.f32 %v7847_v6, %v7835_v49 }
0x2662   :  { %7500 = vmatprep.subr.bf16.mxu1 %v7499_v14  ;;  %v5507_v30 = vmul.f32 %v7849_v17, %v7831_v16  ;;  %v5950_v17 = vld [vmem:[%s10538_s26 + $0x18] sm:$0xff] }
0x2663   :  { %7502 = vmatpush3.bf16.msra.mxu1 %v7499_v14 }
0x2664   :  { %v7851_v40 = vpop.eup %7850  ;;  %7520 = vmatprep.subr.bf16.mxu1 %v7519_v60 }
0x2665   :  { %v7853_v35 = vpop.eup %7852  ;;  %v5508_v62 = vmul.f32 %v7851_v40, %v7837_v20  ;;  %v5730_v20 = vld [vmem:[#allocation16 + $0x10] sm:$0xff] }
0x2666   :  { %7177 = vmatmul.mubr.msk.f32.vlgmr.msra.gmra.mrb[58].mxu1 %vm1137_vm5, %v5503_v61  ;;  %v5509_v44 = vmul.f32 %v7853_v35, %v7833_v21 }
0x2667   :  { %7179 = vmatprep.mubr.msk.f32.mxu1 %vm1137_vm5, %v5504_v39  ;;  %7522 = vmatpush3.bf16.msra.mxu1 %v7519_v60  ;;  %v5948_v39 = vld [vmem:[%s10538_s26 + $0x8] sm:$0xff] }
0x2668   :  { %7524 = vmatprep.subr.bf16.mxu1 %v7523_v12  ;;  %v7535_v6 = vpack.c.bf16 %v5948_v39, %v5947_v7 }
0x266a   :  { %7180 = vmatmul.mubr.msk.f32.gmra.mrb[60].mxu1 %vm1137_vm5, %v5505_v11  ;;  %v5949_v11 = vld [vmem:[%s10538_s26 + $0x10] sm:$0xff] }
0x266b   :  { %7182 = vmatprep.mubr.msk.f32.mxu1 %vm1137_vm5, %v5506_v55  ;;  %7526 = vmatpush3.bf16.msra.mxu1 %v7523_v12  ;;  %v7539_v55 = vpack.c.bf16 %v5950_v17, %v5949_v11 }
0x266e   :  { %7183 = vmatmul.mubr.msk.f32.gmra.mrb[62].mxu1 %vm1137_vm5, %v5507_v30 }
0x266f   :  { %7185 = vmatprep.mubr.msk.f32.mxu1 %vm1137_vm5, %v5508_v62 }
0x2672   :  { %7186 = vmatmul.mubr.msk.f32.gmra.mrb[64].mxu1 %vm1137_vm5, %v5509_v44 }
0x2739   :  { %v7178_v38 = vpop.f32.mrb[58].mxu1 }
0x273a   :  { %v5646_v46 = vmul.f32 %v10288_v63, %v7178_v38  ;;  %v5606_v48 = vpop.f32.mrb[59].mxu1 }
0x273b   :  { %v5645_v57 = vmul.f32 %v10284_v0, %v5606_v48 }
0x273d   :  { %v7503_v53 = vpack.c.bf16 %v5646_v46, %v5645_v57  ;;  %v7181_v56 = vpop.f32.mrb[60].mxu1 }
0x273e   :  { %v5648_v26 = vmul.f32 %v10293_v13, %v7181_v56  ;;  %v5616_v42 = vpop.f32.mrb[61].mxu1  ;;  %v6356_v56 = vld [vmem:[#allocation10] ss:$0 sm:$0xff] }
0x273f   :  { %v5647_v29 = vmul.f32 %v10298_v4, %v5616_v42  ;;  %7504 = vmatprep.subr.bf16.mxu0 %v7503_v53 }
0x2740   :  { %7506 = vmatpush3.bf16.msra.mxu0 %v7503_v53 }
0x2741   :  { %v7507_v5 = vpack.c.bf16 %v5648_v26, %v5647_v29  ;;  %v7184_v33 = vpop.f32.mrb[62].mxu1 }
0x2742   :  { %v5650_v16 = vmul.f32 %v10303_v41, %v7184_v33  ;;  %v5626_v47 = vpop.f32.mrb[63].mxu1  ;;  %v5728_v41 = vld [vmem:[#allocation16] sm:$0xff] }
0x2743   :  { %v5649_v21 = vmul.f32 %v10308_v1, %v5626_v47  ;;  %7508 = vmatprep.subr.bf16.mxu0 %v7507_v5  ;;  %v7527_v1 = vpack.c.bf16 %v5729_v51, %v5728_v41  ;;  %v6039_v41 = vlaneseq }
0x2744   :  { %7510 = vmatpush3.bf16.msra.mxu0 %v7507_v5 }
0x2745   :  { %v7511_v63 = vpack.c.bf16 %v5650_v16, %v5649_v21  ;;  %v7187_v0 = vpop.f32.mrb[64].mxu1  ;;  %7528 = vmatprep.subr.bf16.mxu1 %v7527_v1  ;;  %v6040_v51 = vand.u32 127, %v6039_v41 }
0x2746   :  { %v5652_v49 = vmul.f32 %v10313_v15, %v7187_v0  ;;  %v5636_v28 = vpop.f32.mrb[65].mxu1  ;;  %v7531_v15 = vpack.c.bf16 %v5731_v9, %v5730_v20 }
0x2747   :  { %v5651_v13 = vmul.f32 %v10318_v36, %v5636_v28  ;;  %7512 = vmatprep.subr.bf16.mxu0 %v7511_v63  ;;  %vm6059_vm10 = vcmp.lt.s32.totalorder %v6040_v51, 2 }
0x2748   :  { %7514 = vmatpush3.bf16.msra.mxu0 %v7511_v63 }
0x2749   :  { %v7515_v4 = vpack.c.bf16 %v5652_v49, %v5651_v13 }
0x274b   :  { %7516 = vmatprep.subr.bf16.mxu0 %v7515_v4 }
0x274c   :  { %7518 = vmatpush3.bf16.msra.mxu0 %v7515_v4 }
0x274d   :  { %7536 = vmatprep.subr.bf16.mxu0 %v7535_v6 }
0x274f   :  { %7205 = vmatmul.mubr.msk.f32.vlgmr.msra.gmra.mrb[78].mxu0 %vm1665_vm7, %v10189_v24  ;;  %v6353_v24 = vld [vmem:[#allocation12] ss:$0 sm:$0xff] }
0x2750   :  { %7538 = vmatpush3.bf16.msra.mxu0 %v7535_v6 }
0x2751   :  { %7540 = vmatprep.subr.bf16.mxu0 %v7539_v55 }
0x2754   :  { %7542 = vmatpush3.bf16.msra.mxu0 %v7539_v55 }
0x2822   :  { %v7206_v25 = vpop.f32.mrb[78].mxu0 }
0x2823   :  { %v5719_v10 = vpop.f32.mrb[79].mxu0 }
0x2824   :  { %7215 = vmatprep.mubr.msk.f32.mxu1 %vm982_vm4, %v5719_v10 }
0x2825   :  { %7216 = vmatmul.mubr.msk.f32.vlgmr.msra.gmra.mrb[66].mxu1 %vm982_vm4, %v7206_v25 }
0x2826   :  { %7530 = vmatpush3.bf16.msra.mxu1 %v7527_v1  ;;  %7226 = vmatprep.mubr.msk.f32.mxu1 %vm982_vm4, %v10253_v8 }
0x2827   :  { %7532 = vmatprep.subr.bf16.mxu1 %v7531_v15 }
0x282a   :  { %7534 = vmatpush3.bf16.msra.mxu1 %v7531_v15 }
0x282d   :  { %7227 = vmatmul.mubr.msk.f32.vlgmr.msra.gmra.mrb[66].mxu1 %vm982_vm4, %v10255_v32 }
0x2900   :  { %v7228_v36 = vpop.f32.mrb[66].mxu1 }
0x2901   :  { %v5883_v34 = vpop.f32.mrb[67].mxu1  ;;  %v5900_v27 = vadd.f32 %v7228_v36, %v6353_v24 }
0x2902   :  { %v5899_v54 = vadd.f32 %v6353_v24, %v5883_v34 }
0x2903   :  { %v5902_v2 = vadd.f32 %v5900_v27, %v10255_v32 }
0x2904   :  { %v5901_v43 = vadd.f32 %v5899_v54, %v10253_v8 }
0x2905   :  { %v5906_v22 = vsel %vm982_vm4, %v5902_v2, 0.0 }
0x2906   :  { %v5903_v45 = vsel %vm982_vm4, %v5901_v43, 0.0 }
0x2907   :  { %5904 = vadd.xlane.f32.xlu1 %v5903_v45 }
0x290b   :  { %5907 = vadd.xlane.f32.xlu1 %v5906_v22 }
0x2994   :  { %v5905_v59 = vpop.xlane.xlu1 %5904 }
0x2995   :  { %v5909_v19 = vmul.f32 0.03125, %v5905_v59 }
0x2997   :  { %v5911_v58 = vsub.f32 %v5901_v43, %v5909_v19 }
0x2998   :  { %v5908_v23 = vpop.xlane.xlu1 %5907 }
0x2999   :  { %v5910_v14 = vmul.f32 0.03125, %v5908_v23  ;;  %v5913_v52 = vmul.f32 %v5911_v58, %v5911_v58 }
0x299b   :  { %v5912_v3 = vsub.f32 %v5902_v2, %v5910_v14  ;;  %v5915_v8 = vsel %vm982_vm4, %v5913_v52, 0.0 }
0x299c   :  { %5916 = vadd.xlane.f32.xlu1 %v5915_v8 }
0x299d   :  { %v5914_v61 = vmul.f32 %v5912_v3, %v5912_v3 }
0x299f   :  { %v5918_v32 = vsel %vm982_vm4, %v5914_v61, 0.0 }
0x29a0   :  { %5919 = vadd.xlane.f32.xlu1 %v5918_v32 }
0x2a29   :  { %v5917_v40 = vpop.xlane.xlu1 %5916 }
0x2a2a   :  { %v5921_v30 = vmul.f32 0.03125, %v5917_v40 }
0x2a2c   :  { %v5923_v35 = vadd.f32 1e-05, %v5921_v30 }
0x2a2d   :  { %v5920_v62 = vpop.xlane.xlu1 %5919 }
0x2a2e   :  { %7854 = vrsqrt.f32 %v5923_v35  ;;  %v5922_v44 = vmul.f32 0.03125, %v5920_v62 }
0x2a30   :  { %v5924_v37 = vadd.f32 1e-05, %v5922_v44 }
0x2a32   :  { %7856 = vrsqrt.f32 %v5924_v37 }
0x2a38   :  { %v7855_v50 = vpop.eup %7854 }
0x2a39   :  { %v5927_v60 = vmul.f32 %v7855_v50, %v5911_v58 }
0x2a3b   :  { %v5936_v12 = vmul.f32 %v6354_v18, %v5927_v60 }
0x2a3c   :  { %v7857_v38 = vpop.eup %7856 }
0x2a3d   :  { %v5928_v46 = vmul.f32 %v7857_v38, %v5912_v3  ;;  %v5945_v48 = vadd.f32 %v6355_v31, %v5936_v12 }
0x2a3f   :  { %v5937_v57 = vmul.f32 %v6354_v18, %v5928_v46  ;;  %7237 = vmatprep.mubr.msk.f32.mxu0 %vm982_vm4, %v5945_v48 }
0x2a41   :  { %v5946_v53 = vadd.f32 %v6355_v31, %v5937_v57 }
0x2a43   :  { %7238 = vmatmul.mubr.msk.f32.vlgmr.msra.gmra.mrb[80].mxu0 %vm982_vm4, %v5946_v53 }
0x2b16   :  { %v7239_v26 = vpop.f32.mrb[80].mxu0 }
0x2b17   :  { %v6036_v42 = vadd.f32 %v7239_v26, %v6356_v56  ;;  %v6030_v29 = vpop.f32.mrb[81].mxu0 }
0x2b18   :  { %v6031_v5 = vadd.f32 %v6356_v56, %v6030_v29 }
0x2b19   :  { %v6044_v33 = vand.u32 2147483647, %v6036_v42  ;;  %v6042_v9 = vmax.f32 %v6036_v42, 0.0 }
0x2b1a   :  { %v6043_v16 = vand.u32 2147483647, %v6031_v5  ;;  %v6041_v10 = vmax.f32 %v6031_v5, 0.0 }
0x2b1b   :  { %v6046_v47 = vsub.f32 0.0, %v6044_v33 }
0x2b1c   :  { %v6045_v21 = vsub.f32 0.0, %v6043_v16 }
0x2b1d   :  { %v6049_v63 = vmul.f32 1.442695, %v6046_v47 }
0x2b1e   :  { %v6047_v0 = vmul.f32 1.442695, %v6045_v21 }
0x2b1f   :  { %7858 = vpow2.f32 %v6049_v63 }
0x2b20   :  { %7860 = vpow2.f32 %v6047_v0 }
0x2b29   :  { %v7859_v49 = vpop.eup %7858 }
0x2b2a   :  { %v7861_v28 = vpop.eup %7860  ;;  %v6052_v13 = vadd.f32 1.0, %v7859_v49 }
0x2b2b   :  { %v6051_v4 = vadd.f32 1.0, %v7861_v28 }
0x2b2c   :  { %7862 = vlog2.f32 %v6052_v13 }
0x2b2d   :  { %7864 = vlog2.f32 %v6051_v4 }
0x2b36   :  { %v7863_v1 = vpop.eup %7862 }
0x2b37   :  { %v7865_v20 = vpop.eup %7864  ;;  %v6056_v25 = vmul.f32 0.6931472, %v7863_v1 }
0x2b38   :  { %v6054_v15 = vmul.f32 0.6931472, %v7865_v20 }
0x2b39   :  { %v6058_v24 = vadd.f32 %v6056_v25, %v6042_v9 }
0x2b3a   :  { %v6057_v36 = vadd.f32 %v6054_v15, %v6041_v10 }
0x2b3b   :  { %v6061_v34 = vsel %vm6059_vm10, %v6036_v42, %v6058_v24 }
0x2b3c   :  { %6064 = vst.msk [vmem:[%s9359_s29 + $0x8] sm:$0xff] %vm6062_vm11, %v6061_v34  ;;  %v6060_v27 = vsel %vm6059_vm10, %v6031_v5, %v6057_v36 }
0x2b3d   :  { %6063 = vst.msk [vmem:[%s9359_s29] sm:$0xff] %vm6062_vm11, %v6060_v27 }
0x2b3e   :  { %6069 = vsyncpa [#allocation3], 1 }
0x2b3f   :  { %6070 = vsyncpa [#allocation5], 1 }
0x2b40   :  { %6071 = vsyncpa [#allocation8], 1 }
0x2b41   :  { %6072 = vsyncpa [#allocation11], 1 }
0x2b42   :  { %6073 = vsyncpa [#allocation14], 1 }
0x2b43   :  { %6074 = vsyncpa [#allocation17], 1 }
0x2b44   :  { %6075 = vsyncpa [#allocation20], 1 }
0x2b45   :  { %6076 = vsyncpa [#allocation23], 1 }
0x2b46   :  { %6077 = vsyncpa [#allocation26], 1 }
0x2b47   :  { %6078 = vsyncpa [#allocation29], 1 }
0x2b48   :  { %6079 = vsyncpa [#allocation32], 1 }
0x2b49   :  { %6080 = vsyncpa [#allocation35], 1 }
0x2b4a   :  { %6081 = vsyncpa [#allocation38], 1 }
0x2b4b   :  { %6082 = vsyncpa [#allocation41], 1 }
0x2b4c   :  { %6083 = vsyncpa [#allocation44], 1 }
0x2b4d   :  { %6084 = vsyncpa [#allocation47], 1 }
0x2b4e   :  { %6085 = vsyncpa [#allocation50], 1 }
0x2b4f   :  { %6086 = vsyncpa [#allocation53], 1 }
0x2b50   :  { %6087 = vsyncpa [#allocation56], 1 }
0x2b51   :  { %6088 = vsyncpa [#allocation59], 1 }
0x2b52   :  { %6089 = vsyncpa [#allocation62], 1 }
0x2b53   :  { %6090 = vsyncpa [#allocation65], 1 }
0x2b54   :  { %6091 = vsyncpa [#allocation68], 1 }

</bundles_post_ra>
